<compile_context>
chip_gen: v7x
topology: tpu7x:2x2x1
jax: 0.10.0
libtpu: 0.0.40
codegen_flags: <defaults>
</compile_context>

<pallas_src>
import functools

import jax
import jax.numpy as jnp
from jax import lax
from jax.experimental import pallas as pl
from jax.experimental.pallas import tpu as pltpu

BN_EPS = 1e-5


# ----------------------------------------------------------------------------
# Fused Pallas kernel (one batch element per grid step, everything stays in VMEM)
# ----------------------------------------------------------------------------
def _aspp_fused_kernel(x_ref, mask_ref, w0_ref, b0_ref, wb_ref, bb_ref,
                       wf_ref, bf_ref, o_ref, cat_ref,
                       *, H, W, Cin, F, Cf, rates, P, Wp):
    """Fused ASPP forward for one batch element (channel-first, flat spatial).

    x_ref    : (1, Cin, Hp*Wp)  zero-padded input, flattened over (Hp, Wp)
    mask_ref : (1, Hp*Wp)       1.0 at valid (H,W) pixels, 0.0 at the padding halo
    w0_ref   : (F, Cin)         GAP-branch 1x1 conv weights (BN scale folded)
    b0_ref   : (F, 1)           GAP-branch folded bias
    wb_ref   : (nb*9, F, Cin)   dilated-branch per-tap weights (scale folded)
    bb_ref   : (nb, F, 1)       dilated-branch folded biases
    wf_ref   : (9, Cf, Ccat)    final conv per-tap weights (scale folded)
    bf_ref   : (Cf, 1)          final folded bias
    o_ref    : (1, Cf, H*Wp)    lane-dense output (valid rows, padded width)
    cat_ref  : (Ccat, Hp*Wp)    scratch: channel-first concat feature map
    """
    nb = len(rates)
    Ccat = (nb + 1) * F
    HW = H * W
    f0 = P * Wp + P              # flat index of the first valid pixel
    L = (H - 1) * Wp + W         # branch-compute span (first..last valid pixel)
    r0 = P * Wp                  # flat index of the first valid row
    Lr = H * Wp                  # final-conv / output span (all valid rows)

    x = x_ref[0]                              # (Cin, Hp*Wp)
    mask = mask_ref[:, f0:f0 + L]             # (1, L)

    # Zero ONLY the two border strips the final conv reads but the branches do not
    # write. Done every grid step (scratch persists; each TensorCore owns its copy).
    lo = (P - 2) * Wp
    hi = (P + H + 2) * Wp
    cat_ref[:, lo:f0] = jnp.zeros((Ccat, f0 - lo), jnp.float32)
    cat_ref[:, f0 + L:hi] = jnp.zeros((Ccat, hi - (f0 + L)), jnp.float32)

    # ---- branch0: global average pool -> 1x1 conv -> ReLU -> broadcast ------------
    # Padding is zero, so summing the padded block equals summing the valid region.
    gap = jnp.sum(x, axis=1, keepdims=True) * (1.0 / HW)                   # (Cin, 1)
    y0 = jnp.dot(w0_ref[...], gap, preferred_element_type=jnp.float32)     # (F, 1)
    y0 = jnp.maximum(y0 + b0_ref[...], 0.0)
    cat_ref[0:F, f0:f0 + L] = y0 * mask       # lane-dense broadcast store (F, L)

    # ---- branches 1..nb: 3x3 dilated conv == 9 shifted lane-window matmuls --------
    for i, d in enumerate(rates):
        acc = jnp.zeros((F, L), jnp.float32)
        for ky in range(3):
            for kx in range(3):
                s = (ky - 1) * d * Wp + (kx - 1) * d          # static flat shift
                acc = acc + jnp.dot(wb_ref[i * 9 + ky * 3 + kx],
                                    x[:, f0 + s:f0 + s + L],
                                    preferred_element_type=jnp.float32)    # (F, L)
        y = jnp.maximum(acc + bb_ref[i], 0.0) * mask
        cat_ref[(i + 1) * F:(i + 2) * F, f0:f0 + L] = y       # lane-dense store

    # ---- final 3x3 conv (dilation 1) over the concat feature map -------------------
    # Computed over all valid rows (incl. width-halo garbage columns, sliced off in
    # the wrapper) so the HBM store is one full lane-aligned block write.
    acc = jnp.zeros((Cf, Lr), jnp.float32)
    for ky in range(3):
        for kx in range(3):
            s = (ky - 1) * Wp + (kx - 1)
            acc = acc + jnp.dot(wf_ref[ky * 3 + kx],
                                cat_ref[:, r0 + s:r0 + s + Lr],
                                preferred_element_type=jnp.float32)        # (Cf, Lr)
    # Dropout(p=proba) is identity in eval mode.
    # TODO(synk): training-mode stochastic dropout (pltpu.prng_*) not emitted.
    o_ref[0] = jnp.maximum(acc + bf_ref[...], 0.0).astype(o_ref.dtype)


# ----------------------------------------------------------------------------
# Wrapper: fold BN, transpose weights per tap, single pallas_call
# ----------------------------------------------------------------------------
def aspp_forward(x_nchw, params, rates):
    N, Cin, H, W = x_nchw.shape
    rates = tuple(int(r) for r in rates)
    nb = len(rates)
    P = max(max(rates), 2)           # shared halo (>=2 so d=1 final-conv taps stay in-bounds)
    Hp, Wp = H + 2 * P, W + 2 * P

    # Layout plumbing (not compute hoisting): zero-pad once and flatten (Hp, Wp)
    # so every conv tap inside the kernel is a contiguous lane window.
    x = x_nchw.astype(jnp.float32)
    xflat = jnp.pad(x, ((0, 0), (0, 0), (P, P), (P, P))).reshape(N, Cin, Hp * Wp)
    mask = jnp.zeros((Hp, Wp), jnp.float32).at[P:P + H, P:P + W].set(1.0)
    mask = mask.reshape(1, Hp * Wp)

    # Fold BN scale into conv weights once at trace time (kernel only adds bias).
    w0, s0, b0 = params["b0"]
    F = w0.shape[-1]
    Ccat = (nb + 1) * F
    w0t = jnp.transpose(w0 * s0).astype(jnp.float32)                     # (F, Cin)
    b0c = b0.reshape(F, 1).astype(jnp.float32)

    wb_l, bb_l = [], []
    for i in range(1, nb + 1):
        w, s, b, r = params[f"b{i}"]
        assert int(r) == rates[i - 1]
        wt = jnp.transpose((w * s).reshape(9, Cin, F), (0, 2, 1))        # (9, F, Cin)
        wb_l.append(wt)
        bb_l.append(b.reshape(F, 1))
    wb = jnp.stack(wb_l).reshape(nb * 9, F, Cin).astype(jnp.float32)     # (nb*9, F, Cin)
    bb = jnp.stack(bb_l).astype(jnp.float32)                             # (nb, F, 1)

    wfin, sfin, bfin = params["final"]
    Cf = wfin.shape[-1]
    wft = jnp.transpose((wfin * sfin).reshape(9, Ccat, Cf), (0, 2, 1)).astype(jnp.float32)
    bft = bfin.reshape(Cf, 1).astype(jnp.float32)                        # (Cf, 1)

    kern = functools.partial(_aspp_fused_kernel, H=H, W=W, Cin=Cin, F=F, Cf=Cf,
                             rates=rates, P=P, Wp=Wp)

    out = pl.pallas_call(
        kern,
        out_shape=jax.ShapeDtypeStruct((N, Cf, H * Wp), jnp.float32),
        grid=(N,),
        in_specs=[
            pl.BlockSpec((1, Cin, Hp * Wp), lambda n: (n, 0, 0)),
            pl.BlockSpec((1, Hp * Wp), lambda n: (0, 0)),
            pl.BlockSpec((F, Cin), lambda n: (0, 0)),
            pl.BlockSpec((F, 1), lambda n: (0, 0)),
            pl.BlockSpec((nb * 9, F, Cin), lambda n: (0, 0, 0)),
            pl.BlockSpec((nb, F, 1), lambda n: (0, 0, 0)),
            pl.BlockSpec((9, Cf, Ccat), lambda n: (0, 0, 0)),
            pl.BlockSpec((Cf, 1), lambda n: (0, 0)),
        ],
        out_specs=pl.BlockSpec((1, Cf, H * Wp), lambda n: (n, 0, 0)),
        scratch_shapes=[pltpu.VMEM((Ccat, Hp * Wp), jnp.float32)],
        compiler_params=pltpu.CompilerParams(
            dimension_semantics=("parallel",),
            vmem_limit_bytes=48 * 1024 * 1024),
    )(xflat, mask, w0t, b0c, wb, bb, wft, bft)

    # Channel-first output; drop the width halo columns and un-flatten (free-ish slice).
    return out.reshape(N, Cf, H, Wp)[:, :, :, P:P + W]


# ----------------------------------------------------------------------------
# Parameter construction (deterministic, synthetic) + BN folding (eval mode)
# ----------------------------------------------------------------------------
def _fold_bn(gamma, beta, mean, var, conv_bias):
    s = gamma / jnp.sqrt(var + BN_EPS)
    b = beta - mean * s + conv_bias * s
    return s, b


def build_params(key, cin, filters, rates, out_filters=32):
    params = {}
    ks = iter(jax.random.split(key, 64))

    def conv_bn(c_in, c_out, kh, kw):
        w = jax.random.normal(next(ks), (kh, kw, c_in, c_out), jnp.float32) * 0.1
        cb = jax.random.normal(next(ks), (c_out,), jnp.float32) * 0.05
        gamma = jax.random.uniform(next(ks), (c_out,), jnp.float32, 0.5, 1.5)
        beta = jax.random.normal(next(ks), (c_out,), jnp.float32) * 0.1
        mean = jnp.zeros((c_out,), jnp.float32)   # fresh BN running stats
        var = jnp.ones((c_out,), jnp.float32)
        s, b = _fold_bn(gamma, beta, mean, var, cb)
        return w, s, b

    # branch0: 1x1 conv
    w0, s0, b0 = conv_bn(cin, filters, 1, 1)
    params["b0"] = (w0[0, 0], s0, b0)            # (Cin, F)
    # branches 1..nb: 3x3 dilated convs
    for i, r in enumerate(rates, start=1):
        w, s, b = conv_bn(cin, filters, 3, 3)
        params[f"b{i}"] = (w, s, b, int(r))
    # final 3x3 conv -> out_filters channels
    wf, sf, bf = conv_bn(filters * (len(rates) + 1), out_filters, 3, 3)
    params["final"] = (wf, sf, bf)
    return params


# ----------------------------------------------------------------------------
# Pure-JAX reference for a correctness check
# ----------------------------------------------------------------------------
def _ref_conv_bn_relu(x, w, s, b, d):
    y = lax.conv_general_dilated(
        x, w, window_strides=(1, 1), padding=[(d, d), (d, d)],
        rhs_dilation=(d, d), dimension_numbers=("NHWC", "HWIO", "NHWC"))
    return jnp.maximum(y * s + b, 0.0)


def ref_forward(x_nchw, params, rates):
    x = jnp.transpose(x_nchw, (0, 2, 3, 1)).astype(jnp.float32)
    N, H, W, _ = x.shape
    w0, s0, b0 = params["b0"]
    g = jnp.mean(x, axis=(1, 2))                                  # (N, Cin)
    y0 = jnp.maximum(jnp.dot(g, w0) * s0 + b0, 0.0)               # (N, F)
    y0 = jnp.broadcast_to(y0[:, None, None, :], (N, H, W, w0.shape[-1]))
    outs = [y0]
    for i in range(1, len(rates) + 1):
        w, s, b, r = params[f"b{i}"]
        outs.append(_ref_conv_bn_relu(x, w, s, b, r))
    cat = jnp.concatenate(outs, axis=-1)
    wf, sf, bf = params["final"]
    out = _ref_conv_bn_relu(cat, wf, sf, bf, 1)
    return jnp.transpose(out, (0, 3, 1, 2))


# ----------------------------------------------------------------------------
if __name__ == "__main__":
    key = jax.random.PRNGKey(0)
    k_x, k_p = jax.random.split(key)

    N, C, H, W = 2, 4, 16, 16
    filters = 8
    rates = (1, 2, 3, 4)

    x = jax.random.normal(k_x, (N, C, H, W), jnp.float32)
    params = build_params(k_p, C, filters, rates, out_filters=32)

    out = jax.block_until_ready(aspp_forward(x, params, rates))
    assert out.shape == (N, 32, H, W), out.shape

    ref = jax.block_until_ready(ref_forward(x, params, rates))
    err = float(jnp.max(jnp.abs(out - ref)))
    assert jnp.allclose(out, ref, atol=2e-4, rtol=2e-4), err

    print("KERNEL_OK")
</pallas_src>

<mosaic_0001>
module attributes {stable_mosaic.version = 11 : i64} {
  func.func @_aspp_fused_kernel(%arg0: i32, %arg1: memref<1x4x576xf32, #tpu.memory_space<vmem>>, %arg2: memref<1x576xf32, #tpu.memory_space<vmem>>, %arg3: memref<8x4xf32, #tpu.memory_space<vmem>>, %arg4: memref<8x1xf32, #tpu.memory_space<vmem>>, %arg5: memref<36x8x4xf32, #tpu.memory_space<vmem>>, %arg6: memref<4x8x1xf32, #tpu.memory_space<vmem>>, %arg7: memref<9x32x40xf32, #tpu.memory_space<vmem>>, %arg8: memref<32x1xf32, #tpu.memory_space<vmem>>, %arg9: memref<1x32x384xf32, #tpu.memory_space<vmem>>, %arg10: memref<40x576xf32, #tpu.memory_space<vmem>>) attributes {dimension_semantics = [#tpu.dimension_semantics<parallel>], iteration_bounds = array<i64: 2>, scalar_prefetch = 0 : i64, scratch_operands = 1 : i64, tpu.core_type = #tpu.core_type<tc>, window_params = [{transform_indices = @transform_0, window_bounds = array<i64: 1, 4, 576>}, {pipeline_mode = #tpu.pipeline_mode<synchronous>, transform_indices = @transform_1, window_bounds = array<i64: 1, 576>}, {pipeline_mode = #tpu.pipeline_mode<synchronous>, transform_indices = @transform_2, window_bounds = array<i64: 8, 4>}, {pipeline_mode = #tpu.pipeline_mode<synchronous>, transform_indices = @transform_3, window_bounds = array<i64: 8, 1>}, {pipeline_mode = #tpu.pipeline_mode<synchronous>, transform_indices = @transform_4, window_bounds = array<i64: 36, 8, 4>}, {pipeline_mode = #tpu.pipeline_mode<synchronous>, transform_indices = @transform_5, window_bounds = array<i64: 4, 8, 1>}, {pipeline_mode = #tpu.pipeline_mode<synchronous>, transform_indices = @transform_6, window_bounds = array<i64: 9, 32, 40>}, {pipeline_mode = #tpu.pipeline_mode<synchronous>, transform_indices = @transform_7, window_bounds = array<i64: 32, 1>}, {transform_indices = @transform_8, window_bounds = array<i64: 1, 32, 384>}]} {
    %c0 = arith.constant 0 : index
    %c0_0 = arith.constant 0 : index
    %c0_1 = arith.constant 0 : index
    %0 = vector.load %arg1[%c0, %c0_0, %c0_1] : memref<1x4x576xf32, #tpu.memory_space<vmem>>, vector<1x4x576xf32>
    %1 = vector.shape_cast %0 : vector<1x4x576xf32> to vector<4x576xf32>
    %c0_2 = arith.constant 0 : index
    %c100 = arith.constant 100 : index
    %2 = vector.load %arg2[%c0_2, %c100] : memref<1x576xf32, #tpu.memory_space<vmem>>, vector<1x376xf32>
    %cst = arith.constant 0.000000e+00 : f32
    %3 = vector.broadcast %cst : f32 to vector<40x52xf32>
    %c0_3 = arith.constant 0 : index
    %c48 = arith.constant 48 : index
    %4 = vector.load %arg10[%c0_3, %c48] : memref<40x576xf32, #tpu.memory_space<vmem>>, vector<40x52xf32>
    tpu.vector_store %arg10[%c0_3, %c48], %3 {strides = array<i32>} : memref<40x576xf32, #tpu.memory_space<vmem>>, vector<40x52xf32>,
    %cst_4 = arith.constant 0.000000e+00 : f32
    %5 = vector.broadcast %cst_4 : f32 to vector<40x52xf32>
    %c0_5 = arith.constant 0 : index
    %c476 = arith.constant 476 : index
    %6 = vector.load %arg10[%c0_5, %c476] : memref<40x576xf32, #tpu.memory_space<vmem>>, vector<40x52xf32>
    tpu.vector_store %arg10[%c0_5, %c476], %5 {strides = array<i32>} : memref<40x576xf32, #tpu.memory_space<vmem>>, vector<40x52xf32>,
    %cst_6 = arith.constant dense<0.000000e+00> : vector<4xf32>
    %7 = vector.multi_reduction <add>, %1, %cst_6 [1] : vector<4x576xf32> to vector<4xf32>
    %8 = vector.shape_cast %7 : vector<4xf32> to vector<4x1xf32>
    %cst_7 = arith.constant 3.906250e-03 : f32
    %9 = vector.broadcast %cst_7 : f32 to vector<4x1xf32>
    %10 = arith.mulf %8, %9 : vector<4x1xf32>
    %c0_8 = arith.constant 0 : index
    %c0_9 = arith.constant 0 : index
    %11 = vector.load %arg3[%c0_8, %c0_9] : memref<8x4xf32, #tpu.memory_space<vmem>>, vector<8x4xf32>
    %cst_10 = arith.constant dense<0.000000e+00> : vector<8x1xf32>
    %12 = tpu.matmul %11, %10, %cst_10 {dimension_numbers = #tpu.dot_dimension_numbers<[1], [0], [0], [1], [0, 0, 1, 1], [], []>} : vector<8x4xf32>, vector<4x1xf32>, vector<8x1xf32> -> vector<8x1xf32>
    %c0_11 = arith.constant 0 : index
    %c0_12 = arith.constant 0 : index
    %13 = vector.load %arg4[%c0_11, %c0_12] : memref<8x1xf32, #tpu.memory_space<vmem>>, vector<8x1xf32>
    %14 = arith.addf %12, %13 : vector<8x1xf32>
    %cst_13 = arith.constant 0.000000e+00 : f32
    %15 = vector.broadcast %cst_13 : f32 to vector<8x1xf32>
    %16 = arith.maximumf %14, %15 : vector<8x1xf32>
    %17 = vector.broadcast %16 : vector<8x1xf32> to vector<8x376xf32>
    %18 = vector.broadcast %2 : vector<1x376xf32> to vector<8x376xf32>
    %19 = arith.mulf %17, %18 : vector<8x376xf32>
    %c0_14 = arith.constant 0 : index
    %c100_15 = arith.constant 100 : index
    %20 = vector.load %arg10[%c0_14, %c100_15] : memref<40x576xf32, #tpu.memory_space<vmem>>, vector<8x376xf32>
    tpu.vector_store %arg10[%c0_14, %c100_15], %19 {strides = array<i32>} : memref<40x576xf32, #tpu.memory_space<vmem>>, vector<8x376xf32>,
    %cst_16 = arith.constant 0.000000e+00 : f32
    %21 = vector.broadcast %cst_16 : f32 to vector<8x376xf32>
    %c0_17 = arith.constant 0 : index
    %c0_18 = arith.constant 0 : index
    %c0_19 = arith.constant 0 : index
    %22 = vector.load %arg5[%c0_17, %c0_18, %c0_19] : memref<36x8x4xf32, #tpu.memory_space<vmem>>, vector<1x8x4xf32>
    %23 = vector.shape_cast %22 : vector<1x8x4xf32> to vector<8x4xf32>
    %24 = vector.extract_strided_slice %1 {offsets = [0, 75], sizes = [4, 376], strides = [1, 1]} : vector<4x576xf32> to vector<4x376xf32>
    %cst_20 = arith.constant dense<0.000000e+00> : vector<8x376xf32>
    %25 = tpu.matmul %23, %24, %cst_20 {dimension_numbers = #tpu.dot_dimension_numbers<[1], [0], [0], [1], [0, 0, 1, 1], [], []>} : vector<8x4xf32>, vector<4x376xf32>, vector<8x376xf32> -> vector<8x376xf32>
    %26 = arith.addf %21, %25 : vector<8x376xf32>
    %c1 = arith.constant 1 : index
    %c0_21 = arith.constant 0 : index
    %c0_22 = arith.constant 0 : index
    %27 = vector.load %arg5[%c1, %c0_21, %c0_22] : memref<36x8x4xf32, #tpu.memory_space<vmem>>, vector<1x8x4xf32>
    %28 = vector.shape_cast %27 : vector<1x8x4xf32> to vector<8x4xf32>
    %29 = vector.extract_strided_slice %1 {offsets = [0, 76], sizes = [4, 376], strides = [1, 1]} : vector<4x576xf32> to vector<4x376xf32>
    %cst_23 = arith.constant dense<0.000000e+00> : vector<8x376xf32>
    %30 = tpu.matmul %28, %29, %cst_23 {dimension_numbers = #tpu.dot_dimension_numbers<[1], [0], [0], [1], [0, 0, 1, 1], [], []>} : vector<8x4xf32>, vector<4x376xf32>, vector<8x376xf32> -> vector<8x376xf32>
    %31 = arith.addf %26, %30 : vector<8x376xf32>
    %c2 = arith.constant 2 : index
    %c0_24 = arith.constant 0 : index
    %c0_25 = arith.constant 0 : index
    %32 = vector.load %arg5[%c2, %c0_24, %c0_25] : memref<36x8x4xf32, #tpu.memory_space<vmem>>, vector<1x8x4xf32>
    %33 = vector.shape_cast %32 : vector<1x8x4xf32> to vector<8x4xf32>
    %34 = vector.extract_strided_slice %1 {offsets = [0, 77], sizes = [4, 376], strides = [1, 1]} : vector<4x576xf32> to vector<4x376xf32>
    %cst_26 = arith.constant dense<0.000000e+00> : vector<8x376xf32>
    %35 = tpu.matmul %33, %34, %cst_26 {dimension_numbers = #tpu.dot_dimension_numbers<[1], [0], [0], [1], [0, 0, 1, 1], [], []>} : vector<8x4xf32>, vector<4x376xf32>, vector<8x376xf32> -> vector<8x376xf32>
    %36 = arith.addf %31, %35 : vector<8x376xf32>
    %c3 = arith.constant 3 : index
    %c0_27 = arith.constant 0 : index
    %c0_28 = arith.constant 0 : index
    %37 = vector.load %arg5[%c3, %c0_27, %c0_28] : memref<36x8x4xf32, #tpu.memory_space<vmem>>, vector<1x8x4xf32>
    %38 = vector.shape_cast %37 : vector<1x8x4xf32> to vector<8x4xf32>
    %39 = vector.extract_strided_slice %1 {offsets = [0, 99], sizes = [4, 376], strides = [1, 1]} : vector<4x576xf32> to vector<4x376xf32>
    %cst_29 = arith.constant dense<0.000000e+00> : vector<8x376xf32>
    %40 = tpu.matmul %38, %39, %cst_29 {dimension_numbers = #tpu.dot_dimension_numbers<[1], [0], [0], [1], [0, 0, 1, 1], [], []>} : vector<8x4xf32>, vector<4x376xf32>, vector<8x376xf32> -> vector<8x376xf32>
    %41 = arith.addf %36, %40 : vector<8x376xf32>
    %c4 = arith.constant 4 : index
    %c0_30 = arith.constant 0 : index
    %c0_31 = arith.constant 0 : index
    %42 = vector.load %arg5[%c4, %c0_30, %c0_31] : memref<36x8x4xf32, #tpu.memory_space<vmem>>, vector<1x8x4xf32>
    %43 = vector.shape_cast %42 : vector<1x8x4xf32> to vector<8x4xf32>
    %44 = vector.extract_strided_slice %1 {offsets = [0, 100], sizes = [4, 376], strides = [1, 1]} : vector<4x576xf32> to vector<4x376xf32>
    %cst_32 = arith.constant dense<0.000000e+00> : vector<8x376xf32>
    %45 = tpu.matmul %43, %44, %cst_32 {dimension_numbers = #tpu.dot_dimension_numbers<[1], [0], [0], [1], [0, 0, 1, 1], [], []>} : vector<8x4xf32>, vector<4x376xf32>, vector<8x376xf32> -> vector<8x376xf32>
    %46 = arith.addf %41, %45 : vector<8x376xf32>
    %c5 = arith.constant 5 : index
    %c0_33 = arith.constant 0 : index
    %c0_34 = arith.constant 0 : index
    %47 = vector.load %arg5[%c5, %c0_33, %c0_34] : memref<36x8x4xf32, #tpu.memory_space<vmem>>, vector<1x8x4xf32>
    %48 = vector.shape_cast %47 : vector<1x8x4xf32> to vector<8x4xf32>
    %49 = vector.extract_strided_slice %1 {offsets = [0, 101], sizes = [4, 376], strides = [1, 1]} : vector<4x576xf32> to vector<4x376xf32>
    %cst_35 = arith.constant dense<0.000000e+00> : vector<8x376xf32>
    %50 = tpu.matmul %48, %49, %cst_35 {dimension_numbers = #tpu.dot_dimension_numbers<[1], [0], [0], [1], [0, 0, 1, 1], [], []>} : vector<8x4xf32>, vector<4x376xf32>, vector<8x376xf32> -> vector<8x376xf32>
    %51 = arith.addf %46, %50 : vector<8x376xf32>
    %c6 = arith.constant 6 : index
    %c0_36 = arith.constant 0 : index
    %c0_37 = arith.constant 0 : index
    %52 = vector.load %arg5[%c6, %c0_36, %c0_37] : memref<36x8x4xf32, #tpu.memory_space<vmem>>, vector<1x8x4xf32>
    %53 = vector.shape_cast %52 : vector<1x8x4xf32> to vector<8x4xf32>
    %54 = vector.extract_strided_slice %1 {offsets = [0, 123], sizes = [4, 376], strides = [1, 1]} : vector<4x576xf32> to vector<4x376xf32>
    %cst_38 = arith.constant dense<0.000000e+00> : vector<8x376xf32>
    %55 = tpu.matmul %53, %54, %cst_38 {dimension_numbers = #tpu.dot_dimension_numbers<[1], [0], [0], [1], [0, 0, 1, 1], [], []>} : vector<8x4xf32>, vector<4x376xf32>, vector<8x376xf32> -> vector<8x376xf32>
    %56 = arith.addf %51, %55 : vector<8x376xf32>
    %c7 = arith.constant 7 : index
    %c0_39 = arith.constant 0 : index
    %c0_40 = arith.constant 0 : index
    %57 = vector.load %arg5[%c7, %c0_39, %c0_40] : memref<36x8x4xf32, #tpu.memory_space<vmem>>, vector<1x8x4xf32>
    %58 = vector.shape_cast %57 : vector<1x8x4xf32> to vector<8x4xf32>
    %59 = vector.extract_strided_slice %1 {offsets = [0, 124], sizes = [4, 376], strides = [1, 1]} : vector<4x576xf32> to vector<4x376xf32>
    %cst_41 = arith.constant dense<0.000000e+00> : vector<8x376xf32>
    %60 = tpu.matmul %58, %59, %cst_41 {dimension_numbers = #tpu.dot_dimension_numbers<[1], [0], [0], [1], [0, 0, 1, 1], [], []>} : vector<8x4xf32>, vector<4x376xf32>, vector<8x376xf32> -> vector<8x376xf32>
    %61 = arith.addf %56, %60 : vector<8x376xf32>
    %c8 = arith.constant 8 : index
    %c0_42 = arith.constant 0 : index
    %c0_43 = arith.constant 0 : index
    %62 = vector.load %arg5[%c8, %c0_42, %c0_43] : memref<36x8x4xf32, #tpu.memory_space<vmem>>, vector<1x8x4xf32>
    %63 = vector.shape_cast %62 : vector<1x8x4xf32> to vector<8x4xf32>
    %64 = vector.extract_strided_slice %1 {offsets = [0, 125], sizes = [4, 376], strides = [1, 1]} : vector<4x576xf32> to vector<4x376xf32>
    %cst_44 = arith.constant dense<0.000000e+00> : vector<8x376xf32>
    %65 = tpu.matmul %63, %64, %cst_44 {dimension_numbers = #tpu.dot_dimension_numbers<[1], [0], [0], [1], [0, 0, 1, 1], [], []>} : vector<8x4xf32>, vector<4x376xf32>, vector<8x376xf32> -> vector<8x376xf32>
    %66 = arith.addf %61, %65 : vector<8x376xf32>
    %c0_45 = arith.constant 0 : index
    %c0_46 = arith.constant 0 : index
    %c0_47 = arith.constant 0 : index
    %67 = vector.load %arg6[%c0_45, %c0_46, %c0_47] : memref<4x8x1xf32, #tpu.memory_space<vmem>>, vector<1x8x1xf32>
    %68 = vector.shape_cast %67 : vector<1x8x1xf32> to vector<8x1xf32>
    %69 = vector.broadcast %68 : vector<8x1xf32> to vector<8x376xf32>
    %70 = arith.addf %66, %69 : vector<8x376xf32>
    %cst_48 = arith.constant 0.000000e+00 : f32
    %71 = vector.broadcast %cst_48 : f32 to vector<8x376xf32>
    %72 = arith.maximumf %70, %71 : vector<8x376xf32>
    %73 = vector.broadcast %2 : vector<1x376xf32> to vector<8x376xf32>
    %74 = arith.mulf %72, %73 : vector<8x376xf32>
    %c8_49 = arith.constant 8 : index
    %c100_50 = arith.constant 100 : index
    %75 = vector.load %arg10[%c8_49, %c100_50] : memref<40x576xf32, #tpu.memory_space<vmem>>, vector<8x376xf32>
    tpu.vector_store %arg10[%c8_49, %c100_50], %74 {strides = array<i32>} : memref<40x576xf32, #tpu.memory_space<vmem>>, vector<8x376xf32>,
    %cst_51 = arith.constant 0.000000e+00 : f32
    %76 = vector.broadcast %cst_51 : f32 to vector<8x376xf32>
    %c9 = arith.constant 9 : index
    %c0_52 = arith.constant 0 : index
    %c0_53 = arith.constant 0 : index
    %77 = vector.load %arg5[%c9, %c0_52, %c0_53] : memref<36x8x4xf32, #tpu.memory_space<vmem>>, vector<1x8x4xf32>
    %78 = vector.shape_cast %77 : vector<1x8x4xf32> to vector<8x4xf32>
    %79 = vector.extract_strided_slice %1 {offsets = [0, 50], sizes = [4, 376], strides = [1, 1]} : vector<4x576xf32> to vector<4x376xf32>
    %cst_54 = arith.constant dense<0.000000e+00> : vector<8x376xf32>
    %80 = tpu.matmul %78, %79, %cst_54 {dimension_numbers = #tpu.dot_dimension_numbers<[1], [0], [0], [1], [0, 0, 1, 1], [], []>} : vector<8x4xf32>, vector<4x376xf32>, vector<8x376xf32> -> vector<8x376xf32>
    %81 = arith.addf %76, %80 : vector<8x376xf32>
    %c10 = arith.constant 10 : index
    %c0_55 = arith.constant 0 : index
    %c0_56 = arith.constant 0 : index
    %82 = vector.load %arg5[%c10, %c0_55, %c0_56] : memref<36x8x4xf32, #tpu.memory_space<vmem>>, vector<1x8x4xf32>
    %83 = vector.shape_cast %82 : vector<1x8x4xf32> to vector<8x4xf32>
    %84 = vector.extract_strided_slice %1 {offsets = [0, 52], sizes = [4, 376], strides = [1, 1]} : vector<4x576xf32> to vector<4x376xf32>
    %cst_57 = arith.constant dense<0.000000e+00> : vector<8x376xf32>
    %85 = tpu.matmul %83, %84, %cst_57 {dimension_numbers = #tpu.dot_dimension_numbers<[1], [0], [0], [1], [0, 0, 1, 1], [], []>} : vector<8x4xf32>, vector<4x376xf32>, vector<8x376xf32> -> vector<8x376xf32>
    %86 = arith.addf %81, %85 : vector<8x376xf32>
    %c11 = arith.constant 11 : index
    %c0_58 = arith.constant 0 : index
    %c0_59 = arith.constant 0 : index
    %87 = vector.load %arg5[%c11, %c0_58, %c0_59] : memref<36x8x4xf32, #tpu.memory_space<vmem>>, vector<1x8x4xf32>
    %88 = vector.shape_cast %87 : vector<1x8x4xf32> to vector<8x4xf32>
    %89 = vector.extract_strided_slice %1 {offsets = [0, 54], sizes = [4, 376], strides = [1, 1]} : vector<4x576xf32> to vector<4x376xf32>
    %cst_60 = arith.constant dense<0.000000e+00> : vector<8x376xf32>
    %90 = tpu.matmul %88, %89, %cst_60 {dimension_numbers = #tpu.dot_dimension_numbers<[1], [0], [0], [1], [0, 0, 1, 1], [], []>} : vector<8x4xf32>, vector<4x376xf32>, vector<8x376xf32> -> vector<8x376xf32>
    %91 = arith.addf %86, %90 : vector<8x376xf32>
    %c12 = arith.constant 12 : index
    %c0_61 = arith.constant 0 : index
    %c0_62 = arith.constant 0 : index
    %92 = vector.load %arg5[%c12, %c0_61, %c0_62] : memref<36x8x4xf32, #tpu.memory_space<vmem>>, vector<1x8x4xf32>
    %93 = vector.shape_cast %92 : vector<1x8x4xf32> to vector<8x4xf32>
    %94 = vector.extract_strided_slice %1 {offsets = [0, 98], sizes = [4, 376], strides = [1, 1]} : vector<4x576xf32> to vector<4x376xf32>
    %cst_63 = arith.constant dense<0.000000e+00> : vector<8x376xf32>
    %95 = tpu.matmul %93, %94, %cst_63 {dimension_numbers = #tpu.dot_dimension_numbers<[1], [0], [0], [1], [0, 0, 1, 1], [], []>} : vector<8x4xf32>, vector<4x376xf32>, vector<8x376xf32> -> vector<8x376xf32>
    %96 = arith.addf %91, %95 : vector<8x376xf32>
    %c13 = arith.constant 13 : index
    %c0_64 = arith.constant 0 : index
    %c0_65 = arith.constant 0 : index
    %97 = vector.load %arg5[%c13, %c0_64, %c0_65] : memref<36x8x4xf32, #tpu.memory_space<vmem>>, vector<1x8x4xf32>
    %98 = vector.shape_cast %97 : vector<1x8x4xf32> to vector<8x4xf32>
    %99 = vector.extract_strided_slice %1 {offsets = [0, 100], sizes = [4, 376], strides = [1, 1]} : vector<4x576xf32> to vector<4x376xf32>
    %cst_66 = arith.constant dense<0.000000e+00> : vector<8x376xf32>
    %100 = tpu.matmul %98, %99, %cst_66 {dimension_numbers = #tpu.dot_dimension_numbers<[1], [0], [0], [1], [0, 0, 1, 1], [], []>} : vector<8x4xf32>, vector<4x376xf32>, vector<8x376xf32> -> vector<8x376xf32>
    %101 = arith.addf %96, %100 : vector<8x376xf32>
    %c14 = arith.constant 14 : index
    %c0_67 = arith.constant 0 : index
    %c0_68 = arith.constant 0 : index
    %102 = vector.load %arg5[%c14, %c0_67, %c0_68] : memref<36x8x4xf32, #tpu.memory_space<vmem>>, vector<1x8x4xf32>
    %103 = vector.shape_cast %102 : vector<1x8x4xf32> to vector<8x4xf32>
    %104 = vector.extract_strided_slice %1 {offsets = [0, 102], sizes = [4, 376], strides = [1, 1]} : vector<4x576xf32> to vector<4x376xf32>
    %cst_69 = arith.constant dense<0.000000e+00> : vector<8x376xf32>
    %105 = tpu.matmul %103, %104, %cst_69 {dimension_numbers = #tpu.dot_dimension_numbers<[1], [0], [0], [1], [0, 0, 1, 1], [], []>} : vector<8x4xf32>, vector<4x376xf32>, vector<8x376xf32> -> vector<8x376xf32>
    %106 = arith.addf %101, %105 : vector<8x376xf32>
    %c15 = arith.constant 15 : index
    %c0_70 = arith.constant 0 : index
    %c0_71 = arith.constant 0 : index
    %107 = vector.load %arg5[%c15, %c0_70, %c0_71] : memref<36x8x4xf32, #tpu.memory_space<vmem>>, vector<1x8x4xf32>
    %108 = vector.shape_cast %107 : vector<1x8x4xf32> to vector<8x4xf32>
    %109 = vector.extract_strided_slice %1 {offsets = [0, 146], sizes = [4, 376], strides = [1, 1]} : vector<4x576xf32> to vector<4x376xf32>
    %cst_72 = arith.constant dense<0.000000e+00> : vector<8x376xf32>
    %110 = tpu.matmul %108, %109, %cst_72 {dimension_numbers = #tpu.dot_dimension_numbers<[1], [0], [0], [1], [0, 0, 1, 1], [], []>} : vector<8x4xf32>, vector<4x376xf32>, vector<8x376xf32> -> vector<8x376xf32>
    %111 = arith.addf %106, %110 : vector<8x376xf32>
    %c16 = arith.constant 16 : index
    %c0_73 = arith.constant 0 : index
    %c0_74 = arith.constant 0 : index
    %112 = vector.load %arg5[%c16, %c0_73, %c0_74] : memref<36x8x4xf32, #tpu.memory_space<vmem>>, vector<1x8x4xf32>
    %113 = vector.shape_cast %112 : vector<1x8x4xf32> to vector<8x4xf32>
    %114 = vector.extract_strided_slice %1 {offsets = [0, 148], sizes = [4, 376], strides = [1, 1]} : vector<4x576xf32> to vector<4x376xf32>
    %cst_75 = arith.constant dense<0.000000e+00> : vector<8x376xf32>
    %115 = tpu.matmul %113, %114, %cst_75 {dimension_numbers = #tpu.dot_dimension_numbers<[1], [0], [0], [1], [0, 0, 1, 1], [], []>} : vector<8x4xf32>, vector<4x376xf32>, vector<8x376xf32> -> vector<8x376xf32>
    %116 = arith.addf %111, %115 : vector<8x376xf32>
    %c17 = arith.constant 17 : index
    %c0_76 = arith.constant 0 : index
    %c0_77 = arith.constant 0 : index
    %117 = vector.load %arg5[%c17, %c0_76, %c0_77] : memref<36x8x4xf32, #tpu.memory_space<vmem>>, vector<1x8x4xf32>
    %118 = vector.shape_cast %117 : vector<1x8x4xf32> to vector<8x4xf32>
    %119 = vector.extract_strided_slice %1 {offsets = [0, 150], sizes = [4, 376], strides = [1, 1]} : vector<4x576xf32> to vector<4x376xf32>
    %cst_78 = arith.constant dense<0.000000e+00> : vector<8x376xf32>
    %120 = tpu.matmul %118, %119, %cst_78 {dimension_numbers = #tpu.dot_dimension_numbers<[1], [0], [0], [1], [0, 0, 1, 1], [], []>} : vector<8x4xf32>, vector<4x376xf32>, vector<8x376xf32> -> vector<8x376xf32>
    %121 = arith.addf %116, %120 : vector<8x376xf32>
    %c1_79 = arith.constant 1 : index
    %c0_80 = arith.constant 0 : index
    %c0_81 = arith.constant 0 : index
    %122 = vector.load %arg6[%c1_79, %c0_80, %c0_81] : memref<4x8x1xf32, #tpu.memory_space<vmem>>, vector<1x8x1xf32>
    %123 = vector.shape_cast %122 : vector<1x8x1xf32> to vector<8x1xf32>
    %124 = vector.broadcast %123 : vector<8x1xf32> to vector<8x376xf32>
    %125 = arith.addf %121, %124 : vector<8x376xf32>
    %cst_82 = arith.constant 0.000000e+00 : f32
    %126 = vector.broadcast %cst_82 : f32 to vector<8x376xf32>
    %127 = arith.maximumf %125, %126 : vector<8x376xf32>
    %128 = vector.broadcast %2 : vector<1x376xf32> to vector<8x376xf32>
    %129 = arith.mulf %127, %128 : vector<8x376xf32>
    %c16_83 = arith.constant 16 : index
    %c100_84 = arith.constant 100 : index
    %130 = vector.load %arg10[%c16_83, %c100_84] : memref<40x576xf32, #tpu.memory_space<vmem>>, vector<8x376xf32>
    tpu.vector_store %arg10[%c16_83, %c100_84], %129 {strides = array<i32>} : memref<40x576xf32, #tpu.memory_space<vmem>>, vector<8x376xf32>,
    %cst_85 = arith.constant 0.000000e+00 : f32
    %131 = vector.broadcast %cst_85 : f32 to vector<8x376xf32>
    %c18 = arith.constant 18 : index
    %c0_86 = arith.constant 0 : index
    %c0_87 = arith.constant 0 : index
    %132 = vector.load %arg5[%c18, %c0_86, %c0_87] : memref<36x8x4xf32, #tpu.memory_space<vmem>>, vector<1x8x4xf32>
    %133 = vector.shape_cast %132 : vector<1x8x4xf32> to vector<8x4xf32>
    %134 = vector.extract_strided_slice %1 {offsets = [0, 25], sizes = [4, 376], strides = [1, 1]} : vector<4x576xf32> to vector<4x376xf32>
    %cst_88 = arith.constant dense<0.000000e+00> : vector<8x376xf32>
    %135 = tpu.matmul %133, %134, %cst_88 {dimension_numbers = #tpu.dot_dimension_numbers<[1], [0], [0], [1], [0, 0, 1, 1], [], []>} : vector<8x4xf32>, vector<4x376xf32>, vector<8x376xf32> -> vector<8x376xf32>
    %136 = arith.addf %131, %135 : vector<8x376xf32>
    %c19 = arith.constant 19 : index
    %c0_89 = arith.constant 0 : index
    %c0_90 = arith.constant 0 : index
    %137 = vector.load %arg5[%c19, %c0_89, %c0_90] : memref<36x8x4xf32, #tpu.memory_space<vmem>>, vector<1x8x4xf32>
    %138 = vector.shape_cast %137 : vector<1x8x4xf32> to vector<8x4xf32>
    %139 = vector.extract_strided_slice %1 {offsets = [0, 28], sizes = [4, 376], strides = [1, 1]} : vector<4x576xf32> to vector<4x376xf32>
    %cst_91 = arith.constant dense<0.000000e+00> : vector<8x376xf32>
    %140 = tpu.matmul %138, %139, %cst_91 {dimension_numbers = #tpu.dot_dimension_numbers<[1], [0], [0], [1], [0, 0, 1, 1], [], []>} : vector<8x4xf32>, vector<4x376xf32>, vector<8x376xf32> -> vector<8x376xf32>
    %141 = arith.addf %136, %140 : vector<8x376xf32>
    %c20 = arith.constant 20 : index
    %c0_92 = arith.constant 0 : index
    %c0_93 = arith.constant 0 : index
    %142 = vector.load %arg5[%c20, %c0_92, %c0_93] : memref<36x8x4xf32, #tpu.memory_space<vmem>>, vector<1x8x4xf32>
    %143 = vector.shape_cast %142 : vector<1x8x4xf32> to vector<8x4xf32>
    %144 = vector.extract_strided_slice %1 {offsets = [0, 31], sizes = [4, 376], strides = [1, 1]} : vector<4x576xf32> to vector<4x376xf32>
    %cst_94 = arith.constant dense<0.000000e+00> : vector<8x376xf32>
    %145 = tpu.matmul %143, %144, %cst_94 {dimension_numbers = #tpu.dot_dimension_numbers<[1], [0], [0], [1], [0, 0, 1, 1], [], []>} : vector<8x4xf32>, vector<4x376xf32>, vector<8x376xf32> -> vector<8x376xf32>
    %146 = arith.addf %141, %145 : vector<8x376xf32>
    %c21 = arith.constant 21 : index
    %c0_95 = arith.constant 0 : index
    %c0_96 = arith.constant 0 : index
    %147 = vector.load %arg5[%c21, %c0_95, %c0_96] : memref<36x8x4xf32, #tpu.memory_space<vmem>>, vector<1x8x4xf32>
    %148 = vector.shape_cast %147 : vector<1x8x4xf32> to vector<8x4xf32>
    %149 = vector.extract_strided_slice %1 {offsets = [0, 97], sizes = [4, 376], strides = [1, 1]} : vector<4x576xf32> to vector<4x376xf32>
    %cst_97 = arith.constant dense<0.000000e+00> : vector<8x376xf32>
    %150 = tpu.matmul %148, %149, %cst_97 {dimension_numbers = #tpu.dot_dimension_numbers<[1], [0], [0], [1], [0, 0, 1, 1], [], []>} : vector<8x4xf32>, vector<4x376xf32>, vector<8x376xf32> -> vector<8x376xf32>
    %151 = arith.addf %146, %150 : vector<8x376xf32>
    %c22 = arith.constant 22 : index
    %c0_98 = arith.constant 0 : index
    %c0_99 = arith.constant 0 : index
    %152 = vector.load %arg5[%c22, %c0_98, %c0_99] : memref<36x8x4xf32, #tpu.memory_space<vmem>>, vector<1x8x4xf32>
    %153 = vector.shape_cast %152 : vector<1x8x4xf32> to vector<8x4xf32>
    %154 = vector.extract_strided_slice %1 {offsets = [0, 100], sizes = [4, 376], strides = [1, 1]} : vector<4x576xf32> to vector<4x376xf32>
    %cst_100 = arith.constant dense<0.000000e+00> : vector<8x376xf32>
    %155 = tpu.matmul %153, %154, %cst_100 {dimension_numbers = #tpu.dot_dimension_numbers<[1], [0], [0], [1], [0, 0, 1, 1], [], []>} : vector<8x4xf32>, vector<4x376xf32>, vector<8x376xf32> -> vector<8x376xf32>
    %156 = arith.addf %151, %155 : vector<8x376xf32>
    %c23 = arith.constant 23 : index
    %c0_101 = arith.constant 0 : index
    %c0_102 = arith.constant 0 : index
    %157 = vector.load %arg5[%c23, %c0_101, %c0_102] : memref<36x8x4xf32, #tpu.memory_space<vmem>>, vector<1x8x4xf32>
    %158 = vector.shape_cast %157 : vector<1x8x4xf32> to vector<8x4xf32>
    %159 = vector.extract_strided_slice %1 {offsets = [0, 103], sizes = [4, 376], strides = [1, 1]} : vector<4x576xf32> to vector<4x376xf32>
    %cst_103 = arith.constant dense<0.000000e+00> : vector<8x376xf32>
    %160 = tpu.matmul %158, %159, %cst_103 {dimension_numbers = #tpu.dot_dimension_numbers<[1], [0], [0], [1], [0, 0, 1, 1], [], []>} : vector<8x4xf32>, vector<4x376xf32>, vector<8x376xf32> -> vector<8x376xf32>
    %161 = arith.addf %156, %160 : vector<8x376xf32>
    %c24 = arith.constant 24 : index
    %c0_104 = arith.constant 0 : index
    %c0_105 = arith.constant 0 : index
    %162 = vector.load %arg5[%c24, %c0_104, %c0_105] : memref<36x8x4xf32, #tpu.memory_space<vmem>>, vector<1x8x4xf32>
    %163 = vector.shape_cast %162 : vector<1x8x4xf32> to vector<8x4xf32>
    %164 = vector.extract_strided_slice %1 {offsets = [0, 169], sizes = [4, 376], strides = [1, 1]} : vector<4x576xf32> to vector<4x376xf32>
    %cst_106 = arith.constant dense<0.000000e+00> : vector<8x376xf32>
    %165 = tpu.matmul %163, %164, %cst_106 {dimension_numbers = #tpu.dot_dimension_numbers<[1], [0], [0], [1], [0, 0, 1, 1], [], []>} : vector<8x4xf32>, vector<4x376xf32>, vector<8x376xf32> -> vector<8x376xf32>
    %166 = arith.addf %161, %165 : vector<8x376xf32>
    %c25 = arith.constant 25 : index
    %c0_107 = arith.constant 0 : index
    %c0_108 = arith.constant 0 : index
    %167 = vector.load %arg5[%c25, %c0_107, %c0_108] : memref<36x8x4xf32, #tpu.memory_space<vmem>>, vector<1x8x4xf32>
    %168 = vector.shape_cast %167 : vector<1x8x4xf32> to vector<8x4xf32>
    %169 = vector.extract_strided_slice %1 {offsets = [0, 172], sizes = [4, 376], strides = [1, 1]} : vector<4x576xf32> to vector<4x376xf32>
    %cst_109 = arith.constant dense<0.000000e+00> : vector<8x376xf32>
    %170 = tpu.matmul %168, %169, %cst_109 {dimension_numbers = #tpu.dot_dimension_numbers<[1], [0], [0], [1], [0, 0, 1, 1], [], []>} : vector<8x4xf32>, vector<4x376xf32>, vector<8x376xf32> -> vector<8x376xf32>
    %171 = arith.addf %166, %170 : vector<8x376xf32>
    %c26 = arith.constant 26 : index
    %c0_110 = arith.constant 0 : index
    %c0_111 = arith.constant 0 : index
    %172 = vector.load %arg5[%c26, %c0_110, %c0_111] : memref<36x8x4xf32, #tpu.memory_space<vmem>>, vector<1x8x4xf32>
    %173 = vector.shape_cast %172 : vector<1x8x4xf32> to vector<8x4xf32>
    %174 = vector.extract_strided_slice %1 {offsets = [0, 175], sizes = [4, 376], strides = [1, 1]} : vector<4x576xf32> to vector<4x376xf32>
    %cst_112 = arith.constant dense<0.000000e+00> : vector<8x376xf32>
    %175 = tpu.matmul %173, %174, %cst_112 {dimension_numbers = #tpu.dot_dimension_numbers<[1], [0], [0], [1], [0, 0, 1, 1], [], []>} : vector<8x4xf32>, vector<4x376xf32>, vector<8x376xf32> -> vector<8x376xf32>
    %176 = arith.addf %171, %175 : vector<8x376xf32>
    %c2_113 = arith.constant 2 : index
    %c0_114 = arith.constant 0 : index
    %c0_115 = arith.constant 0 : index
    %177 = vector.load %arg6[%c2_113, %c0_114, %c0_115] : memref<4x8x1xf32, #tpu.memory_space<vmem>>, vector<1x8x1xf32>
    %178 = vector.shape_cast %177 : vector<1x8x1xf32> to vector<8x1xf32>
    %179 = vector.broadcast %178 : vector<8x1xf32> to vector<8x376xf32>
    %180 = arith.addf %176, %179 : vector<8x376xf32>
    %cst_116 = arith.constant 0.000000e+00 : f32
    %181 = vector.broadcast %cst_116 : f32 to vector<8x376xf32>
    %182 = arith.maximumf %180, %181 : vector<8x376xf32>
    %183 = vector.broadcast %2 : vector<1x376xf32> to vector<8x376xf32>
    %184 = arith.mulf %182, %183 : vector<8x376xf32>
    %c24_117 = arith.constant 24 : index
    %c100_118 = arith.constant 100 : index
    %185 = vector.load %arg10[%c24_117, %c100_118] : memref<40x576xf32, #tpu.memory_space<vmem>>, vector<8x376xf32>
    tpu.vector_store %arg10[%c24_117, %c100_118], %184 {strides = array<i32>} : memref<40x576xf32, #tpu.memory_space<vmem>>, vector<8x376xf32>,
    %cst_119 = arith.constant 0.000000e+00 : f32
    %186 = vector.broadcast %cst_119 : f32 to vector<8x376xf32>
    %c27 = arith.constant 27 : index
    %c0_120 = arith.constant 0 : index
    %c0_121 = arith.constant 0 : index
    %187 = vector.load %arg5[%c27, %c0_120, %c0_121] : memref<36x8x4xf32, #tpu.memory_space<vmem>>, vector<1x8x4xf32>
    %188 = vector.shape_cast %187 : vector<1x8x4xf32> to vector<8x4xf32>
    %189 = vector.extract_strided_slice %1 {offsets = [0, 0], sizes = [4, 376], strides = [1, 1]} : vector<4x576xf32> to vector<4x376xf32>
    %cst_122 = arith.constant dense<0.000000e+00> : vector<8x376xf32>
    %190 = tpu.matmul %188, %189, %cst_122 {dimension_numbers = #tpu.dot_dimension_numbers<[1], [0], [0], [1], [0, 0, 1, 1], [], []>} : vector<8x4xf32>, vector<4x376xf32>, vector<8x376xf32> -> vector<8x376xf32>
    %191 = arith.addf %186, %190 : vector<8x376xf32>
    %c28 = arith.constant 28 : index
    %c0_123 = arith.constant 0 : index
    %c0_124 = arith.constant 0 : index
    %192 = vector.load %arg5[%c28, %c0_123, %c0_124] : memref<36x8x4xf32, #tpu.memory_space<vmem>>, vector<1x8x4xf32>
    %193 = vector.shape_cast %192 : vector<1x8x4xf32> to vector<8x4xf32>
    %194 = vector.extract_strided_slice %1 {offsets = [0, 4], sizes = [4, 376], strides = [1, 1]} : vector<4x576xf32> to vector<4x376xf32>
    %cst_125 = arith.constant dense<0.000000e+00> : vector<8x376xf32>
    %195 = tpu.matmul %193, %194, %cst_125 {dimension_numbers = #tpu.dot_dimension_numbers<[1], [0], [0], [1], [0, 0, 1, 1], [], []>} : vector<8x4xf32>, vector<4x376xf32>, vector<8x376xf32> -> vector<8x376xf32>
    %196 = arith.addf %191, %195 : vector<8x376xf32>
    %c29 = arith.constant 29 : index
    %c0_126 = arith.constant 0 : index
    %c0_127 = arith.constant 0 : index
    %197 = vector.load %arg5[%c29, %c0_126, %c0_127] : memref<36x8x4xf32, #tpu.memory_space<vmem>>, vector<1x8x4xf32>
    %198 = vector.shape_cast %197 : vector<1x8x4xf32> to vector<8x4xf32>
    %199 = vector.extract_strided_slice %1 {offsets = [0, 8], sizes = [4, 376], strides = [1, 1]} : vector<4x576xf32> to vector<4x376xf32>
    %cst_128 = arith.constant dense<0.000000e+00> : vector<8x376xf32>
    %200 = tpu.matmul %198, %199, %cst_128 {dimension_numbers = #tpu.dot_dimension_numbers<[1], [0], [0], [1], [0, 0, 1, 1], [], []>} : vector<8x4xf32>, vector<4x376xf32>, vector<8x376xf32> -> vector<8x376xf32>
    %201 = arith.addf %196, %200 : vector<8x376xf32>
    %c30 = arith.constant 30 : index
    %c0_129 = arith.constant 0 : index
    %c0_130 = arith.constant 0 : index
    %202 = vector.load %arg5[%c30, %c0_129, %c0_130] : memref<36x8x4xf32, #tpu.memory_space<vmem>>, vector<1x8x4xf32>
    %203 = vector.shape_cast %202 : vector<1x8x4xf32> to vector<8x4xf32>
    %204 = vector.extract_strided_slice %1 {offsets = [0, 96], sizes = [4, 376], strides = [1, 1]} : vector<4x576xf32> to vector<4x376xf32>
    %cst_131 = arith.constant dense<0.000000e+00> : vector<8x376xf32>
    %205 = tpu.matmul %203, %204, %cst_131 {dimension_numbers = #tpu.dot_dimension_numbers<[1], [0], [0], [1], [0, 0, 1, 1], [], []>} : vector<8x4xf32>, vector<4x376xf32>, vector<8x376xf32> -> vector<8x376xf32>
    %206 = arith.addf %201, %205 : vector<8x376xf32>
    %c31 = arith.constant 31 : index
    %c0_132 = arith.constant 0 : index
    %c0_133 = arith.constant 0 : index
    %207 = vector.load %arg5[%c31, %c0_132, %c0_133] : memref<36x8x4xf32, #tpu.memory_space<vmem>>, vector<1x8x4xf32>
    %208 = vector.shape_cast %207 : vector<1x8x4xf32> to vector<8x4xf32>
    %209 = vector.extract_strided_slice %1 {offsets = [0, 100], sizes = [4, 376], strides = [1, 1]} : vector<4x576xf32> to vector<4x376xf32>
    %cst_134 = arith.constant dense<0.000000e+00> : vector<8x376xf32>
    %210 = tpu.matmul %208, %209, %cst_134 {dimension_numbers = #tpu.dot_dimension_numbers<[1], [0], [0], [1], [0, 0, 1, 1], [], []>} : vector<8x4xf32>, vector<4x376xf32>, vector<8x376xf32> -> vector<8x376xf32>
    %211 = arith.addf %206, %210 : vector<8x376xf32>
    %c32 = arith.constant 32 : index
    %c0_135 = arith.constant 0 : index
    %c0_136 = arith.constant 0 : index
    %212 = vector.load %arg5[%c32, %c0_135, %c0_136] : memref<36x8x4xf32, #tpu.memory_space<vmem>>, vector<1x8x4xf32>
    %213 = vector.shape_cast %212 : vector<1x8x4xf32> to vector<8x4xf32>
    %214 = vector.extract_strided_slice %1 {offsets = [0, 104], sizes = [4, 376], strides = [1, 1]} : vector<4x576xf32> to vector<4x376xf32>
    %cst_137 = arith.constant dense<0.000000e+00> : vector<8x376xf32>
    %215 = tpu.matmul %213, %214, %cst_137 {dimension_numbers = #tpu.dot_dimension_numbers<[1], [0], [0], [1], [0, 0, 1, 1], [], []>} : vector<8x4xf32>, vector<4x376xf32>, vector<8x376xf32> -> vector<8x376xf32>
    %216 = arith.addf %211, %215 : vector<8x376xf32>
    %c33 = arith.constant 33 : index
    %c0_138 = arith.constant 0 : index
    %c0_139 = arith.constant 0 : index
    %217 = vector.load %arg5[%c33, %c0_138, %c0_139] : memref<36x8x4xf32, #tpu.memory_space<vmem>>, vector<1x8x4xf32>
    %218 = vector.shape_cast %217 : vector<1x8x4xf32> to vector<8x4xf32>
    %219 = vector.extract_strided_slice %1 {offsets = [0, 192], sizes = [4, 376], strides = [1, 1]} : vector<4x576xf32> to vector<4x376xf32>
    %cst_140 = arith.constant dense<0.000000e+00> : vector<8x376xf32>
    %220 = tpu.matmul %218, %219, %cst_140 {dimension_numbers = #tpu.dot_dimension_numbers<[1], [0], [0], [1], [0, 0, 1, 1], [], []>} : vector<8x4xf32>, vector<4x376xf32>, vector<8x376xf32> -> vector<8x376xf32>
    %221 = arith.addf %216, %220 : vector<8x376xf32>
    %c34 = arith.constant 34 : index
    %c0_141 = arith.constant 0 : index
    %c0_142 = arith.constant 0 : index
    %222 = vector.load %arg5[%c34, %c0_141, %c0_142] : memref<36x8x4xf32, #tpu.memory_space<vmem>>, vector<1x8x4xf32>
    %223 = vector.shape_cast %222 : vector<1x8x4xf32> to vector<8x4xf32>
    %224 = vector.extract_strided_slice %1 {offsets = [0, 196], sizes = [4, 376], strides = [1, 1]} : vector<4x576xf32> to vector<4x376xf32>
    %cst_143 = arith.constant dense<0.000000e+00> : vector<8x376xf32>
    %225 = tpu.matmul %223, %224, %cst_143 {dimension_numbers = #tpu.dot_dimension_numbers<[1], [0], [0], [1], [0, 0, 1, 1], [], []>} : vector<8x4xf32>, vector<4x376xf32>, vector<8x376xf32> -> vector<8x376xf32>
    %226 = arith.addf %221, %225 : vector<8x376xf32>
    %c35 = arith.constant 35 : index
    %c0_144 = arith.constant 0 : index
    %c0_145 = arith.constant 0 : index
    %227 = vector.load %arg5[%c35, %c0_144, %c0_145] : memref<36x8x4xf32, #tpu.memory_space<vmem>>, vector<1x8x4xf32>
    %228 = vector.shape_cast %227 : vector<1x8x4xf32> to vector<8x4xf32>
    %229 = vector.extract_strided_slice %1 {offsets = [0, 200], sizes = [4, 376], strides = [1, 1]} : vector<4x576xf32> to vector<4x376xf32>
    %cst_146 = arith.constant dense<0.000000e+00> : vector<8x376xf32>
    %230 = tpu.matmul %228, %229, %cst_146 {dimension_numbers = #tpu.dot_dimension_numbers<[1], [0], [0], [1], [0, 0, 1, 1], [], []>} : vector<8x4xf32>, vector<4x376xf32>, vector<8x376xf32> -> vector<8x376xf32>
    %231 = arith.addf %226, %230 : vector<8x376xf32>
    %c3_147 = arith.constant 3 : index
    %c0_148 = arith.constant 0 : index
    %c0_149 = arith.constant 0 : index
    %232 = vector.load %arg6[%c3_147, %c0_148, %c0_149] : memref<4x8x1xf32, #tpu.memory_space<vmem>>, vector<1x8x1xf32>
    %233 = vector.shape_cast %232 : vector<1x8x1xf32> to vector<8x1xf32>
    %234 = vector.broadcast %233 : vector<8x1xf32> to vector<8x376xf32>
    %235 = arith.addf %231, %234 : vector<8x376xf32>
    %cst_150 = arith.constant 0.000000e+00 : f32
    %236 = vector.broadcast %cst_150 : f32 to vector<8x376xf32>
    %237 = arith.maximumf %235, %236 : vector<8x376xf32>
    %238 = vector.broadcast %2 : vector<1x376xf32> to vector<8x376xf32>
    %239 = arith.mulf %237, %238 : vector<8x376xf32>
    %c32_151 = arith.constant 32 : index
    %c100_152 = arith.constant 100 : index
    %240 = vector.load %arg10[%c32_151, %c100_152] : memref<40x576xf32, #tpu.memory_space<vmem>>, vector<8x376xf32>
    tpu.vector_store %arg10[%c32_151, %c100_152], %239 {strides = array<i32>} : memref<40x576xf32, #tpu.memory_space<vmem>>, vector<8x376xf32>,
    %cst_153 = arith.constant 0.000000e+00 : f32
    %241 = vector.broadcast %cst_153 : f32 to vector<32x384xf32>
    %c0_154 = arith.constant 0 : index
    %c0_155 = arith.constant 0 : index
    %c0_156 = arith.constant 0 : index
    %242 = vector.load %arg7[%c0_154, %c0_155, %c0_156] : memref<9x32x40xf32, #tpu.memory_space<vmem>>, vector<1x32x40xf32>
    %243 = vector.shape_cast %242 : vector<1x32x40xf32> to vector<32x40xf32>
    %c0_157 = arith.constant 0 : index
    %c71 = arith.constant 71 : index
    %244 = vector.load %arg10[%c0_157, %c71] : memref<40x576xf32, #tpu.memory_space<vmem>>, vector<40x384xf32>
    %cst_158 = arith.constant dense<0.000000e+00> : vector<32x384xf32>
    %245 = tpu.matmul %243, %244, %cst_158 {dimension_numbers = #tpu.dot_dimension_numbers<[1], [0], [0], [1], [0, 0, 1, 1], [], []>} : vector<32x40xf32>, vector<40x384xf32>, vector<32x384xf32> -> vector<32x384xf32>
    %246 = arith.addf %241, %245 : vector<32x384xf32>
    %c1_159 = arith.constant 1 : index
    %c0_160 = arith.constant 0 : index
    %c0_161 = arith.constant 0 : index
    %247 = vector.load %arg7[%c1_159, %c0_160, %c0_161] : memref<9x32x40xf32, #tpu.memory_space<vmem>>, vector<1x32x40xf32>
    %248 = vector.shape_cast %247 : vector<1x32x40xf32> to vector<32x40xf32>
    %c0_162 = arith.constant 0 : index
    %c72 = arith.constant 72 : index
    %249 = vector.load %arg10[%c0_162, %c72] : memref<40x576xf32, #tpu.memory_space<vmem>>, vector<40x384xf32>
    %cst_163 = arith.constant dense<0.000000e+00> : vector<32x384xf32>
    %250 = tpu.matmul %248, %249, %cst_163 {dimension_numbers = #tpu.dot_dimension_numbers<[1], [0], [0], [1], [0, 0, 1, 1], [], []>} : vector<32x40xf32>, vector<40x384xf32>, vector<32x384xf32> -> vector<32x384xf32>
    %251 = arith.addf %246, %250 : vector<32x384xf32>
    %c2_164 = arith.constant 2 : index
    %c0_165 = arith.constant 0 : index
    %c0_166 = arith.constant 0 : index
    %252 = vector.load %arg7[%c2_164, %c0_165, %c0_166] : memref<9x32x40xf32, #tpu.memory_space<vmem>>, vector<1x32x40xf32>
    %253 = vector.shape_cast %252 : vector<1x32x40xf32> to vector<32x40xf32>
    %c0_167 = arith.constant 0 : index
    %c73 = arith.constant 73 : index
    %254 = vector.load %arg10[%c0_167, %c73] : memref<40x576xf32, #tpu.memory_space<vmem>>, vector<40x384xf32>
    %cst_168 = arith.constant dense<0.000000e+00> : vector<32x384xf32>
    %255 = tpu.matmul %253, %254, %cst_168 {dimension_numbers = #tpu.dot_dimension_numbers<[1], [0], [0], [1], [0, 0, 1, 1], [], []>} : vector<32x40xf32>, vector<40x384xf32>, vector<32x384xf32> -> vector<32x384xf32>
    %256 = arith.addf %251, %255 : vector<32x384xf32>
    %c3_169 = arith.constant 3 : index
    %c0_170 = arith.constant 0 : index
    %c0_171 = arith.constant 0 : index
    %257 = vector.load %arg7[%c3_169, %c0_170, %c0_171] : memref<9x32x40xf32, #tpu.memory_space<vmem>>, vector<1x32x40xf32>
    %258 = vector.shape_cast %257 : vector<1x32x40xf32> to vector<32x40xf32>
    %c0_172 = arith.constant 0 : index
    %c95 = arith.constant 95 : index
    %259 = vector.load %arg10[%c0_172, %c95] : memref<40x576xf32, #tpu.memory_space<vmem>>, vector<40x384xf32>
    %cst_173 = arith.constant dense<0.000000e+00> : vector<32x384xf32>
    %260 = tpu.matmul %258, %259, %cst_173 {dimension_numbers = #tpu.dot_dimension_numbers<[1], [0], [0], [1], [0, 0, 1, 1], [], []>} : vector<32x40xf32>, vector<40x384xf32>, vector<32x384xf32> -> vector<32x384xf32>
    %261 = arith.addf %256, %260 : vector<32x384xf32>
    %c4_174 = arith.constant 4 : index
    %c0_175 = arith.constant 0 : index
    %c0_176 = arith.constant 0 : index
    %262 = vector.load %arg7[%c4_174, %c0_175, %c0_176] : memref<9x32x40xf32, #tpu.memory_space<vmem>>, vector<1x32x40xf32>
    %263 = vector.shape_cast %262 : vector<1x32x40xf32> to vector<32x40xf32>
    %c0_177 = arith.constant 0 : index
    %c96 = arith.constant 96 : index
    %264 = vector.load %arg10[%c0_177, %c96] : memref<40x576xf32, #tpu.memory_space<vmem>>, vector<40x384xf32>
    %cst_178 = arith.constant dense<0.000000e+00> : vector<32x384xf32>
    %265 = tpu.matmul %263, %264, %cst_178 {dimension_numbers = #tpu.dot_dimension_numbers<[1], [0], [0], [1], [0, 0, 1, 1], [], []>} : vector<32x40xf32>, vector<40x384xf32>, vector<32x384xf32> -> vector<32x384xf32>
    %266 = arith.addf %261, %265 : vector<32x384xf32>
    %c5_179 = arith.constant 5 : index
    %c0_180 = arith.constant 0 : index
    %c0_181 = arith.constant 0 : index
    %267 = vector.load %arg7[%c5_179, %c0_180, %c0_181] : memref<9x32x40xf32, #tpu.memory_space<vmem>>, vector<1x32x40xf32>
    %268 = vector.shape_cast %267 : vector<1x32x40xf32> to vector<32x40xf32>
    %c0_182 = arith.constant 0 : index
    %c97 = arith.constant 97 : index
    %269 = vector.load %arg10[%c0_182, %c97] : memref<40x576xf32, #tpu.memory_space<vmem>>, vector<40x384xf32>
    %cst_183 = arith.constant dense<0.000000e+00> : vector<32x384xf32>
    %270 = tpu.matmul %268, %269, %cst_183 {dimension_numbers = #tpu.dot_dimension_numbers<[1], [0], [0], [1], [0, 0, 1, 1], [], []>} : vector<32x40xf32>, vector<40x384xf32>, vector<32x384xf32> -> vector<32x384xf32>
    %271 = arith.addf %266, %270 : vector<32x384xf32>
    %c6_184 = arith.constant 6 : index
    %c0_185 = arith.constant 0 : index
    %c0_186 = arith.constant 0 : index
    %272 = vector.load %arg7[%c6_184, %c0_185, %c0_186] : memref<9x32x40xf32, #tpu.memory_space<vmem>>, vector<1x32x40xf32>
    %273 = vector.shape_cast %272 : vector<1x32x40xf32> to vector<32x40xf32>
    %c0_187 = arith.constant 0 : index
    %c119 = arith.constant 119 : index
    %274 = vector.load %arg10[%c0_187, %c119] : memref<40x576xf32, #tpu.memory_space<vmem>>, vector<40x384xf32>
    %cst_188 = arith.constant dense<0.000000e+00> : vector<32x384xf32>
    %275 = tpu.matmul %273, %274, %cst_188 {dimension_numbers = #tpu.dot_dimension_numbers<[1], [0], [0], [1], [0, 0, 1, 1], [], []>} : vector<32x40xf32>, vector<40x384xf32>, vector<32x384xf32> -> vector<32x384xf32>
    %276 = arith.addf %271, %275 : vector<32x384xf32>
    %c7_189 = arith.constant 7 : index
    %c0_190 = arith.constant 0 : index
    %c0_191 = arith.constant 0 : index
    %277 = vector.load %arg7[%c7_189, %c0_190, %c0_191] : memref<9x32x40xf32, #tpu.memory_space<vmem>>, vector<1x32x40xf32>
    %278 = vector.shape_cast %277 : vector<1x32x40xf32> to vector<32x40xf32>
    %c0_192 = arith.constant 0 : index
    %c120 = arith.constant 120 : index
    %279 = vector.load %arg10[%c0_192, %c120] : memref<40x576xf32, #tpu.memory_space<vmem>>, vector<40x384xf32>
    %cst_193 = arith.constant dense<0.000000e+00> : vector<32x384xf32>
    %280 = tpu.matmul %278, %279, %cst_193 {dimension_numbers = #tpu.dot_dimension_numbers<[1], [0], [0], [1], [0, 0, 1, 1], [], []>} : vector<32x40xf32>, vector<40x384xf32>, vector<32x384xf32> -> vector<32x384xf32>
    %281 = arith.addf %276, %280 : vector<32x384xf32>
    %c8_194 = arith.constant 8 : index
    %c0_195 = arith.constant 0 : index
    %c0_196 = arith.constant 0 : index
    %282 = vector.load %arg7[%c8_194, %c0_195, %c0_196] : memref<9x32x40xf32, #tpu.memory_space<vmem>>, vector<1x32x40xf32>
    %283 = vector.shape_cast %282 : vector<1x32x40xf32> to vector<32x40xf32>
    %c0_197 = arith.constant 0 : index
    %c121 = arith.constant 121 : index
    %284 = vector.load %arg10[%c0_197, %c121] : memref<40x576xf32, #tpu.memory_space<vmem>>, vector<40x384xf32>
    %cst_198 = arith.constant dense<0.000000e+00> : vector<32x384xf32>
    %285 = tpu.matmul %283, %284, %cst_198 {dimension_numbers = #tpu.dot_dimension_numbers<[1], [0], [0], [1], [0, 0, 1, 1], [], []>} : vector<32x40xf32>, vector<40x384xf32>, vector<32x384xf32> -> vector<32x384xf32>
    %286 = arith.addf %281, %285 : vector<32x384xf32>
    %c0_199 = arith.constant 0 : index
    %c0_200 = arith.constant 0 : index
    %287 = vector.load %arg8[%c0_199, %c0_200] : memref<32x1xf32, #tpu.memory_space<vmem>>, vector<32x1xf32>
    %288 = vector.broadcast %287 : vector<32x1xf32> to vector<32x384xf32>
    %289 = arith.addf %286, %288 : vector<32x384xf32>
    %cst_201 = arith.constant 0.000000e+00 : f32
    %290 = vector.broadcast %cst_201 : f32 to vector<32x384xf32>
    %291 = arith.maximumf %289, %290 : vector<32x384xf32>
    %c0_202 = arith.constant 0 : index
    %c0_203 = arith.constant 0 : index
    %c0_204 = arith.constant 0 : index
    %292 = vector.load %arg9[%c0_202, %c0_203, %c0_204] : memref<1x32x384xf32, #tpu.memory_space<vmem>>, vector<1x32x384xf32>
    %293 = vector.shape_cast %292 : vector<1x32x384xf32> to vector<32x384xf32>
    %294 = vector.shape_cast %291 : vector<32x384xf32> to vector<1x32x384xf32>
    tpu.vector_store %arg9[%c0_202, %c0_203, %c0_204], %294 {strides = array<i32>} : memref<1x32x384xf32, #tpu.memory_space<vmem>>, vector<1x32x384xf32>,
    return
  }
  func.func @transform_0(%arg0: i32) -> (i32, i32, i32) {
    %c0_i32 = arith.constant 0 : i32
    %c0_i32_0 = arith.constant 0 : i32
    %c0_i32_1 = arith.constant 0 : i32
    return %arg0, %c0_i32, %c0_i32_0 : i32, i32, i32
  }
  func.func @transform_1(%arg0: i32) -> (i32, i32) {
    %c0_i32 = arith.constant 0 : i32
    %c0_i32_0 = arith.constant 0 : i32
    %c0_i32_1 = arith.constant 0 : i32
    return %c0_i32, %c0_i32_0 : i32, i32
  }
  func.func @transform_2(%arg0: i32) -> (i32, i32) {
    %c0_i32 = arith.constant 0 : i32
    %c0_i32_0 = arith.constant 0 : i32
    %c0_i32_1 = arith.constant 0 : i32
    return %c0_i32, %c0_i32_0 : i32, i32
  }
  func.func @transform_3(%arg0: i32) -> (i32, i32) {
    %c0_i32 = arith.constant 0 : i32
    %c0_i32_0 = arith.constant 0 : i32
    %c0_i32_1 = arith.constant 0 : i32
    return %c0_i32, %c0_i32_0 : i32, i32
  }
  func.func @transform_4(%arg0: i32) -> (i32, i32, i32) {
    %c0_i32 = arith.constant 0 : i32
    %c0_i32_0 = arith.constant 0 : i32
    %c0_i32_1 = arith.constant 0 : i32
    %c0_i32_2 = arith.constant 0 : i32
    return %c0_i32, %c0_i32_0, %c0_i32_1 : i32, i32, i32
  }
  func.func @transform_5(%arg0: i32) -> (i32, i32, i32) {
    %c0_i32 = arith.constant 0 : i32
    %c0_i32_0 = arith.constant 0 : i32
    %c0_i32_1 = arith.constant 0 : i32
    %c0_i32_2 = arith.constant 0 : i32
    return %c0_i32, %c0_i32_0, %c0_i32_1 : i32, i32, i32
  }
  func.func @transform_6(%arg0: i32) -> (i32, i32, i32) {
    %c0_i32 = arith.constant 0 : i32
    %c0_i32_0 = arith.constant 0 : i32
    %c0_i32_1 = arith.constant 0 : i32
    %c0_i32_2 = arith.constant 0 : i32
    return %c0_i32, %c0_i32_0, %c0_i32_1 : i32, i32, i32
  }
  func.func @transform_7(%arg0: i32) -> (i32, i32) {
    %c0_i32 = arith.constant 0 : i32
    %c0_i32_0 = arith.constant 0 : i32
    %c0_i32_1 = arith.constant 0 : i32
    return %c0_i32, %c0_i32_0 : i32, i32
  }
  func.func @transform_8(%arg0: i32) -> (i32, i32, i32) {
    %c0_i32 = arith.constant 0 : i32
    %c0_i32_0 = arith.constant 0 : i32
    %c0_i32_1 = arith.constant 0 : i32
    return %arg0, %c0_i32, %c0_i32_0 : i32, i32, i32
  }
}

</mosaic_0001>

<bundles_post_ra>
// kernel: tpu_custom_call.1
= control target key start
LH: loop header
LB: loop body
LE: loop exit
PB: predicated region body
PF: predicated region fallthrough
CT: control target
= control target key end

     0   :  { %13 = vsyncpa [#allocation4], 0  ;;  %s13371_s0 = inlined_call_operand.vmem [shape: f32[2,4,576], index: 0, kind: input, shape index: {}]   ;;  %s13372_s1 = inlined_call_operand.vmem [shape: f32[1,576], index: 1, kind: input, shape index: {}]   ;;  %s13373_s2 = inlined_call_operand.vmem [shape: f32[8,4], index: 2, kind: input, shape index: {}]   ;;  %s13374_s3 = inlined_call_operand.vmem [shape: f32[8,1], index: 3, kind: input, shape index: {}]   ;;  %s13375_s4 = inlined_call_operand.vmem [shape: f32[36,8,4], index: 4, kind: input, shape index: {}]   ;;  %s13376_s5 = inlined_call_operand.vmem [shape: f32[4,8,1], index: 5, kind: input, shape index: {}]   ;;  %s13377_s6 = inlined_call_operand.vmem [shape: f32[9,32,40], index: 6, kind: input, shape index: {}]   ;;  %s13378_s7 = inlined_call_operand.vmem [shape: f32[32,1], index: 7, kind: input, shape index: {}]   ;;  %s13379_s8 = inlined_call_operand.hbm [shape: f32[2,32,384], index: 8, kind: output, shape index: {}]  }
   0x1   :  { %15 = vsyncpa [#allocation4 + $0x1], 0  ;;  %s10873_s27 = smov 0   ;;  %s10875_s28 = smov 0  }
   0x2   :  { %s10877_s29 = smov 0   ;;  %s10879_s30 = smov 0  }
   0x3 LB: > { %s10894_s9 = sadd.s32 4294967295, %s10783_s30   ;;  %s9145_s10 = sadd.s32 4294967294, %s10783_s30   ;;  %s10783_s30 = sphi %s10879_s30, %s13449_s30   ;;  %s10779_s29 = sphi %s10877_s29, %s13448_s29   ;;  %s10775_s28 = sphi %s10875_s28, %s13447_s28   ;;  %s10771_s27 = sphi %s10873_s27, %s13446_s27  }
   0x4   : > { %s10898_s11 = sadd.s32 1, %s10783_s30   ;;  %s201_s12 = sadd.s32 1, %s10779_s29 }
   0x5   : > { %s198_s13 = ssub.s32 %s10783_s30, %s10898_s11  ;;  %p211_p0 = scmp.ne.s32.totalorder %s10779_s29, %s10775_s28 }
   0x6   : > { %p199_p1 = scmp.eq.s32.totalorder %s198_s13, 0  ;;  %p212_p2 = scmp.eq.s32.totalorder %s10894_s9, 1 }
   0x7   : > { %p217_p3 = scmp.ne.s32.totalorder %s10775_s28, %s10771_s27  ;;  %p218_p4 = scmp.eq.s32.totalorder %s9145_s10, 1 }
   0x8   : > { %s10909_s14 = scalar_select %p199_p1, %s10779_s29, %s201_s12  }
   0x9   : > { %p10911_p5 = por %p212_p2, %p211_p0  ;;  %p10915_p6 = por %p218_p4, %p217_p3 }
   0xa   : > { %p9148_p7 = scmp.ge.s32.totalorder %s10783_s30, 1  ;;  %p265_p8 = scmp.lt.s32.totalorder %s10783_s30, 3 }
   0xc   : > { %p266_p9 = pnand %p9148_p7, %p265_p8 }
   0xe   : > { %269 = sbr.rel (%p266_p9) target bundleno = 1325 (0x52d), region = 52 }
  0x15   : > { %p299_p10 = scmp.lt.s32.totalorder %s10894_s9, 1  ;;  %v13389_v0 = vmov 0.0   ;;  %s10786_s22 = smov 52   ;;  %vm333_vm0 = vcmask 1043456   ;;  %vm341_vm1 = vcmask 519168   ;;  %vm474_vm2 = vcmask 424960  }
  0x16   : > { %551 = vmatprep.mubr.f32.mxu1 %v13389_v0  ;;  %9632 = vmatprep.subr.mxu0 %v13389_v0  ;;  %s10787_s23 = smov 53   ;;  %s10788_s24 = smov 51   ;;  %vm636_vm3 = vcmask 433152   ;;  %vm349_vm4 = vcmask 31744   ;;  %v11068_v23 = vld [vmem:[%s13375_s4 + $0x8] sm:$0xff]  ;;  %vm800_vm5 = vcmask 416768  }
  0x17   : > { %s300_s17 = scalar_select %p299_p10, %s10894_s9, 1  ;;  %vm10803_vm6 = vmmov 0   ;;  %v11096_v31 = vld [vmem:[%s13375_s4] sm:$0xff]  ;;  %vm967_vm7 = vcmask 236544   ;;  %v11121_v38 = vld [vmem:[%s13375_s4 + $0x10] sm:$0xff]  ;;  %vm1134_vm8 = vcmask 228352  }
  0x18   : > { %s10789_s25 = smov 29   ;;  %s10790_s26 = smov 28   ;;  %9634 = vmatprep.mubr.msk.f32.mxu0 %vm10803_vm6, %v13389_v0  ;;  %v11147_v45 = vld [vmem:[%s13375_s4 + $0x18] sm:$0xff]  ;;  %vm1301_vm9 = vcmask 220160   ;;  %v10807_v50 = vmov 0   ;;  %v11173_v53 = vld [vmem:[%s13375_s4 + $0x20] sm:$0xff] }
  0x19   : > { %s10272_s18 = smul.u32 20, %s300_s17  ;;  %s10791_s10 = smov 27   ;;  %10355 = vset.pattern.permute.xlu0 %v10807_v50  ;;  %10356 = vset.pattern.permute.xlu1 %v10807_v50  ;;  %vm1468_vm10 = vcmask 39936   ;;  %v11196_v59 = vld [vmem:[%s13375_s4 + $0x28] sm:$0xff]  ;;  %vm1801_vm11 = vcmask 23552   ;;  %vm2019_vm12 = vcmask 621568  }
  0x1a   : > { %s10792_s12 = smov 5   ;;  %s10793_s13 = smov 4   ;;  %vm2181_vm13 = vcmask 637952   ;;  %vm2345_vm14 = vcmask 605184   ;;  %vm13386_vm15 = vcmask 244736   ;;  %v11332_v50 = vld [vmem:[%s13375_s4 + $0x58] sm:$0xff] }
  0x1b   : > { %s10928_s21 = scalar_lea.vmem %s13371_s0, %s10272_s18  ;;  %s13381_s17 = smov 3  }
  0x1c   : > { %v10931_v1 = vld [vmem:[%s10928_s21 + $0x8] sm:$0xff]  ;;  %v10934_v2 = vld [vmem:[%s10928_s21] sm:$0xff]  ;;  %s13380_s18 = smov 76   ;;  %s10796_s19 = smov 78   ;;  %v11045_v11 = vld [vmem:[%s10928_s21 + $0x10] sm:$0xf] }
  0x1d   : > { %470 = vrot.lane.b32.xlu0 %v10931_v1, %s10786_s22  ;;  %466 = vrot.lane.b32.xlu1 %v10934_v2, %s10786_s22  ;;  %v10942_v3 = vcombine.high %v10934_v2, %v10934_v2  ;;  %s13382_s20 = smov 74   ;;  %v11028_v4 = vcombine.high %v10931_v1, %v10931_v1  ;;  %v334_v5 = vsel %vm333_vm0, %v10934_v2, 0.0  ;;  %v337_v8 = vsel %vm333_vm0, %v10931_v1, 0.0 }
  0x1e   : > { %v342_v13 = vsel %vm341_vm1, %v11045_v11, 0.0  ;;  %vm13387_vm1 = vcmask 211968  }
  0x1f   : > { %v335_v6 = vsel %vm333_vm0, %v10942_v3, 0.0  ;;  %v339_v10 = vsel %vm333_vm0, %v11028_v4, 0.0 }
  0x20   : > { %v336_v7 = vadd.f32 %v335_v6, %v334_v5 }
  0x21   : > { %632 = vrot.lane.b32.xlu0 %v10931_v1, %s10787_s23  ;;  %628 = vrot.lane.b32.xlu1 %v10934_v2, %s10787_s23 }
  0x22   : > { %v338_v9 = vadd.f32 %v337_v8, %v336_v7  ;;  %v11221_v7 = vld [vmem:[%s13375_s4 + $0x30] sm:$0xff] }
  0x24   : > { %v340_v12 = vadd.f32 %v339_v10, %v338_v9 }
  0x25   : > { %630 = vrot.lane.b32.xlu1 %v10942_v3, %s10787_s23  ;;  %468 = vrot.lane.b32.xlu0 %v10942_v3, %s10786_s22 }
  0x26   : > { %v343_v14 = vadd.f32 %v342_v13, %v340_v12 }
  0x29   : > { %796 = vrot.lane.b32.xlu1 %v10931_v1, %s10788_s24  ;;  %794 = vrot.lane.b32.xlu0 %v10942_v3, %s10788_s24 }
  0x2d   : > { %961 = vrot.lane.b32.xlu1 %v10942_v3, %s10789_s25  ;;  %792 = vrot.lane.b32.xlu0 %v10934_v2, %s10788_s24 }
  0x31   : > { %959 = vrot.lane.b32.xlu1 %v10934_v2, %s10789_s25  ;;  %963 = vrot.lane.b32.xlu0 %v10931_v1, %s10789_s25 }
  0x35   : > { %1130 = vrot.lane.b32.xlu1 %v10931_v1, %s10790_s26  ;;  %1128 = vrot.lane.b32.xlu0 %v10942_v3, %s10790_s26 }
  0x39   : > { %1295 = vrot.lane.b32.xlu1 %v10942_v3, %s10791_s10  ;;  %1126 = vrot.lane.b32.xlu0 %v10934_v2, %s10790_s26 }
  0x3d   : > { %1293 = vrot.lane.b32.xlu1 %v10934_v2, %s10791_s10  ;;  %1297 = vrot.lane.b32.xlu0 %v10931_v1, %s10791_s10 }
  0x41   : > { %1464 = vrot.lane.b32.xlu1 %v10931_v1, %s10792_s12  ;;  %1462 = vrot.lane.b32.xlu0 %v10942_v3, %s10792_s12 }
  0x45   : > { %1629 = vrot.lane.b32.xlu1 %v10942_v3, %s10793_s13  ;;  %1460 = vrot.lane.b32.xlu0 %v10934_v2, %s10792_s12 }
  0x49   : > { %1627 = vrot.lane.b32.xlu1 %v10934_v2, %s10793_s13  ;;  %1631 = vrot.lane.b32.xlu0 %v10931_v1, %s10793_s13 }
  0x4d   : > { %1797 = vrot.lane.b32.xlu1 %v10931_v1, %s13381_s17  ;;  %1795 = vrot.lane.b32.xlu0 %v10942_v3, %s13381_s17 }
  0x51   : > { %2013 = vrot.lane.b32.xlu1 %v10942_v3, %s13380_s18  ;;  %1793 = vrot.lane.b32.xlu0 %v10934_v2, %s13381_s17  ;;  %s13383_s17 = smov 26  }
  0x55   : > { %2011 = vrot.lane.b32.xlu1 %v10934_v2, %s13380_s18  ;;  %2015 = vrot.lane.b32.xlu0 %v10931_v1, %s13380_s18  ;;  %s10798_s18 = smov 30  }
  0x59   : > { %2177 = vrot.lane.b32.xlu1 %v10931_v1, %s10796_s19  ;;  %2175 = vrot.lane.b32.xlu0 %v10942_v3, %s10796_s19 }
  0x5d   : > { %2339 = vrot.lane.b32.xlu1 %v10942_v3, %s13382_s20  ;;  %2173 = vrot.lane.b32.xlu0 %v10934_v2, %s10796_s19 }
  0x61   : > { %2337 = vrot.lane.b32.xlu1 %v10934_v2, %s13382_s20  ;;  %2341 = vrot.lane.b32.xlu0 %v10931_v1, %s13382_s20  ;;  %s13384_s20 = smov 110  }
  0x65   : > { %2508 = vrot.lane.b32.xlu1 %v10931_v1, %s10798_s18  ;;  %2506 = vrot.lane.b32.xlu0 %v10942_v3, %s10798_s18 }
  0x69   : > { %2822 = vrot.lane.b32.xlu1 %v10942_v3, %s13383_s17  ;;  %2504 = vrot.lane.b32.xlu0 %v10934_v2, %s10798_s18 }
  0x6d   : > { %2824 = vrot.lane.b32.xlu0 %v10931_v1, %s13383_s17 }
  0x71   : > { %2820 = vrot.lane.b32.xlu0 %v10934_v2, %s13383_s17  ;;  %s13385_s17 = smov 108  }
  0x75   : > { %2989 = vrot.lane.b32.xlu0 %v10931_v1, %s13384_s20 }
  0x79   : > { %2991 = vrot.lane.b32.xlu0 %v11028_v4, %s13384_s20 }
  0x7d   : > { %2987 = vrot.lane.b32.xlu0 %v10942_v3, %s13384_s20  ;;  %s10802_s20 = smov 106  }
  0x81   : > { %3156 = vrot.lane.b32.xlu0 %v10931_v1, %s13385_s17 }
  0x85   : > { %3158 = vrot.lane.b32.xlu0 %v11028_v4, %s13385_s17 }
  0x89   : > { %3154 = vrot.lane.b32.xlu0 %v10942_v3, %s13385_s17  ;;  %s10805_s17 = smov 103  }
  0x8d   : > { %472 = vrot.lane.b32.xlu0 %v11028_v4, %s10786_s22  ;;  %344 = vadd.xlane.f32.xlu1 %v343_v14  ;;  %s10804_s22 = smov 100   ;;  %v11242_v14 = vld [vmem:[%s13375_s4 + $0x38] sm:$0xff] }
  0x8f   : > { %v11054_v15 = vpop.permute.xlu0 %470  ;;  %v467_v16 = vpop.permute.xlu1 %466 }
  0x91   : > { %634 = vrot.lane.b32.xlu0 %v11028_v4, %s10787_s23  ;;  %s13407_s23 = smov 76  }
  0x93   : > { %v11058_v17 = vpop.permute.xlu0 %632  ;;  %v629_v18 = vpop.permute.xlu1 %628 }
  0x95   : > { %3325 = vrot.lane.b32.xlu0 %v11028_v4, %s10802_s20 }
  0x97   : > { %v631_v19 = vpop.permute.xlu1 %630  ;;  %v469_v20 = vpop.permute.xlu0 %468 }
  0x98   : > { %v476_v21 = vsel %vm474_vm2, %v469_v20, %v11054_v15  ;;  %v475_v22 = vsel %vm474_vm2, %v467_v16, %v469_v20  ;;  %v638_v24 = vsel %vm636_vm3, %v631_v19, %v11058_v17  ;;  %v637_v25 = vsel %vm636_vm3, %v629_v18, %v631_v19 }
  0x99   : > { %3321 = vrot.lane.b32.xlu0 %v10942_v3, %s10802_s20  ;;  %9153 = vmatprep.subr.msk.mxu1 %vm333_vm0, %v476_v21 }
  0x9a   : > { %9154 = vmatpush1.msk.msra.mxu1 %vm333_vm0, %v475_v22  ;;  %v11267_v22 = vld [vmem:[%s13375_s4 + $0x40] sm:$0xff] }
  0x9b   : > { %v11077_v26 = vpop.permute.xlu1 %796  ;;  %9155 = vmatmul.mubr.msk.f32.vlgmr.msra.gmra.mrb[0].mxu1 %vm349_vm4, %v11068_v23  ;;  %9158 = vmatprep.subr.msk.mxu1 %vm333_vm0, %v638_v24  ;;  %v795_v27 = vpop.permute.xlu0 %794 }
  0x9c   : > { %9159 = vmatpush1.msk.msra.mxu1 %vm333_vm0, %v637_v25  ;;  %v802_v28 = vsel %vm800_vm5, %v795_v27, %v11077_v26  ;;  %713 = vmatprep.mubr.f32.mxu1 %v13389_v0 }
  0x9d   : > { %798 = vrot.lane.b32.xlu0 %v11028_v4, %s10788_s24  ;;  %9164 = vmatprep.subr.msk.mxu1 %vm333_vm0, %v802_v28  ;;  %s10810_s24 = smov 87  }
  0x9e   : > { %3323 = vrot.lane.b32.xlu1 %v10931_v1, %s10802_s20 }
  0x9f   : > { %v962_v29 = vpop.permute.xlu1 %961  ;;  %v793_v30 = vpop.permute.xlu0 %792 }
  0xa0   : > { %v801_v32 = vsel %vm800_vm5, %v793_v30, %v795_v27 }
  0xa1   : > { %3527 = vrot.lane.b32.xlu0 %v10942_v3, %s10804_s22 }
  0xa2   : > { %3529 = vrot.lane.b32.xlu1 %v10931_v1, %s10804_s22 }
  0xa3   : > { %v960_v33 = vpop.permute.xlu1 %959  ;;  %9160 = vmatmul.mubr.msk.f32.vlgmr.msra.gmra.mrb[0].mxu1 %vm349_vm4, %v11096_v31  ;;  %v11105_v34 = vpop.permute.xlu0 %963 }
  0xa4   : > { %9165 = vmatpush1.msk.msra.mxu1 %vm333_vm0, %v801_v32  ;;  %v969_v35 = vsel %vm967_vm7, %v962_v29, %v11105_v34  ;;  %877 = vmatprep.mubr.f32.mxu1 %v13389_v0  ;;  %v968_v39 = vsel %vm967_vm7, %v960_v33, %v962_v29  ;;  %v11283_v29 = vld [vmem:[%s13375_s4 + $0x50] sm:$0xff] }
  0xa5   : > { %3525 = vrot.lane.b32.xlu0 %v10934_v2, %s10804_s22  ;;  %9170 = vmatprep.subr.msk.mxu1 %vm333_vm0, %v969_v35 }
  0xa6   : > { %965 = vrot.lane.b32.xlu1 %v11028_v4, %s10789_s25  ;;  %s13406_s25 = smov 3  }
  0xa7   : > { %v11116_v36 = vpop.permute.xlu1 %1130  ;;  %v1129_v37 = vpop.permute.xlu0 %1128 }
  0xa8   : > { %v11133_v42 = vsel %vm1134_vm8, %v1129_v37, %v11116_v36 }
  0xa9   : > { %1132 = vrot.lane.b32.xlu0 %v11028_v4, %s10790_s26 }
  0xaa   : > { %3688 = vrot.lane.b32.xlu1 %v10942_v3, %s10805_s17 }
  0xab   : > { %v1296_v40 = vpop.permute.xlu1 %1295  ;;  %9166 = vmatmul.mubr.msk.f32.vlgmr.msra.gmra.mrb[0].mxu1 %vm349_vm4, %v11121_v38  ;;  %v1127_v41 = vpop.permute.xlu0 %1126 }
  0xac   : > { %9171 = vmatpush1.msk.msra.mxu1 %vm333_vm0, %v968_v39  ;;  %1044 = vmatprep.mubr.f32.mxu1 %v13389_v0  ;;  %v11150_v46 = vsel %vm1134_vm8, %v1127_v41, %v1129_v37  ;;  %v11307_v39 = vld [vmem:[%s13375_s4 + $0x48] sm:$0xff] }
  0xad   : > { %9176 = vmatprep.subr.msk.mxu1 %vm333_vm0, %v11133_v42  ;;  %3690 = vrot.lane.b32.xlu0 %v10931_v1, %s10805_s17 }
  0xae   : > { %3686 = vrot.lane.b32.xlu1 %v10934_v2, %s10805_s17 }
  0xaf   : > { %v1294_v43 = vpop.permute.xlu1 %1293  ;;  %v11142_v44 = vpop.permute.xlu0 %1297 }
  0xb0   : > { %v1303_v49 = vsel %vm1301_vm9, %v1296_v40, %v11142_v44  ;;  %v1302_v54 = vsel %vm1301_vm9, %v1294_v43, %v1296_v40 }
  0xb1   : > { %1299 = vrot.lane.b32.xlu0 %v11028_v4, %s10791_s10  ;;  %s10806_s10 = smov 97  }
  0xb2   : > { %1466 = vrot.lane.b32.xlu1 %v11028_v4, %s10792_s12  ;;  %s13408_s12 = smov 74  }
  0xb3   : > { %v11156_v47 = vpop.permute.xlu1 %1464  ;;  %9172 = vmatmul.mubr.msk.f32.vlgmr.msra.gmra.mrb[0].mxu1 %vm349_vm4, %v11147_v45  ;;  %v1463_v48 = vpop.permute.xlu0 %1462 }
  0xb4   : > { %9177 = vmatpush1.msk.msra.mxu1 %vm333_vm0, %v11150_v46  ;;  %1211 = vmatprep.mubr.f32.mxu1 %v13389_v0  ;;  %v1470_v57 = vsel %vm1468_vm10, %v1463_v48, %v11156_v47 }
  0xb5   : > { %9182 = vmatprep.subr.msk.mxu1 %vm333_vm0, %v1303_v49  ;;  %3852 = vrot.lane.b32.xlu0 %v10942_v3, %s10806_s10 }
  0xb6   : > { %3854 = vrot.lane.b32.xlu1 %v10931_v1, %s10806_s10 }
  0xb7   : > { %v1630_v51 = vpop.permute.xlu1 %1629  ;;  %v1461_v52 = vpop.permute.xlu0 %1460 }
  0xb8   : > { %v1469_v61 = vsel %vm1468_vm10, %v1461_v52, %v1463_v48 }
  0xb9   : > { %3850 = vrot.lane.b32.xlu0 %v10934_v2, %s10806_s10 }
  0xba   : > { %1633 = vrot.lane.b32.xlu1 %v11028_v4, %s10793_s13  ;;  %s10808_s13 = smov 31  }
  0xbb   : > { %v1628_v55 = vpop.permute.xlu1 %1627  ;;  %9178 = vmatmul.mubr.msk.f32.vlgmr.msra.gmra.mrb[0].mxu1 %vm349_vm4, %v11173_v53  ;;  %v11182_v56 = vpop.permute.xlu0 %1631 }
  0xbc   : > { %9183 = vmatpush1.msk.msra.mxu1 %vm333_vm0, %v1302_v54  ;;  %1378 = vmatprep.mubr.f32.mxu1 %v13389_v0  ;;  %v1636_v63 = vsel %vm349_vm4, %v1630_v51, %v11182_v56  ;;  %v1635_v8 = vsel %vm349_vm4, %v1628_v55, %v1630_v51  ;;  %v11350_v55 = vld [vmem:[%s13375_s4 + $0x60] sm:$0xff] }
  0xbd   : > { %9188 = vmatprep.subr.msk.mxu1 %vm333_vm0, %v1470_v57  ;;  %1799 = vrot.lane.b32.xlu0 %v11028_v4, %s13406_s25  ;;  %s13409_s25 = smov 26  }
  0xbe   : > { %4019 = vrot.lane.b32.xlu1 %v10942_v3, %s10808_s13 }
  0xbf   : > { %v1796_v58 = vpop.permute.xlu0 %1795  ;;  %v11198_v60 = vpop.permute.xlu1 %1797 }
  0xc0   : > { %v1803_v10 = vsel %vm1801_vm11, %v1796_v58, %v11198_v60 }
  0xc1   : > { %4021 = vrot.lane.b32.xlu0 %v10931_v1, %s10808_s13 }
  0xc2   : > { %4017 = vrot.lane.b32.xlu1 %v10934_v2, %s10808_s13 }
  0xc3   : > { %9184 = vmatmul.mubr.msk.f32.vlgmr.msra.gmra.mrb[0].mxu1 %vm349_vm4, %v11196_v59  ;;  %v1794_v62 = vpop.permute.xlu0 %1793  ;;  %v2014_v5 = vpop.permute.xlu1 %2013 }
  0xc4   : > { %9189 = vmatpush1.msk.msra.mxu1 %vm333_vm0, %v1469_v61  ;;  %1545 = vmatprep.mubr.f32.mxu1 %v13389_v0  ;;  %v1802_v16 = vsel %vm1801_vm11, %v1794_v62, %v1796_v58 }
  0xc5   : > { %9194 = vmatprep.subr.msk.mxu1 %vm333_vm0, %v1636_v63  ;;  %2017 = vrot.lane.b32.xlu0 %v11028_v4, %s13407_s23  ;;  %s13410_s23 = smov 110   ;;  %v11372_v63 = vld [vmem:[%s13375_s4 + $0x68] sm:$0xff] }
  0xc6   : > { %2179 = vrot.lane.b32.xlu1 %v11028_v4, %s10796_s19  ;;  %s10809_s19 = smov 25  }
  0xc7   : > { %v11216_v6 = vpop.permute.xlu0 %2015  ;;  %v2012_v12 = vpop.permute.xlu1 %2011 }
  0xc8   : > { %v2021_v20 = vsel %vm2019_vm12, %v2014_v5, %v11216_v6  ;;  %v2020_v25 = vsel %vm2019_vm12, %v2012_v12, %v2014_v5  ;;  %v11390_v12 = vld [vmem:[%s13375_s4 + $0x70] sm:$0xff] }
  0xc9   : > { %2343 = vrot.lane.b32.xlu0 %v11028_v4, %s13408_s12  ;;  %s10813_s12 = smov 124  }
  0xca   : > { %2510 = vrot.lane.b32.xlu1 %v11028_v4, %s10798_s18  ;;  %s13411_s18 = smov 108  }
  0xcb   : > { %9190 = vmatmul.mubr.msk.f32.vlgmr.msra.gmra.mrb[0].mxu1 %vm349_vm4, %v11221_v7  ;;  %v2176_v9 = vpop.permute.xlu0 %2175  ;;  %v11249_v18 = vpop.permute.xlu1 %2177 }
  0xcc   : > { %9195 = vmatpush1.msk.msra.mxu1 %vm333_vm0, %v1635_v8  ;;  %1711 = vmatprep.mubr.f32.mxu1 %v13389_v0  ;;  %v2183_v28 = vsel %vm2181_vm13, %v2176_v9, %v11249_v18 }
  0xcd   : > { %9200 = vmatprep.subr.msk.mxu1 %vm333_vm0, %v1803_v10  ;;  %4335 = vrot.lane.b32.xlu0 %v10942_v3, %s10809_s19 }
  0xce   : > { %4337 = vrot.lane.b32.xlu1 %v10931_v1, %s10809_s19 }
  0xcf   : > { %v2174_v13 = vpop.permute.xlu0 %2173  ;;  %v2340_v24 = vpop.permute.xlu1 %2339 }
  0xd0   : > { %v2182_v30 = vsel %vm2181_vm13, %v2174_v13, %v2176_v9 }
  0xd1   : > { %4333 = vrot.lane.b32.xlu0 %v10934_v2, %s10809_s19 }
  0xd2   : > { %2826 = vrot.lane.b32.xlu1 %v11028_v4, %s13409_s25  ;;  %s10821_s25 = smov 57  }
  0xd3   : > { %9196 = vmatmul.mubr.msk.f32.vlgmr.msra.gmra.mrb[0].mxu1 %vm349_vm4, %v11242_v14  ;;  %v11253_v19 = vpop.permute.xlu0 %2341  ;;  %v2338_v32 = vpop.permute.xlu1 %2337 }
  0xd4   : > { %9201 = vmatpush1.msk.msra.mxu1 %vm333_vm0, %v1802_v16  ;;  %1878 = vmatprep.mubr.f32.mxu1 %v13389_v0  ;;  %v2347_v35 = vsel %vm2345_vm14, %v2340_v24, %v11253_v19  ;;  %v2346_v41 = vsel %vm2345_vm14, %v2338_v32, %v2340_v24  ;;  %v11413_v24 = vld [vmem:[%s13375_s4 + $0x78] sm:$0xff] }
  0xd5   : > { %9207 = vmatprep.subr.msk.mxu1 %vm333_vm0, %v2021_v20  ;;  %4502 = vrot.lane.b32.xlu0 %v10931_v1, %s10810_s24 }
  0xd6   : > { %4504 = vrot.lane.b32.xlu1 %v11028_v4, %s10810_s24 }
  0xd7   : > { %v2507_v21 = vpop.permute.xlu0 %2506  ;;  %v11309_v40 = vpop.permute.xlu1 %2508 }
  0xd8   : > { %v2514_v48 = vsel %vm13386_vm15, %v2507_v21, %v11309_v40 }
  0xd9   : > { %4500 = vrot.lane.b32.xlu0 %v10942_v3, %s10810_s24 }
  0xda   : > { %2993 = vrot.lane.b32.xlu1 %v11045_v11, %s13410_s23  ;;  %s10811_s23 = smov 84  }
  0xdb   : > { %9202 = vmatmul.mubr.msk.f32.vlgmr.msra.gmra.mrb[0].mxu1 %vm349_vm4, %v11267_v22  ;;  %v2505_v27 = vpop.permute.xlu0 %2504  ;;  %v2823_v57 = vpop.permute.xlu1 %2822 }
  0xdc   : > { %9208 = vmatpush1.msk.msra.mxu1 %vm333_vm0, %v2020_v25  ;;  %2096 = vmatprep.mubr.f32.mxu1 %v13389_v0  ;;  %v2513_v51 = vsel %vm13386_vm15, %v2505_v27, %v2507_v21  ;;  %vm2995_vm15 = vcmask 900096  }
  0xdd   : > { %9212 = vmatprep.subr.msk.mxu1 %vm333_vm0, %v2183_v28  ;;  %3160 = vrot.lane.b32.xlu0 %v11045_v11, %s13411_s18  ;;  %s10812_s18 = smov 81  }
  0xde   : > { %4669 = vrot.lane.b32.xlu1 %v10931_v1, %s10811_s23 }
  0xdf   : > { %9209 = vmatmul.mubr.msk.f32.vlgmr.msra.gmra.mrb[2].mxu1 %vm349_vm4, %v11283_v29  ;;  %v11293_v33 = vpop.permute.xlu0 %2824 }
  0xe0   : > { %9213 = vmatpush1.msk.msra.mxu1 %vm333_vm0, %v2182_v30  ;;  %2258 = vmatprep.mubr.f32.mxu1 %v13389_v0  ;;  %v2830_v61 = vsel %vm13387_vm1, %v2823_v57, %v11293_v33  ;;  %v11431_v30 = vld [vmem:[%s13375_s4 + $0x80] sm:$0xff] }
  0xe1   : > { %9218 = vmatprep.subr.msk.mxu1 %vm333_vm0, %v2347_v35  ;;  %4671 = vrot.lane.b32.xlu0 %v11028_v4, %s10811_s23 }
  0xe2   : > { %4667 = vrot.lane.b32.xlu1 %v10942_v3, %s10811_s23 }
  0xe3   : > { %v2821_v37 = vpop.permute.xlu0 %2820 }
  0xe4   : > { %v2829_v5 = vsel %vm13387_vm1, %v2821_v37, %v2823_v57  ;;  %vm13388_vm1 = vcmask 883712  }
  0xe5   : > { %3327 = vrot.lane.b32.xlu0 %v11045_v11, %s10802_s20  ;;  %s10815_s20 = smov 32  }
  0xe6   : > { %3531 = vrot.lane.b32.xlu1 %v11028_v4, %s10804_s22 }
  0xe7   : > { %9214 = vmatmul.mubr.msk.f32.vlgmr.msra.gmra.mrb[2].mxu1 %vm349_vm4, %v11307_v39  ;;  %v2990_v43 = vpop.permute.xlu0 %2989 }
  0xe8   : > { %9219 = vmatpush1.msk.msra.mxu1 %vm333_vm0, %v2346_v41  ;;  %2422 = vmatprep.mubr.f32.mxu1 %v13389_v0  ;;  %v347_v41 = vld [vmem:[%s13373_s2] sm:$0xff] }
  0xe9   : > { %9224 = vmatprep.subr.msk.mxu1 %vm333_vm0, %v2514_v48  ;;  %4836 = vrot.lane.b32.xlu0 %v10931_v1, %s10812_s18 }
  0xea   : > { %4838 = vrot.lane.b32.xlu1 %v11028_v4, %s10812_s18 }
  0xeb   : > { %v11327_v49 = vpop.permute.xlu0 %2991 }
  0xec   : > { %v2997_v9 = vsel %vm2995_vm15, %v2990_v43, %v11327_v49 }
  0xed   : > { %4834 = vrot.lane.b32.xlu0 %v10942_v3, %s10812_s18 }
  0xee   : > { %3692 = vrot.lane.b32.xlu1 %v11028_v4, %s10805_s17 }
  0xef   : > { %9220 = vmatmul.mubr.msk.f32.vlgmr.msra.gmra.mrb[2].mxu1 %vm349_vm4, %v11332_v50  ;;  %v2988_v52 = vpop.permute.xlu0 %2987 }
  0xf0   : > { %9225 = vmatpush1.msk.msra.mxu1 %vm333_vm0, %v2513_v51  ;;  %2589 = vmatprep.mubr.f32.mxu1 %v13389_v0  ;;  %v2996_v13 = vsel %vm2995_vm15, %v2988_v52, %v2990_v43 }
  0xf1   : > { %9230 = vmatprep.subr.msk.mxu1 %vm333_vm0, %v11133_v42  ;;  %5040 = vrot.lane.b32.xlu0 %v10942_v3, %s10813_s12 }
  0xf2   : > { %5042 = vrot.lane.b32.xlu1 %v10931_v1, %s10813_s12 }
  0xf3   : > { %v3157_v54 = vpop.permute.xlu0 %3156 }
  0xf5   : > { %5038 = vrot.lane.b32.xlu0 %v10934_v2, %s10813_s12  ;;  %s10814_s12 = smov 120  }
  0xf6   : > { %3856 = vrot.lane.b32.xlu1 %v11028_v4, %s10806_s10  ;;  %s10816_s10 = smov 24  }
  0xf7   : > { %9226 = vmatmul.mubr.msk.f32.vlgmr.msra.gmra.mrb[2].mxu1 %vm349_vm4, %v11350_v55  ;;  %v11357_v58 = vpop.permute.xlu0 %3158 }
  0xf8   : > { %9231 = vmatpush1.msk.msra.mxu1 %vm333_vm0, %v11150_v46  ;;  %2738 = vmatprep.mubr.f32.mxu1 %v13389_v0  ;;  %v3164_v20 = vsel %vm13388_vm1, %v3157_v54, %v11357_v58 }
  0xf9   : > { %9236 = vmatprep.subr.msk.mxu1 %vm333_vm0, %v2830_v61  ;;  %4023 = vrot.lane.b32.xlu0 %v11028_v4, %s10808_s13 }
  0xfa   : > { %4339 = vrot.lane.b32.xlu1 %v11028_v4, %s10809_s19  ;;  %s10819_s19 = smov 56  }
  0xfb   : > { %v3155_v62 = vpop.permute.xlu0 %3154 }
  0xfc   : > { %v3163_v25 = vsel %vm13388_vm1, %v3155_v62, %v3157_v54  ;;  %vm3329_vm1 = vcmask 867328  }
  0xfd   : > { %5351 = vrot.lane.b32.xlu0 %v10942_v3, %s10814_s12 }
  0xfe   : > { %5353 = vrot.lane.b32.xlu1 %v10931_v1, %s10814_s12 }
  0xff   : > { %9232 = vmatmul.mubr.msk.f32.vlgmr.msra.gmra.mrb[2].mxu1 %vm349_vm4, %v11372_v63  ;;  %v473_v8 = vpop.permute.xlu0 %472 }
 0x100   : > { %9237 = vmatpush1.msk.msra.mxu1 %vm333_vm0, %v2829_v5  ;;  %2905 = vmatprep.mubr.f32.mxu1 %v13389_v0  ;;  %v477_v43 = vsel %vm474_vm2, %v11054_v15, %v473_v8  ;;  %v11464_v15 = vld [vmem:[%s13375_s4 + $0x88] sm:$0xff]  ;;  %vm1996_vm2 = vcmask 818176  }
 0x101   : > { %9242 = vmatprep.subr.msk.mxu1 %vm333_vm0, %v2997_v9  ;;  %5349 = vrot.lane.b32.xlu0 %v10934_v2, %s10814_s12  ;;  %s10817_s12 = smov 64   ;;  %v11496_v9 = vld [vmem:[%s13375_s4 + $0x98] sm:$0xff] }
 0x102   : > { %4506 = vrot.lane.b32.xlu1 %v11045_v11, %s10810_s24 }
 0x103   : > { %v635_v10 = vpop.permute.xlu0 %634 }
 0x104   : > { %v639_v57 = vsel %vm636_vm3, %v11058_v17, %v635_v10  ;;  %vm3694_vm3 = vcmask 842752  }
 0x105   : > { %4673 = vrot.lane.b32.xlu0 %v11045_v11, %s10811_s23 }
 0x106   : > { %5515 = vrot.lane.b32.xlu1 %v10942_v3, %s10815_s20 }
 0x107   : > { %9238 = vmatmul.mubr.msk.f32.vlgmr.msra.gmra.mrb[2].mxu1 %vm349_vm4, %v11390_v12  ;;  %v11399_v16 = vpop.permute.xlu0 %3325 }
 0x108   : > { %9243 = vmatpush1.msk.msra.mxu1 %vm333_vm0, %v2996_v13  ;;  %3072 = vmatprep.mubr.f32.mxu1 %v13389_v0 }
 0x109   : > { %9248 = vmatprep.subr.msk.mxu1 %vm333_vm0, %v3164_v20  ;;  %5517 = vrot.lane.b32.xlu0 %v10931_v1, %s10815_s20 }
 0x10a   : > { %5513 = vrot.lane.b32.xlu1 %v10934_v2, %s10815_s20 }
 0x10b   : > { %v3322_v21 = vpop.permute.xlu0 %3321 }
 0x10d   : > { %4840 = vrot.lane.b32.xlu0 %v11045_v11, %s10812_s18  ;;  %s10818_s18 = smov 60  }
 0x10e   : > { %5831 = vrot.lane.b32.xlu1 %v10942_v3, %s10816_s10 }
 0x10f   : > { %9244 = vmatmul.mubr.msk.f32.vlgmr.msra.gmra.mrb[2].mxu1 %vm349_vm4, %v11413_v24  ;;  %v799_v27 = vpop.permute.xlu0 %798 }
 0x110   : > { %9249 = vmatpush1.msk.msra.mxu1 %vm333_vm0, %v3163_v25  ;;  %3239 = vmatprep.mubr.f32.mxu1 %v13389_v0  ;;  %v803_v17 = vsel %vm800_vm5, %v11077_v26, %v799_v27  ;;  %v433_v26 = vlaneseq  ;;  %vm3858_vm5 = vcmask 793600  }
 0x111   : > { %5833 = vrot.lane.b32.xlu0 %v10931_v1, %s10816_s10 }
 0x112   : > { %5829 = vrot.lane.b32.xlu1 %v10934_v2, %s10816_s10 }
 0x113   : > { %v3528_v28 = vpop.permute.xlu0 %3527 }
 0x115   : > { %5519 = vrot.lane.b32.xlu0 %v11028_v4, %s10815_s20 }
 0x116   : > { %5998 = vrot.lane.b32.xlu1 %v10931_v1, %s10817_s12 }
 0x117   : > { %v3526_v32 = vpop.permute.xlu0 %3525  ;;  %9250 = vmatmul.mubr.msk.f32.vlgmr.msra.gmra.mrb[2].mxu1 %vm349_vm4, %v11431_v30 }
 0x118   : > { %3406 = vmatprep.mubr.f32.mxu1 %v13389_v0  ;;  %v3533_v8 = vsel %vm1996_vm2, %v3526_v32, %v3528_v28  ;;  %v1958_v32 = vld [vmem:[%s13376_s5] sm:$0xff] }
 0x119   : > { %6000 = vrot.lane.b32.xlu0 %v11028_v4, %s10817_s12 }
 0x11a   : > { %v345_v2 = vpop.xlane.xlu1 %344  ;;  %5996 = vrot.lane.b32.xlu1 %v10942_v3, %s10817_s12 }
 0x11b   : > { %v346_v35 = vmul.f32 0.00390625, %v345_v2  ;;  %v11441_v37 = vpop.permute.xlu0 %1132 }
 0x11d   : > { %9633 = vmatpush3.msk.msra.mxu0 %vm333_vm0, %v346_v35  ;;  %5835 = vrot.lane.b32.xlu0 %v11028_v4, %s10816_s10 }
 0x11e   : > { %9635 = vmatmul.mubr.msk.f32.vlgmr.msra.gmra.mrb[0].mxu0 %vm349_vm4, %v347_v41  ;;  %9637 = vmatprep.subr.mxu0 %v13389_v0  ;;  %v3324_v48 = vpop.permute.xlu1 %3323 }
 0x11f   : > { %v3330_v51 = vsel %vm3329_vm1, %v3322_v21, %v3324_v48  ;;  %v11454_v52 = vpop.permute.xlu0 %3690  ;;  %9638 = vmatpush3.msk.msra.mxu0 %vm333_vm0, %v477_v43  ;;  %v3331_v54 = vsel %vm3329_vm1, %v3324_v48, %v11399_v16  ;;  %9639 = vmatprep.mubr.msk.f32.mxu0 %vm10803_vm6, %v13389_v0 }
 0x120   : > { %9254 = vmatprep.subr.msk.mxu1 %vm333_vm0, %v3331_v54  ;;  %9642 = vmatprep.subr.mxu0 %v13389_v0  ;;  %v11599_v54 = vld [vmem:[%s13375_s4 + $0xa0] sm:$0xff] }
 0x121   : > { %9255 = vmatpush1.msk.msra.mxu1 %vm333_vm0, %v3330_v51  ;;  %6002 = vrot.lane.b32.xlu1 %v11045_v11, %s10817_s12  ;;  %s10822_s12 = smov 33  }
 0x122   : > { %9640 = vmatmul.mubr.msk.f32.vlgmr.msra.gmra.mrb[2].mxu0 %vm349_vm4, %v11068_v23  ;;  %v11474_v61 = vpop.permute.xlu1 %3529  ;;  %9256 = vmatmul.mubr.msk.f32.vlgmr.msra.gmra.mrb[2].mxu1 %vm349_vm4, %v11464_v15 }
 0x123   : > { %9643 = vmatpush3.msk.msra.mxu0 %vm333_vm0, %v639_v57  ;;  %v1300_v62 = vpop.permute.xlu0 %1299  ;;  %v3534_v5 = vsel %vm1996_vm2, %v3528_v28, %v11474_v61  ;;  %9644 = vmatprep.mubr.msk.f32.mxu0 %vm10803_vm6, %v13389_v0 }
 0x124   : > { %9262 = vmatprep.subr.msk.mxu1 %vm333_vm0, %v3534_v5  ;;  %9647 = vmatprep.subr.mxu0 %v13389_v0 }
 0x125   : > { %9263 = vmatpush1.msk.msra.mxu1 %vm333_vm0, %v3533_v8  ;;  %6165 = vrot.lane.b32.xlu0 %v10931_v1, %s10818_s18 }
 0x126   : > { %6167 = vrot.lane.b32.xlu1 %v11028_v4, %s10818_s18  ;;  %9645 = vmatmul.mubr.msk.f32.vlgmr.msra.gmra.mrb[4].mxu0 %vm349_vm4, %v11096_v31  ;;  %v966_v23 = vpop.permute.xlu1 %965 }
 0x127   : > { %9648 = vmatpush3.msk.msra.mxu0 %vm333_vm0, %v803_v17  ;;  %v11499_v10 = vpop.permute.xlu0 %3852  ;;  %9649 = vmatprep.mubr.msk.f32.mxu0 %vm10803_vm6, %v13389_v0  ;;  %v970_v31 = vsel %vm967_vm7, %v11105_v34, %v966_v23  ;;  %v11523_v34 = vshrl.u32 %v433_v26, 7  ;;  %vm4025_vm7 = vcmask 252928  }
 0x128   : > { %9652 = vmatprep.subr.mxu0 %v13389_v0  ;;  %3609 = vmatprep.mubr.f32.mxu1 %v13389_v0 }
 0x129   : > { %6163 = vrot.lane.b32.xlu0 %v10942_v3, %s10818_s18  ;;  %9264 = vmatmul.mubr.msk.f32.vlgmr.msra.gmra.mrb[4].mxu1 %vm349_vm4, %v11496_v9  ;;  %v443_v35 = vsub.s32 2, %v11523_v34  ;;  %v439_v43 = vsub.s32 1, %v11523_v34  ;;  %v447_v8 = vsub.s32 3, %v11523_v34 }
 0x12a   : > { %6169 = vrot.lane.b32.xlu1 %v11045_v11, %s10818_s18  ;;  %9650 = vmatmul.mubr.msk.f32.vlgmr.msra.gmra.mrb[6].mxu0 %vm349_vm4, %v11121_v38  ;;  %v3689_v13 = vpop.permute.xlu1 %3688  ;;  %v11528_v38 = vsel %vm1134_vm8, %v11116_v36, %v11441_v37  ;;  %v1304_v36 = vsel %vm1301_vm9, %v11142_v44, %v1300_v62  ;;  %v9259_v44 = vld [vmem:[%s13376_s5 + $0x8] sm:$0xff]  ;;  %vm4341_vm9 = vcmask 203776   ;;  %s10826_s18 = smov [#allocation3]  }
 0x12b   : > { %9653 = vmatpush3.msk.msra.mxu0 %vm333_vm0, %v970_v31  ;;  %v3851_v20 = vpop.permute.xlu0 %3850  ;;  %9654 = vmatprep.mubr.msk.f32.mxu0 %vm10803_vm6, %v13389_v0  ;;  %v3696_v21 = vsel %vm3694_vm3, %v3689_v13, %v11454_v52 }
 0x12c   : > { %9657 = vmatprep.subr.mxu0 %v13389_v0  ;;  %9267 = vmatprep.subr.msk.mxu1 %vm333_vm0, %v3696_v21 }
 0x12d   : > { %6332 = vrot.lane.b32.xlu0 %v10931_v1, %s10819_s19  ;;  %3771 = vmatprep.mubr.f32.mxu1 %v13389_v0  ;;  %v11537_v1 = vld [vmem:[%s13375_s4 + $0x90] sm:$0xff] }
 0x12e   : > { %6334 = vrot.lane.b32.xlu1 %v11028_v4, %s10819_s19  ;;  %9655 = vmatmul.mubr.msk.f32.vlgmr.msra.gmra.mrb[8].mxu0 %vm349_vm4, %v11147_v45  ;;  %v3687_v25 = vpop.permute.xlu1 %3686  ;;  %v435_v4 = vsub.s32 0, %v11523_v34 }
 0x12f   : > { %9658 = vmatpush3.msk.msra.mxu0 %vm333_vm0, %v11528_v38  ;;  %v3695_v27 = vsel %vm3694_vm3, %v3687_v25, %v3689_v13  ;;  %v1800_v28 = vpop.permute.xlu0 %1799  ;;  %9659 = vmatprep.mubr.msk.f32.mxu0 %vm10803_vm6, %v13389_v0 }
 0x130   : > { %9268 = vmatpush1.msk.msra.mxu1 %vm333_vm0, %v3695_v27  ;;  %9662 = vmatprep.subr.mxu0 %v13389_v0 }
 0x131   : > { %6336 = vrot.lane.b32.xlu0 %v11045_v11, %s10819_s19  ;;  %9269 = vmatmul.mubr.msk.f32.vlgmr.msra.gmra.mrb[4].mxu1 %vm349_vm4, %v11537_v1  ;;  %v307_v11 = vld [vmem:[%s13372_s1] sm:$0xf] }
 0x132   : > { %6330 = vrot.lane.b32.xlu1 %v10942_v3, %s10819_s19  ;;  %9660 = vmatmul.mubr.msk.f32.vlgmr.msra.gmra.mrb[10].mxu0 %vm349_vm4, %v11173_v53  ;;  %v1467_v45 = vpop.permute.xlu1 %1466  ;;  %v11573_v53 = vrot.slane %v307_v11, %v435_v4  ;;  %v11604_v57 = vrot.slane %v307_v11, %v443_v35  ;;  %v11608_v5 = vrot.slane %v307_v11, %v439_v43 }
 0x133   : > { %9663 = vmatpush3.msk.msra.mxu0 %vm333_vm0, %v1304_v36  ;;  %v11564_v2 = vpop.permute.xlu0 %4021  ;;  %9664 = vmatprep.mubr.msk.f32.mxu0 %vm10803_vm6, %v13389_v0  ;;  %v1471_v37 = vsel %vm1468_vm10, %v11156_v47, %v1467_v45  ;;  %v9314_v47 = vld [vmem:[%s13376_s5 + $0x10] sm:$0xff]  ;;  %v11631_v26 = vrot.slane %v307_v11, %v447_v8  ;;  %vm13412_vm10 = vcmask 244736  }
 0x134   : > { %9667 = vmatprep.subr.mxu0 %v13389_v0  ;;  %3935 = vmatprep.mubr.f32.mxu1 %v13389_v0 }
 0x135   : > { %1961 = vperm.xlu0 %10355, %v1958_v32  }
 0x136   : > { %3490 = vperm.xlu1 %10356, %v9259_v44   ;;  %9665 = vmatmul.mubr.msk.f32.vlgmr.msra.gmra.mrb[12].mxu0 %vm349_vm4, %v11196_v59  ;;  %v11580_v41 = vpop.permute.xlu1 %3854  ;;  %v3859_v59 = vsel %vm3858_vm5, %v3851_v20, %v11499_v10  ;;  %v11647_v20 = vld [vmem:[%s13375_s4 + $0xa8] sm:$0xff] }
 0x137   : > { %9668 = vmatpush3.msk.msra.mxu0 %vm333_vm0, %v1471_v37  ;;  %v2018_v48 = vpop.permute.xlu0 %2017  ;;  %v3860_v51 = vsel %vm3858_vm5, %v11499_v10, %v11580_v41  ;;  %9669 = vmatprep.mubr.msk.f32.mxu0 %vm10803_vm6, %v13389_v0  ;;  %v9369_v10 = vld [vmem:[%s13376_s5 + $0x18] sm:$0xff] }
 0x138   : > { %9273 = vmatprep.subr.msk.mxu1 %vm333_vm0, %v3860_v51  ;;  %9672 = vmatprep.subr.mxu0 %v13389_v0 }
 0x139   : > { %9274 = vmatpush1.msk.msra.mxu1 %vm333_vm0, %v3859_v59  ;;  %1970 = vrot.lane.b32.xlu0 %v11573_v53, %s10790_s26  ;;  %v11769_v59 = vld [vmem:[%s13375_s4 + $0xc8] sm:$0xff] }
 0x13a   : > { %5003 = vperm.xlu1 %10356, %v9314_v47   ;;  %9670 = vmatmul.mubr.msk.f32.vlgmr.msra.gmra.mrb[14].mxu0 %vm349_vm4, %v11221_v7  ;;  %v1634_v62 = vpop.permute.xlu1 %1633 }
 0x13b   : > { %v1637_v17 = vsel %vm349_vm4, %v11182_v56, %v1634_v62  ;;  %v2344_v23 = vpop.permute.xlu0 %2343  ;;  %9674 = vmatprep.mubr.msk.f32.mxu0 %vm10803_vm6, %v13389_v0  ;;  %9275 = vmatmul.mubr.msk.f32.vlgmr.msra.gmra.mrb[4].mxu1 %vm349_vm4, %v11599_v54  ;;  %v1804_v56 = vsel %vm1801_vm11, %v11198_v60, %v1800_v28  ;;  %vm4508_vm11 = vcmask 711680  }
 0x13c   : > { %9673 = vmatpush3.msk.msra.mxu0 %vm333_vm0, %v1637_v17  ;;  %4102 = vmatprep.mubr.f32.mxu1 %v13389_v0 }
 0x13d   : > { %9677 = vmatprep.subr.mxu0 %v13389_v0  ;;  %1974 = vrot.lane.b32.xlu0 %v11604_v57, %s10790_s26 }
 0x13e   : > { %9675 = vmatmul.mubr.msk.f32.vlgmr.msra.gmra.mrb[16].mxu0 %vm349_vm4, %v11242_v14  ;;  %v4020_v7 = vpop.permute.xlu1 %4019  ;;  %1972 = vrot.lane.b32.xlu1 %v11608_v5, %s10790_s26  ;;  %v2022_v14 = vsel %vm2019_vm12, %v11216_v6, %v2018_v48  ;;  %vm13413_vm12 = vcmask 211968  }
 0x13f   : > { %9678 = vmatpush3.msk.msra.mxu0 %vm333_vm0, %v1804_v56  ;;  %v4336_v31 = vpop.permute.xlu0 %4335  ;;  %9679 = vmatprep.mubr.msk.f32.mxu0 %vm10803_vm6, %v13389_v0  ;;  %v4027_v60 = vsel %vm4025_vm7, %v4020_v7, %v11564_v2 }
 0x140   : > { %9682 = vmatprep.subr.mxu0 %v13389_v0  ;;  %9279 = vmatprep.subr.msk.mxu1 %vm333_vm0, %v4027_v60 }
 0x141   : > { %6499 = vperm.xlu0 %10355, %v9369_v10  }
 0x142   : > { %9680 = vmatmul.mubr.msk.f32.vlgmr.msra.gmra.mrb[18].mxu0 %vm349_vm4, %v11267_v22  ;;  %v4018_v13 = vpop.permute.xlu1 %4017  ;;  %1976 = vrot.lane.b32.xlu1 %v11631_v26, %s10790_s26  ;;  %s10820_s26 = smov 55  }
 0x143   : > { %9683 = vmatpush3.msk.msra.mxu0 %vm333_vm0, %v2022_v14  ;;  %v4026_v21 = vsel %vm4025_vm7, %v4018_v13, %v4020_v7  ;;  %v4334_v34 = vpop.permute.xlu0 %4333  ;;  %9684 = vmatprep.mubr.msk.f32.mxu0 %vm10803_vm6, %v13389_v0 }
 0x144   : > { %9280 = vmatpush1.msk.msra.mxu1 %vm333_vm0, %v4026_v21  ;;  %9687 = vmatprep.subr.mxu0 %v13389_v0  ;;  %v4342_v45 = vsel %vm4341_vm9, %v4334_v34, %v4336_v31  ;;  %v11821_v21 = vld [vmem:[%s13375_s4 + $0xe0] sm:$0xff] }
 0x145   : > { %9285 = vmatprep.subr.msk.mxu1 %vm333_vm0, %v11133_v42  ;;  %9281 = vmatmul.mubr.msk.f32.vlgmr.msra.gmra.mrb[4].mxu1 %vm349_vm4, %v11647_v20 }
 0x146   : > { %9685 = vmatmul.mubr.msk.f32.vlgmr.msra.gmra.mrb[20].mxu0 %vm349_vm4, %v11283_v29  ;;  %9286 = vmatpush1.msk.msra.mxu1 %vm333_vm0, %v11150_v46  ;;  %v2180_v6 = vpop.permute.xlu1 %2179  ;;  %v2348_v29 = vsel %vm2345_vm14, %v11253_v19, %v2344_v23  ;;  %vm13414_vm14 = vcmask 883712  }
 0x147   : > { %v2184_v22 = vsel %vm2181_vm13, %v11249_v18, %v2180_v6  ;;  %v4503_v25 = vpop.permute.xlu0 %4502  ;;  %9689 = vmatprep.mubr.msk.f32.mxu0 %vm10803_vm6, %v13389_v0  ;;  %4251 = vmatprep.mubr.f32.mxu1 %v13389_v0  ;;  %v11679_v18 = vld [vmem:[%s13375_s4 + $0xb0] sm:$0xff]  ;;  %vm4675_vm13 = vcmask 687104  }
 0x148   : > { %9688 = vmatpush3.msk.msra.mxu0 %vm333_vm0, %v2184_v22  ;;  %v10719_v22 = vld [vmem:[%s10928_s21] sm:$0xff] }
 0x149   : > { %9692 = vmatprep.subr.mxu0 %v13389_v0 }
 0x14a   : > { %9690 = vmatmul.mubr.msk.f32.vlgmr.msra.gmra.mrb[22].mxu0 %vm349_vm4, %v11307_v39  ;;  %v2511_v27 = vpop.permute.xlu1 %2510 }
 0x14b   : > { %9693 = vmatpush3.msk.msra.mxu0 %vm333_vm0, %v2348_v29  ;;  %v4501_v28 = vpop.permute.xlu0 %4500  ;;  %9694 = vmatprep.mubr.msk.f32.mxu0 %vm10803_vm6, %v13389_v0  ;;  %v2515_v19 = vsel %vm13412_vm10, %v11309_v40, %v2511_v27  ;;  %vm6004_vm10 = vcmask 523264  }
 0x14c   : > { %9697 = vmatprep.subr.mxu0 %v13389_v0  ;;  %v4509_v37 = vsel %vm4508_vm11, %v4501_v28, %v4503_v25 }
 0x14d   : > { %9287 = vmatmul.mubr.msk.f32.vlgmr.msra.gmra.mrb[4].mxu1 %vm349_vm4, %v11679_v18 }
 0x14e   : > { %9695 = vmatmul.mubr.msk.f32.vlgmr.msra.gmra.mrb[24].mxu0 %vm349_vm4, %v11332_v50  ;;  %v11691_v39 = vpop.permute.xlu1 %4337  ;;  %4418 = vmatprep.mubr.f32.mxu1 %v13389_v0  ;;  %v11708_v50 = vld [vmem:[%s13375_s4 + $0xb8] sm:$0xff] }
 0x14f   : > { %9698 = vmatpush3.msk.msra.mxu0 %vm333_vm0, %v2515_v19  ;;  %v3161_v4 = vpop.permute.xlu0 %3160  ;;  %v4343_v36 = vsel %vm4341_vm9, %v4336_v31, %v11691_v39  ;;  %9699 = vmatprep.mubr.msk.f32.mxu0 %vm10803_vm6, %v13389_v0 }
 0x150   : > { %9291 = vmatprep.subr.msk.mxu1 %vm333_vm0, %v4343_v36  ;;  %9702 = vmatprep.subr.mxu0 %v13389_v0 }
 0x151   : > { %9292 = vmatpush1.msk.msra.mxu1 %vm333_vm0, %v4342_v45 }
 0x152   : > { %9700 = vmatmul.mubr.msk.f32.vlgmr.msra.gmra.mrb[26].mxu0 %vm349_vm4, %v11350_v55  ;;  %v2827_v40 = vpop.permute.xlu1 %2826 }
 0x153   : > { %9703 = vmatpush3.msk.msra.mxu0 %vm333_vm0, %v11528_v38  ;;  %v11712_v32 = vpop.permute.xlu0 %4671  ;;  %9704 = vmatprep.mubr.msk.f32.mxu0 %vm10803_vm6, %v13389_v0  ;;  %v2831_v55 = vsel %vm13413_vm12, %v11293_v33, %v2827_v40  ;;  %vm6338_vm12 = vcmask 457728  }
 0x154   : > { %9707 = vmatprep.subr.mxu0 %v13389_v0 }
 0x155   : > { %9293 = vmatmul.mubr.msk.f32.vlgmr.msra.gmra.mrb[4].mxu1 %vm349_vm4, %v11708_v50 }
 0x156   : > { %9705 = vmatmul.mubr.msk.f32.vlgmr.msra.gmra.mrb[28].mxu0 %vm349_vm4, %v11372_v63  ;;  %v11723_v11 = vpop.permute.xlu1 %4504  ;;  %4585 = vmatprep.mubr.f32.mxu1 %v13389_v0  ;;  %v11740_v63 = vld [vmem:[%s13375_s4 + $0xc0] sm:$0xff] }
 0x157   : > { %9708 = vmatpush3.msk.msra.mxu0 %vm333_vm0, %v2831_v55  ;;  %v3328_v44 = vpop.permute.xlu0 %3327  ;;  %v4510_v35 = vsel %vm4508_vm11, %v4503_v25, %v11723_v11  ;;  %9709 = vmatprep.mubr.msk.f32.mxu0 %vm10803_vm6, %v13389_v0 }
 0x158   : > { %9297 = vmatprep.subr.msk.mxu1 %vm333_vm0, %v4510_v35  ;;  %9712 = vmatprep.subr.mxu0 %v13389_v0 }
 0x159   : > { %9298 = vmatpush1.msk.msra.mxu1 %vm333_vm0, %v4509_v37 }
 0x15a   : > { %9710 = vmatmul.mubr.msk.f32.vlgmr.msra.gmra.mrb[30].mxu0 %vm349_vm4, %v11390_v12  ;;  %v2994_v33 = vpop.permute.xlu1 %2993  ;;  %v3165_v12 = vsel %vm13414_vm14, %v11357_v58, %v3161_v4  ;;  %v3332_v58 = vsel %vm3329_vm1, %v11399_v16, %v3328_v44  ;;  %vm5044_vm1 = vcmask 1014784   ;;  %v9333_v44 = vld [vmem:[%s13375_s4 + $0xf0] sm:$0xff]  ;;  %vm7412_vm14 = vcmask 269312  }
 0x15b   : > { %v2998_v43 = vsel %vm2995_vm15, %v11327_v49, %v2994_v33  ;;  %v4837_v48 = vpop.permute.xlu0 %4836  ;;  %9714 = vmatprep.mubr.msk.f32.mxu0 %vm10803_vm6, %v13389_v0  ;;  %vm4842_vm15 = vcmask 662528  }
 0x15c   : > { %9713 = vmatpush3.msk.msra.mxu0 %vm333_vm0, %v2998_v43 }
 0x15d   : > { %9717 = vmatprep.subr.mxu0 %v13389_v0  ;;  %9299 = vmatmul.mubr.msk.f32.vlgmr.msra.gmra.mrb[4].mxu1 %vm349_vm4, %v11740_v63 }
 0x15e   : > { %9715 = vmatmul.mubr.msk.f32.vlgmr.msra.gmra.mrb[32].mxu0 %vm349_vm4, %v11413_v24  ;;  %v4670_v51 = vpop.permute.xlu1 %4669  ;;  %4752 = vmatprep.mubr.f32.mxu1 %v13389_v0 }
 0x15f   : > { %9718 = vmatpush3.msk.msra.mxu0 %vm333_vm0, %v3165_v12  ;;  %v4835_v49 = vpop.permute.xlu0 %4834  ;;  %9719 = vmatprep.mubr.msk.f32.mxu0 %vm10803_vm6, %v13389_v0  ;;  %v4677_v47 = vsel %vm4675_vm13, %v4670_v51, %v11712_v32 }
 0x160   : > { %9722 = vmatprep.subr.mxu0 %v13389_v0  ;;  %9303 = vmatprep.subr.msk.mxu1 %vm333_vm0, %v4677_v47  ;;  %v4843_v23 = vsel %vm4842_vm15, %v4835_v49, %v4837_v48 }
 0x162   : > { %9720 = vmatmul.mubr.msk.f32.vlgmr.msra.gmra.mrb[34].mxu0 %vm349_vm4, %v11431_v30  ;;  %v4668_v24 = vpop.permute.xlu1 %4667 }
 0x163   : > { %9723 = vmatpush3.msk.msra.mxu0 %vm333_vm0, %v3332_v58  ;;  %v4676_v62 = vsel %vm4675_vm13, %v4668_v24, %v4670_v51  ;;  %v5041_v8 = vpop.permute.xlu0 %5040  ;;  %9724 = vmatprep.mubr.msk.f32.mxu0 %vm10803_vm6, %v13389_v0  ;;  %v9345_v58 = vld [vmem:[%s13375_s4 + $0x100] sm:$0xff] }
 0x164   : > { %9304 = vmatpush1.msk.msra.mxu1 %vm333_vm0, %v4676_v62  ;;  %9727 = vmatprep.subr.mxu0 %v13389_v0 }
 0x165   : > { %9305 = vmatmul.mubr.msk.f32.vlgmr.msra.gmra.mrb[4].mxu1 %vm349_vm4, %v11769_v59 }
 0x166   : > { %9725 = vmatmul.mubr.msk.f32.vlgmr.msra.gmra.mrb[36].mxu0 %vm349_vm4, %v11464_v15  ;;  %v3532_v16 = vpop.permute.xlu1 %3531  ;;  %4919 = vmatprep.mubr.f32.mxu1 %v13389_v0 }
 0x167   : > { %v3535_v30 = vsel %vm1996_vm2, %v11474_v61, %v3532_v16  ;;  %v5039_v17 = vpop.permute.xlu0 %5038  ;;  %9729 = vmatprep.mubr.msk.f32.mxu0 %vm10803_vm6, %v13389_v0  ;;  %v11798_v61 = vld [vmem:[%s13375_s4 + $0xd0] sm:$0xff] }
 0x168   : > { %9728 = vmatpush3.msk.msra.mxu0 %vm333_vm0, %v3535_v30  ;;  %v5045_v60 = vsel %vm5044_vm1, %v5039_v17, %v5041_v8  ;;  %v9351_v17 = vld [vmem:[%s13375_s4 + $0x108] sm:$0xff] }
 0x169   : > { %9732 = vmatprep.subr.mxu0 %v13389_v0 }
 0x16a   : > { %v11789_v56 = vpop.permute.xlu1 %4838  ;;  %9730 = vmatmul.mubr.msk.f32.vlgmr.msra.gmra.mrb[38].mxu0 %vm349_vm4, %v11496_v9 }
 0x16b   : > { %v4024_v15 = vpop.permute.xlu0 %4023  ;;  %v4844_v7 = vsel %vm4842_vm15, %v4837_v48, %v11789_v56  ;;  %9734 = vmatprep.mubr.msk.f32.mxu0 %vm10803_vm6, %v13389_v0  ;;  %v10720_v48 = vld [vmem:[%s10928_s21 + $0x8] sm:$0xff] }
 0x16c   : > { %9309 = vmatprep.subr.msk.mxu1 %vm333_vm0, %v4844_v7  ;;  %v4028_v25 = vsel %vm4025_vm7, %v11564_v2, %v4024_v15  ;;  %v11849_v2 = vld [vmem:[%s13375_s4 + $0xd8] sm:$0xff] }
 0x16d   : > { %9310 = vmatpush1.msk.msra.mxu1 %vm333_vm0, %v4843_v23 }
 0x16e   : > { %9311 = vmatmul.mubr.msk.f32.vlgmr.msra.gmra.mrb[4].mxu1 %vm349_vm4, %v11798_v61  ;;  %v3693_v9 = vpop.permute.xlu1 %3692 }
 0x16f   : > { %v3697_v10 = vsel %vm3694_vm3, %v11454_v52, %v3693_v9  ;;  %v5352_v31 = vpop.permute.xlu0 %5351  ;;  %5120 = vmatprep.mubr.f32.mxu1 %v13389_v0  ;;  %vm5355_vm3 = vcmask 982016  }
 0x170   : > { %9733 = vmatpush3.msk.msra.mxu0 %vm333_vm0, %v3697_v10  ;;  %v9357_v10 = vld [vmem:[%s13375_s4 + $0x110] sm:$0xff] }
 0x171   : > { %9735 = vmatmul.mubr.msk.f32.vlgmr.msra.gmra.mrb[40].mxu0 %vm349_vm4, %v11537_v1  ;;  %9737 = vmatprep.subr.mxu0 %v13389_v0 }
 0x172   : > { %v11813_v14 = vpop.permute.xlu1 %5042  ;;  %9739 = vmatprep.mubr.msk.f32.mxu0 %vm10803_vm6, %v13389_v0 }
 0x173   : > { %v5350_v13 = vpop.permute.xlu0 %5349  ;;  %v5046_v52 = vsel %vm5044_vm1, %v5041_v8, %v11813_v14  ;;  %vm8232_vm1 = vcmask 72704  }
 0x174   : > { %9317 = vmatprep.subr.msk.mxu1 %vm333_vm0, %v5046_v52 }
 0x175   : > { %9318 = vmatpush1.msk.msra.mxu1 %vm333_vm0, %v5045_v60 }
 0x176   : > { %9319 = vmatmul.mubr.msk.f32.vlgmr.msra.gmra.mrb[6].mxu1 %vm349_vm4, %v11821_v21  ;;  %v3857_v1 = vpop.permute.xlu1 %3856  ;;  %9322 = vmatprep.subr.msk.mxu1 %vm333_vm0, %v10942_v3 }
 0x177   : > { %v3861_v34 = vsel %vm3858_vm5, %v11580_v41, %v3857_v1  ;;  %v4674_v6 = vpop.permute.xlu0 %4673  ;;  %9323 = vmatpush1.msk.msra.mxu1 %vm333_vm0, %v10719_v22  ;;  %5270 = vmatprep.mubr.f32.mxu1 %v13389_v0  ;;  %vm5521_vm5 = vcmask 261120  }
 0x178   : > { %9738 = vmatpush3.msk.msra.mxu0 %vm333_vm0, %v3861_v34  ;;  %v4678_v40 = vsel %vm4675_vm13, %v11712_v32, %v4674_v6  ;;  %v9363_v34 = vld [vmem:[%s13375_s4 + $0x118] sm:$0xff]  ;;  %vm308_vm13 = vcmask 818560  }
 0x179   : > { %9740 = vmatmul.mubr.msk.f32.vlgmr.msra.gmra.mrb[42].mxu0 %vm349_vm4, %v11599_v54  ;;  %9742 = vmatprep.subr.mxu0 %v13389_v0  ;;  %v5356_v54 = vsel %vm5355_vm3, %v5350_v13, %v5352_v31  ;;  %310 = vst.msk [vmem:[#allocation2 + $0x28] sm:$0xff] %vm308_vm13, %v13389_v0  ;;  %309 = vst.msk [vmem:[#allocation2] sm:$0xff] %vm308_vm13, %v13389_v0 }
 0x17a   : > { %9743 = vmatpush3.msk.msra.mxu0 %vm333_vm0, %v4028_v25  ;;  %v4340_v3 = vpop.permute.xlu1 %4339  ;;  %9744 = vmatprep.mubr.msk.f32.mxu0 %vm10803_vm6, %v13389_v0  ;;  %311 = vst.msk [vmem:[#allocation2 + $0x50] sm:$0xff] %vm308_vm13, %v13389_v0  ;;  %312 = vst.msk [vmem:[#allocation2 + $0x78] sm:$0xff] %vm308_vm13, %v13389_v0 }
 0x17b   : > { %9747 = vmatprep.subr.mxu0 %v13389_v0  ;;  %v11844_v41 = vpop.permute.xlu0 %5517  ;;  %313 = vst.msk [vmem:[#allocation2 + $0xa0] sm:$0xff] %vm308_vm13, %v13389_v0 }
 0x17d   : > { %9745 = vmatmul.mubr.msk.f32.vlgmr.msra.gmra.mrb[44].mxu0 %vm349_vm4, %v11647_v20  ;;  %v4344_v20 = vsel %vm4341_vm9, %v11691_v39, %v4340_v3  ;;  %v11879_v39 = vld [vmem:[%s13375_s4 + $0xe8] sm:$0xff]  ;;  %vm5837_vm9 = vcmask 195584  }
 0x17e   : > { %9748 = vmatpush3.msk.msra.mxu0 %vm333_vm0, %v11528_v38  ;;  %9324 = vmatmul.mubr.msk.f32.vlgmr.msra.gmra.mrb[6].mxu1 %vm349_vm4, %v11849_v2  ;;  %v11857_v29 = vpop.permute.xlu1 %5353 }
 0x17f   : > { %9749 = vmatprep.mubr.msk.f32.mxu0 %vm10803_vm6, %v13389_v0  ;;  %9752 = vmatprep.subr.mxu0 %v13389_v0  ;;  %v4841_v27 = vpop.permute.xlu0 %4840  ;;  %v5357_v28 = vsel %vm5355_vm3, %v5352_v31, %v11857_v29  ;;  %vm8780_vm3 = vcmask 56320  }
 0x180   : > { %9328 = vmatprep.subr.msk.mxu1 %vm333_vm0, %v5357_v28  ;;  %5431 = vmatprep.mubr.f32.mxu1 %v13389_v0  ;;  %v4845_v32 = vsel %vm4842_vm15, %v11789_v56, %v4841_v27  ;;  %v348_v28 = vld [vmem:[%s13374_s3] sm:$0xff]  ;;  %vm6649_vm15 = vcmask 326656  }
 0x181   : > { %9750 = vmatmul.mubr.msk.f32.vlgmr.msra.gmra.mrb[46].mxu0 %vm349_vm4, %v11679_v18  ;;  %9329 = vmatpush1.msk.msra.mxu1 %vm333_vm0, %v5356_v54 }
 0x182   : > { %9753 = vmatpush3.msk.msra.mxu0 %vm333_vm0, %v4344_v20  ;;  %v4507_v19 = vpop.permute.xlu1 %4506  ;;  %9754 = vmatprep.mubr.msk.f32.mxu0 %vm10803_vm6, %v13389_v0 }
 0x183   : > { %v4511_v4 = vsel %vm4508_vm11, %v11723_v11, %v4507_v19  ;;  %9757 = vmatprep.subr.mxu0 %v13389_v0  ;;  %v11881_v36 = vpop.permute.xlu0 %5833  ;;  %vm6171_vm11 = vcmask 490496  }
 0x185   : > { %9755 = vmatmul.mubr.msk.f32.vlgmr.msra.gmra.mrb[48].mxu0 %vm349_vm4, %v11708_v50 }
 0x186   : > { %9758 = vmatpush3.msk.msra.mxu0 %vm333_vm0, %v4511_v4  ;;  %9330 = vmatmul.mubr.msk.f32.vlgmr.msra.gmra.mrb[6].mxu1 %vm349_vm4, %v11879_v39  ;;  %v5516_v18 = vpop.permute.xlu1 %5515 }
 0x187   : > { %9759 = vmatprep.mubr.msk.f32.mxu0 %vm10803_vm6, %v13389_v0  ;;  %9762 = vmatprep.subr.mxu0 %v13389_v0  ;;  %v5523_v45 = vsel %vm5521_vm5, %v5516_v18, %v11844_v41  ;;  %v5520_v50 = vpop.permute.xlu0 %5519 }
 0x188   : > { %9334 = vmatprep.subr.msk.mxu1 %vm333_vm0, %v5523_v45  ;;  %5598 = vmatprep.mubr.f32.mxu1 %v13389_v0  ;;  %v5524_v47 = vsel %vm5521_vm5, %v11844_v41, %v5520_v50 }
 0x189   : > { %9760 = vmatmul.mubr.msk.f32.vlgmr.msra.gmra.mrb[50].mxu0 %vm349_vm4, %v11740_v63 }
 0x18a   : > { %9763 = vmatpush3.msk.msra.mxu0 %vm333_vm0, %v4678_v40  ;;  %v5514_v55 = vpop.permute.xlu1 %5513  ;;  %9764 = vmatprep.mubr.msk.f32.mxu0 %vm10803_vm6, %v13389_v0 }
 0x18b   : > { %v5522_v11 = vsel %vm5521_vm5, %v5514_v55, %v5516_v18  ;;  %9767 = vmatprep.subr.mxu0 %v13389_v0  ;;  %v6001_v33 = vpop.permute.xlu0 %6000 }
 0x18c   : > { %9335 = vmatpush1.msk.msra.mxu1 %vm333_vm0, %v5522_v11 }
 0x18d   : > { %9765 = vmatmul.mubr.msk.f32.vlgmr.msra.gmra.mrb[52].mxu0 %vm349_vm4, %v11769_v59  ;;  %9340 = vmatprep.subr.msk.mxu1 %vm333_vm0, %v11133_v42 }
 0x18e   : > { %9768 = vmatpush3.msk.msra.mxu0 %vm333_vm0, %v4845_v32  ;;  %9336 = vmatmul.mubr.msk.f32.vlgmr.msra.gmra.mrb[6].mxu1 %vm349_vm4, %v9333_v44  ;;  %v5832_v35 = vpop.permute.xlu1 %5831 }
 0x18f   : > { %9341 = vmatpush1.msk.msra.mxu1 %vm333_vm0, %v11150_v46  ;;  %9769 = vmatprep.mubr.msk.f32.mxu0 %vm10803_vm6, %v13389_v0  ;;  %v5839_v37 = vsel %vm5837_vm9, %v5832_v35, %v11881_v36  ;;  %v9339_v46 = vld [vmem:[%s13375_s4 + $0xf8] sm:$0xff]  ;;  %v5836_v43 = vpop.permute.xlu0 %5835 }
 0x190   : > { %9772 = vmatprep.subr.mxu0 %v13389_v0  ;;  %5747 = vmatprep.mubr.f32.mxu1 %v13389_v0  ;;  %v5840_v30 = vsel %vm5837_vm9, %v11881_v36, %v5836_v43 }
 0x191   : > { %9770 = vmatmul.mubr.msk.f32.vlgmr.msra.gmra.mrb[54].mxu0 %vm349_vm4, %v11798_v61  ;;  %9346 = vmatprep.subr.msk.mxu1 %vm333_vm0, %v5839_v37 }
 0x192   : > { %9773 = vmatpush3.msk.msra.mxu0 %vm333_vm0, %v11813_v14  ;;  %9774 = vmatprep.mubr.msk.f32.mxu0 %vm10803_vm6, %v13389_v0  ;;  %v5830_v42 = vpop.permute.xlu1 %5829 }
 0x193   : > { %9777 = vmatprep.subr.mxu0 %v13389_v0  ;;  %v5838_v63 = vsel %vm5837_vm9, %v5830_v42, %v5832_v35 }
 0x195   : > { %9775 = vmatmul.mubr.msk.f32.vlgmr.msra.gmra.mrb[56].mxu0 %vm349_vm4, %v11821_v21 }
 0x196   : > { %9342 = vmatmul.mubr.msk.f32.vlgmr.msra.gmra.mrb[6].mxu1 %vm349_vm4, %v9339_v46  ;;  %9778 = vmatpush3.msk.msra.mxu0 %vm333_vm0, %v10720_v48  ;;  %v5999_v12 = vpop.permute.xlu1 %5998 }
 0x197   : > { %9779 = vmatprep.mubr.msk.f32.mxu0 %vm10803_vm6, %v13389_v0  ;;  %9782 = vmatprep.subr.mxu0 %v13389_v0  ;;  %v6006_v51 = vsel %vm6004_vm10, %v5999_v12, %v6001_v33  ;;  %v6166_v24 = vpop.permute.xlu0 %6165 }
 0x198   : > { %9347 = vmatpush1.msk.msra.mxu1 %vm333_vm0, %v5838_v63  ;;  %5914 = vmatprep.mubr.f32.mxu1 %v13389_v0 }
 0x199   : > { %9780 = vmatmul.mubr.msk.f32.vlgmr.msra.gmra.mrb[58].mxu0 %vm349_vm4, %v11849_v2  ;;  %9352 = vmatprep.subr.msk.mxu1 %vm333_vm0, %v6006_v51 }
 0x19a   : > { %9783 = vmatpush3.msk.msra.mxu0 %vm333_vm0, %v11857_v29  ;;  %9784 = vmatprep.mubr.msk.f32.mxu0 %vm10803_vm6, %v13389_v0  ;;  %v5997_v49 = vpop.permute.xlu1 %5996 }
 0x19b   : > { %9787 = vmatprep.subr.mxu0 %v13389_v0  ;;  %v6005_v59 = vsel %vm6004_vm10, %v5997_v49, %v5999_v12  ;;  %v6164_v8 = vpop.permute.xlu0 %6163 }
 0x19d   : > { %9785 = vmatmul.mubr.msk.f32.vlgmr.msra.gmra.mrb[60].mxu0 %vm349_vm4, %v11879_v39 }
 0x19e   : > { %9348 = vmatmul.mubr.msk.f32.vlgmr.msra.gmra.mrb[6].mxu1 %vm349_vm4, %v9345_v58  ;;  %9788 = vmatpush3.msk.msra.mxu0 %vm333_vm0, %v5524_v47  ;;  %v6003_v62 = vpop.permute.xlu1 %6002 }
 0x19f   : > { %9789 = vmatprep.mubr.msk.f32.mxu0 %vm10803_vm6, %v13389_v0  ;;  %9792 = vmatprep.subr.mxu0 %v13389_v0  ;;  %v6007_v15 = vsel %vm6004_vm10, %v6001_v33, %v6003_v62  ;;  %v6333_v7 = vpop.permute.xlu0 %6332 }
 0x1a0   : > { %9353 = vmatpush1.msk.msra.mxu1 %vm333_vm0, %v6005_v59  ;;  %6081 = vmatprep.mubr.f32.mxu1 %v13389_v0 }
 0x1a1   : > { %9790 = vmatmul.mubr.msk.f32.vlgmr.msra.gmra.mrb[62].mxu0 %vm349_vm4, %v9333_v44 }
 0x1a2   : > { %9793 = vmatpush3.msk.msra.mxu0 %vm333_vm0, %v11528_v38  ;;  %9794 = vmatprep.mubr.msk.f32.mxu0 %vm10803_vm6, %v13389_v0  ;;  %v6168_v16 = vpop.permute.xlu1 %6167  ;;  %v6172_v38 = vsel %vm6171_vm11, %v6164_v8, %v6166_v24 }
 0x1a3   : > { %9797 = vmatprep.subr.mxu0 %v13389_v0  ;;  %v6173_v23 = vsel %vm6171_vm11, %v6166_v24, %v6168_v16  ;;  %v6337_v60 = vpop.permute.xlu0 %6336 }
 0x1a4   : > { %9358 = vmatprep.subr.msk.mxu1 %vm333_vm0, %v6173_v23 }
 0x1a5   : > { %9795 = vmatmul.mubr.msk.f32.vlgmr.msra.gmra.mrb[64].mxu0 %vm349_vm4, %v9339_v46 }
 0x1a6   : > { %9354 = vmatmul.mubr.msk.f32.vlgmr.msra.gmra.mrb[6].mxu1 %vm349_vm4, %v9351_v17  ;;  %9798 = vmatpush3.msk.msra.mxu0 %vm333_vm0, %v5840_v30  ;;  %v6170_v56 = vpop.permute.xlu1 %6169 }
 0x1a7   : > { %9799 = vmatprep.mubr.msk.f32.mxu0 %vm10803_vm6, %v13389_v0  ;;  %9802 = vmatprep.subr.mxu0 %v13389_v0  ;;  %v6174_v9 = vsel %vm6171_vm11, %v6168_v16, %v6170_v56 }
 0x1a8   : > { %9359 = vmatpush1.msk.msra.mxu1 %vm333_vm0, %v6172_v38  ;;  %6248 = vmatprep.mubr.f32.mxu1 %v13389_v0 }
 0x1a9   : > { %9800 = vmatmul.mubr.msk.f32.vlgmr.msra.gmra.mrb[66].mxu0 %vm349_vm4, %v9345_v58 }
 0x1aa   : > { %9803 = vmatpush3.msk.msra.mxu0 %vm333_vm0, %v6007_v15  ;;  %9804 = vmatprep.mubr.msk.f32.mxu0 %vm10803_vm6, %v13389_v0  ;;  %v6335_v61 = vpop.permute.xlu1 %6334 }
 0x1ab   : > { %9807 = vmatprep.subr.mxu0 %v13389_v0  ;;  %v6340_v31 = vsel %vm6338_vm12, %v6333_v7, %v6335_v61  ;;  %v6341_v52 = vsel %vm6338_vm12, %v6335_v61, %v6337_v60 }
 0x1ac   : > { %9364 = vmatprep.subr.msk.mxu1 %vm333_vm0, %v6340_v31 }
 0x1ad   : > { %9805 = vmatmul.mubr.msk.f32.vlgmr.msra.gmra.mrb[68].mxu0 %vm349_vm4, %v9351_v17 }
 0x1ae   : > { %9360 = vmatmul.mubr.msk.f32.vlgmr.msra.gmra.mrb[6].mxu1 %vm349_vm4, %v9357_v10  ;;  %9808 = vmatpush3.msk.msra.mxu0 %vm333_vm0, %v6174_v9  ;;  %v6331_v14 = vpop.permute.xlu1 %6330  ;;  %v1880_v13 = vpop.f32.mrb[0].mxu1 }
 0x1af   : > { %9809 = vmatprep.mubr.msk.f32.mxu0 %vm10803_vm6, %v13389_v0  ;;  %v6339_v21 = vsel %vm6338_vm12, %v6331_v14, %v6333_v7  ;;  %9812 = vmatprep.subr.mxu0 %v13389_v0  ;;  %v1882_v1 = vpop.f32.mrb[1].mxu1 }
 0x1b0   : > { %9365 = vmatpush1.msk.msra.mxu1 %vm333_vm0, %v6339_v21  ;;  %6415 = vmatprep.mubr.f32.mxu1 %v13389_v0 }
 0x1b1   : > { %9810 = vmatmul.mubr.msk.f32.vlgmr.msra.gmra.mrb[70].mxu0 %vm349_vm4, %v9357_v10 }
 0x1b2   : > { %9813 = vmatpush3.msk.msra.mxu0 %vm333_vm0, %v6341_v52  ;;  %9814 = vmatprep.mubr.msk.f32.mxu0 %vm10803_vm6, %v13389_v0  ;;  %vm314_vm0 = vcmask 1048288   ;;  %vm461_vm6 = vcmask 752640  }
 0x1b3   : > { %315 = vst.msk [vmem:[#allocation2 + $0x18] sm:$0xff] %vm314_vm0, %v13389_v0  ;;  %318 = vst.msk [vmem:[#allocation2 + $0x40] sm:$0xff] %vm314_vm0, %v13389_v0 }
 0x1b4   : > { %v1962_v22 = vpop.permute.xlu0 %1961  ;;  %320 = vst.msk [vmem:[#allocation2 + $0x68] sm:$0xff] %vm314_vm0, %v13389_v0  ;;  %322 = vst.msk [vmem:[#allocation2 + $0x90] sm:$0xff] %vm314_vm0, %v13389_v0 }
 0x1b5   : > { %9815 = vmatmul.mubr.msk.f32.vlgmr.msra.gmra.mrb[72].mxu0 %vm349_vm4, %v9363_v34  ;;  %v12027_v6 = vpop.permute.xlu1 %3490  ;;  %v1964_v25 = vadd.f32 %v1962_v22, %v1880_v13  ;;  %v1965_v20 = vadd.f32 %v1962_v22, %v1882_v1  ;;  %324 = vst.msk [vmem:[#allocation2 + $0xb8] sm:$0xff] %vm314_vm0, %v13389_v0 }
 0x1b6   : > { %9366 = vmatmul.mubr.msk.f32.vlgmr.msra.gmra.mrb[6].mxu1 %vm349_vm4, %v9363_v34  ;;  %6726 = vmatprep.mubr.f32.mxu0 %v13389_v0  ;;  %vm457_vm4 = vcmask 1048352  }
 0x1b7   : > { %6983 = vmatprep.mubr.f32.mxu1 %v13389_v0  ;;  %v1967_v41 = vmax.f32 %v1964_v25, 0.0  ;;  %v1968_v18 = vmax.f32 %v1965_v20, 0.0 }
 0x1b8   : > { %v1971_v2 = vpop.permute.xlu0 %1970 }
 0x1b9   : > { %v12032_v3 = vpop.permute.xlu1 %5003 }
 0x1bc   : > { %v1975_v4 = vpop.permute.xlu0 %1974 }
 0x1bd   : > { %v1973_v54 = vpop.permute.xlu1 %1972 }
 0x1be   : > { %v12035_v29 = vsel %vm1134_vm8, %v1971_v2, %v1973_v54  ;;  %v12043_v40 = vsel %vm1134_vm8, %v1973_v54, %v1975_v4 }
 0x1bf   : > { %v1984_v27 = vmul.f32 %v12035_v29, %v1967_v41  ;;  %v1985_v32 = vmul.f32 %v12043_v40, %v1968_v18 }
 0x1c1   : > { %1990 = vrot.lane.b32.xlu0 %v1984_v27, %s10804_s22  ;;  %v1977_v7 = vpop.permute.xlu1 %1976 }
 0x1c2   : > { %v12056_v31 = vsel %vm1134_vm8, %v1975_v4, %v1977_v7  ;;  %vm6876_vm8 = vcmask 465920  }
 0x1f1   : > { %v422_v19 = vpop.f32.mrb[0].mxu0 }
 0x1f2   : > { %v423_v39 = vadd.f32 %v422_v19, %v348_v28  ;;  %v9636_v36 = vpop.f32.mrb[1].mxu0 }
 0x1f4   : > { %v426_v45 = vmax.f32 %v423_v39, 0.0 }
 0x1f5   : > { %v624_v50 = vpop.f32.mrb[2].mxu0  ;;  %v12045_v55 = vpop.f32.mrb[2].mxu1 }
 0x1f6   : > { %429 = vperm.xlu1 %10356, %v426_v45   ;;  %v9641_v11 = vpop.f32.mrb[3].mxu0  ;;  %v3410_v44 = vpop.f32.mrb[3].mxu1 }
 0x1f7   : > { %v3494_v61 = vadd.f32 %v12027_v6, %v3410_v44  ;;  %v12062_v45 = vpop.permute.xlu0 %6499 }
 0x1f9   : > { %v786_v35 = vpop.f32.mrb[4].mxu0  ;;  %v3497_v13 = vmax.f32 %v3494_v61, 0.0 }
 0x1fa   : > { %v787_v37 = vadd.f32 %v786_v35, %v624_v50  ;;  %v9646_v33 = vpop.f32.mrb[5].mxu0  ;;  %1992 = vrot.lane.b32.xlu1 %v1985_v32, %s10804_s22 }
 0x1fb   : > { %v3500_v25 = vmul.f32 %v3497_v13, %v12043_v40 }
 0x1fd   : > { %v950_v42 = vpop.f32.mrb[6].mxu0 }
 0x1fe   : > { %v956_v46 = vadd.f32 %v950_v42, %v787_v37  ;;  %v9651_v63 = vpop.f32.mrb[7].mxu0 }
 0x201   : > { %v1117_v43 = vpop.f32.mrb[8].mxu0 }
 0x202   : > { %v1123_v48 = vadd.f32 %v1117_v43, %v956_v46  ;;  %v9656_v12 = vpop.f32.mrb[9].mxu0  ;;  %v3493_v43 = vadd.f32 %v12027_v6, %v12045_v55 }
 0x205   : > { %v1284_v51 = vpop.f32.mrb[10].mxu0 }
 0x206   : > { %v1290_v49 = vadd.f32 %v1284_v51, %v1123_v48  ;;  %v9661_v47 = vpop.f32.mrb[11].mxu0 }
 0x207   : > { %v3496_v47 = vmax.f32 %v3493_v43, 0.0 }
 0x209   : > { %v1451_v58 = vpop.f32.mrb[12].mxu0 }
 0x20a   : > { %v1457_v24 = vadd.f32 %v1451_v58, %v1290_v49  ;;  %v9666_v59 = vpop.f32.mrb[13].mxu0 }
 0x20d   : > { %v1618_v62 = vpop.f32.mrb[14].mxu0 }
 0x20e   : > { %v1624_v8 = vadd.f32 %v1618_v62, %v1457_v24  ;;  %v9671_v16 = vpop.f32.mrb[15].mxu0  ;;  %v3499_v62 = vmul.f32 %v3496_v47, %v12035_v29 }
 0x211   : > { %v1784_v30 = vpop.f32.mrb[16].mxu0 }
 0x212   : > { %v1790_v17 = vadd.f32 %v1784_v30, %v1624_v8  ;;  %v9676_v23 = vpop.f32.mrb[17].mxu0 }
 0x215   : > { %v1951_v38 = vpop.f32.mrb[18].mxu0 }
 0x216   : > { %v1957_v56 = vadd.f32 %v1951_v38, %v1790_v17  ;;  %v9681_v15 = vpop.f32.mrb[19].mxu0 }
 0x218   : > { %v1966_v9 = vadd.f32 %v1962_v22, %v1957_v56 }
 0x219   : > { %v2169_v10 = vpop.f32.mrb[20].mxu0 }
 0x21a   : > { %v1969_v60 = vmax.f32 %v1966_v9, 0.0  ;;  %v9686_v14 = vpop.f32.mrb[21].mxu0 }
 0x21c   : > { %v1986_v52 = vmul.f32 %v12056_v31, %v1969_v60 }
 0x21d   : > { %v2331_v21 = vpop.f32.mrb[22].mxu0 }
 0x21e   : > { %v2332_v1 = vadd.f32 %v2331_v21, %v2169_v10  ;;  %v9691_v34 = vpop.f32.mrb[23].mxu0  ;;  %1994 = vrot.lane.b32.xlu0 %v1986_v52, %s10804_s22 }
 0x221   : > { %v2495_v41 = vpop.f32.mrb[24].mxu0 }
 0x222   : > { %v2501_v2 = vadd.f32 %v2495_v41, %v2332_v1  ;;  %v9696_v54 = vpop.f32.mrb[25].mxu0  ;;  %3507 = vrot.lane.b32.xlu0 %v3500_v25, %s10804_s22 }
 0x225   : > { %v2662_v22 = vpop.f32.mrb[26].mxu0 }
 0x226   : > { %v2668_v27 = vadd.f32 %v2662_v22, %v2501_v2  ;;  %v9701_v28 = vpop.f32.mrb[27].mxu0 }
 0x229   : > { %v2811_v20 = vpop.f32.mrb[28].mxu0 }
 0x22a   : > { %v2817_v19 = vadd.f32 %v2811_v20, %v2668_v27  ;;  %v9706_v4 = vpop.f32.mrb[29].mxu0 }
 0x22d   : > { %v2978_v39 = vpop.f32.mrb[30].mxu0 }
 0x22e   : > { %v2984_v36 = vadd.f32 %v2978_v39, %v2817_v19  ;;  %v9711_v18 = vpop.f32.mrb[31].mxu0 }
 0x231   : > { %v3145_v50 = vpop.f32.mrb[32].mxu0 }
 0x232   : > { %v3151_v11 = vadd.f32 %v3145_v50, %v2984_v36  ;;  %v9716_v44 = vpop.f32.mrb[33].mxu0 }
 0x233   : > { %v12064_v32 = vpop.permute.xlu0 %1990 }
 0x234   : > { %2003 = vst.msk [vmem:[#allocation2 + $0x28] sm:$0xff] %vm457_vm4, %v12064_v32 }
 0x235   : > { %v3312_v35 = vpop.f32.mrb[34].mxu0 }
 0x236   : > { %v3318_v37 = vadd.f32 %v3312_v35, %v3151_v11  ;;  %v9721_v33 = vpop.f32.mrb[35].mxu0 }
 0x239   : > { %v3479_v42 = vpop.f32.mrb[36].mxu0 }
 0x23a   : > { %v3485_v46 = vadd.f32 %v3479_v42, %v3318_v37  ;;  %v9726_v63 = vpop.f32.mrb[37].mxu0 }
 0x23c   : > { %v3495_v48 = vadd.f32 %v12027_v6, %v3485_v46 }
 0x23d   : > { %v3682_v12 = vpop.f32.mrb[38].mxu0 }
 0x23e   : > { %v3498_v51 = vmax.f32 %v3495_v48, 0.0  ;;  %v9731_v49 = vpop.f32.mrb[39].mxu0 }
 0x240   : > { %v3501_v58 = vmul.f32 %v3498_v51, %v12056_v31 }
 0x241   : > { %v12072_v24 = vpop.f32.mrb[4].mxu1 }
 0x242   : > { %v12074_v59 = vpop.f32.mrb[5].mxu1  ;;  %3509 = vrot.lane.b32.xlu1 %v3501_v58, %s10804_s22  ;;  %v6538_v58 = vld [vmem:[#allocation2 + $0x28] sm:$0xff] }
 0x244   : > { %v3844_v8 = vpop.f32.mrb[40].mxu0 }
 0x245   : > { %v3845_v16 = vadd.f32 %v3844_v8, %v3682_v12  ;;  %v9736_v30 = vpop.f32.mrb[41].mxu0 }
 0x246   : > { %3505 = vrot.lane.b32.xlu1 %v3499_v62, %s10804_s22 }
 0x24c   : > { %v4008_v6 = vpop.f32.mrb[42].mxu0 }
 0x24d   : > { %v4014_v55 = vadd.f32 %v4008_v6, %v3845_v16  ;;  %v9741_v17 = vpop.f32.mrb[43].mxu0 }
 0x250   : > { %v4175_v23 = vpop.f32.mrb[44].mxu0 }
 0x251   : > { %v4181_v38 = vadd.f32 %v4175_v23, %v4014_v55  ;;  %v9746_v56 = vpop.f32.mrb[45].mxu0 }
 0x254   : > { %v4324_v15 = vpop.f32.mrb[46].mxu0 }
 0x255   : > { %v4330_v7 = vadd.f32 %v4324_v15, %v4181_v38  ;;  %v9751_v61 = vpop.f32.mrb[47].mxu0 }
 0x258   : > { %v4491_v9 = vpop.f32.mrb[48].mxu0 }
 0x259   : > { %v4497_v10 = vadd.f32 %v4491_v9, %v4330_v7  ;;  %v9756_v60 = vpop.f32.mrb[49].mxu0 }
 0x25c   : > { %v4658_v14 = vpop.f32.mrb[50].mxu0 }
 0x25d   : > { %v4664_v13 = vadd.f32 %v4658_v14, %v4497_v10  ;;  %v9761_v52 = vpop.f32.mrb[51].mxu0 }
 0x260   : > { %v4825_v21 = vpop.f32.mrb[52].mxu0 }
 0x261   : > { %v4831_v1 = vadd.f32 %v4825_v21, %v4664_v13  ;;  %v9766_v34 = vpop.f32.mrb[53].mxu0 }
 0x262   : > { %v5007_v34 = vadd.f32 %v12032_v3, %v12074_v59 }
 0x264   : > { %v4992_v25 = vpop.f32.mrb[54].mxu0 }
 0x265   : > { %v4998_v41 = vadd.f32 %v4992_v25, %v4831_v1  ;;  %v9771_v2 = vpop.f32.mrb[55].mxu0 }
 0x266   : > { %v5006_v2 = vadd.f32 %v12032_v3, %v12072_v24 }
 0x267   : > { %v5008_v54 = vadd.f32 %v12032_v3, %v4998_v41  ;;  %v5010_v41 = vmax.f32 %v5007_v34, 0.0 }
 0x268   : > { %v5193_v22 = vpop.f32.mrb[56].mxu0 }
 0x269   : > { %v5011_v27 = vmax.f32 %v5008_v54, 0.0  ;;  %v9776_v28 = vpop.f32.mrb[57].mxu0  ;;  %v5013_v59 = vmul.f32 %v5010_v41, %v12043_v40  ;;  %v5009_v54 = vmax.f32 %v5006_v2, 0.0 }
 0x26b   : > { %v5014_v20 = vmul.f32 %v5011_v27, %v12056_v31 }
 0x26c   : > { %v5343_v19 = vpop.f32.mrb[58].mxu0 }
 0x26d   : > { %5022 = vrot.lane.b32.xlu0 %v5014_v20, %s10804_s22  ;;  %v5344_v4 = vadd.f32 %v5343_v19, %v5193_v22  ;;  %v9781_v39 = vpop.f32.mrb[59].mxu0  ;;  %v5012_v22 = vmul.f32 %v5009_v54, %v12035_v29 }
 0x270   : > { %v5504_v36 = vpop.f32.mrb[60].mxu0 }
 0x271   : > { %v5510_v18 = vadd.f32 %v5504_v36, %v5344_v4  ;;  %v9786_v50 = vpop.f32.mrb[61].mxu0 }
 0x274   : > { %v5671_v11 = vpop.f32.mrb[62].mxu0 }
 0x275   : > { %v430_v44 = vpop.permute.xlu1 %429  ;;  %v5677_v35 = vadd.f32 %v5671_v11, %v5510_v18  ;;  %v9791_v37 = vpop.f32.mrb[63].mxu0 }
 0x276   : > { %v453_v33 = vmul.f32 %v11573_v53, %v430_v44  ;;  %v12084_v42 = vmul.f32 %v11608_v5, %v430_v44  ;;  %v12087_v46 = vmul.f32 %v11604_v57, %v430_v44  ;;  %v456_v63 = vmul.f32 %v11631_v26, %v430_v44 }
 0x278   : > { %458 = vst.msk [vmem:[#allocation2] sm:$0xff] %vm457_vm4, %v453_v33  ;;  %v5820_v43 = vpop.f32.mrb[64].mxu0  ;;  %v12093_v48 = vpack.i.bf16 %v12087_v46, %v12084_v42 }
 0x279   : > { %462 = vst.msk [vmem:[#allocation2 + $0x18] sm:$0xff] %vm461_vm6, %v456_v63  ;;  %v1993_v12 = vpop.permute.xlu1 %1992  ;;  %v5826_v51 = vadd.f32 %v5820_v43, %v5677_v35  ;;  %v9796_v53 = vpop.f32.mrb[65].mxu0 }
 0x27a   : > { %v12098_v5 = vsel %vm1996_vm2, %v12064_v32, %v1993_v12  ;;  %10368 = vrot.lane.b32.xlu1 %v12093_v48, %s10820_s26  ;;  %10358 = vrot.lane.b32.xlu0 %v12093_v48, %s10821_s25 }
 0x27c   : > { %v5987_v26 = vpop.f32.mrb[66].mxu0 }
 0x27d   : > { %v5993_v49 = vadd.f32 %v5987_v26, %v5826_v51  ;;  %v9801_v47 = vpop.f32.mrb[67].mxu0 }
 0x27e   : > { %10373 = vrot.lane.b32.xlu1 %v12093_v48, %s10822_s12  ;;  %10363 = vrot.lane.b32.xlu0 %v12093_v48, %s10819_s19 }
 0x27f   : > { %v6534_v32 = vld [vmem:[#allocation2] sm:$0xff] }
 0x280   : > { %v12110_v62 = vld [vmem:[#allocation2 + $0x18] sm:$0xff]  ;;  %v6154_v8 = vpop.f32.mrb[68].mxu0  ;;  %v12112_v16 = vpack.i.bf16 %v6538_v58, %v6534_v32 }
 0x281   : > { %v6160_v30 = vadd.f32 %v6154_v8, %v5993_v49  ;;  %v9806_v6 = vpop.f32.mrb[69].mxu0 }
 0x282   : > { %10378 = vrot.lane.b32.xlu0 %v12112_v16, %s10821_s25 }
 0x284   : > { %v6321_v17 = vpop.f32.mrb[70].mxu0 }
 0x285   : > { %v6327_v23 = vadd.f32 %v6321_v17, %v6160_v30  ;;  %v9811_v38 = vpop.f32.mrb[71].mxu0 }
 0x286   : > { %10383 = vrot.lane.b32.xlu0 %v12112_v16, %s10819_s19 }
 0x288   : > { %v6488_v56 = vpop.f32.mrb[72].mxu0 }
 0x289   : > { %v6494_v15 = vadd.f32 %v6488_v56, %v6327_v23  ;;  %v6417_v7 = vpop.f32.mrb[6].mxu1  ;;  %v9816_v61 = vpop.f32.mrb[73].mxu0 }
 0x28a   : > { %v6419_v9 = vpop.f32.mrb[7].mxu1  ;;  %v6502_v50 = vadd.f32 %v12062_v45, %v6417_v7 }
 0x28b   : > { %v6504_v10 = vadd.f32 %v12062_v45, %v6494_v15  ;;  %v6503_v3 = vadd.f32 %v12062_v45, %v6419_v9 }
 0x28c   : > { %v6505_v11 = vmax.f32 %v6502_v50, 0.0 }
 0x28d   : > { %v6507_v60 = vmax.f32 %v6504_v10, 0.0  ;;  %v6506_v24 = vmax.f32 %v6503_v3, 0.0 }
 0x28e   : > { %v6508_v44 = vmul.f32 %v6505_v11, %v12035_v29 }
 0x28f   : > { %v6510_v14 = vmul.f32 %v6507_v60, %v12056_v31  ;;  %v6509_v20 = vmul.f32 %v6506_v24, %v12043_v40 }
 0x290   : > { %v1995_v13 = vpop.permute.xlu0 %1994 }
 0x291   : > { %v12123_v52 = vsel %vm1996_vm2, %v1993_v12, %v1995_v13  ;;  %2006 = vst.msk [vmem:[#allocation2 + $0x40] sm:$0xff] %vm461_vm6, %v1995_v13  ;;  %6518 = vrot.lane.b32.xlu1 %v6510_v14, %s10804_s22 }
 0x292   : > { %v12145_v25 = vpack.i.bf16 %v12123_v52, %v12098_v5 }
 0x294   : > { %v3508_v27 = vpop.permute.xlu0 %3507 }
 0x295   : > { %10388 = vrot.lane.b32.xlu1 %v12112_v16, %s10820_s26 }
 0x298   : > { %v12129_v21 = vld [vmem:[#allocation2 + $0x40] sm:$0xff] }
 0x299   : > { %10393 = vrot.lane.b32.xlu1 %v12112_v16, %s10822_s12  ;;  %v12135_v1 = vpack.i.bf16 %v12129_v21, %v12110_v62 }
 0x29b   : > { %10398 = vrot.lane.b32.xlu0 %v12135_v1, %s10819_s19 }
 0x29d   : > { %10408 = vrot.lane.b32.xlu1 %v12145_v25, %s10821_s25 }
 0x29f   : > { %10403 = vrot.lane.b32.xlu0 %v12135_v1, %s10821_s25 }
 0x2a1   : > { %10413 = vrot.lane.b32.xlu1 %v12145_v25, %s10819_s19 }
 0x2a3   : > { %10418 = vrot.lane.b32.xlu0 %v12145_v25, %s10820_s26 }
 0x2a5   : > { %5020 = vrot.lane.b32.xlu1 %v5013_v59, %s10804_s22 }
 0x2a7   : > { %10423 = vrot.lane.b32.xlu0 %v12145_v25, %s10822_s12 }
 0x2ab   : > { %5018 = vrot.lane.b32.xlu0 %v5012_v22, %s10804_s22 }
 0x2af   : > { %10453 = vrot.lane.b32.xlu0 %v12093_v48, %s10815_s20 }
 0x2b3   : > { %10463 = vrot.lane.b32.xlu0 %v12112_v16, %s10815_s20 }
 0x2b4   : > { %v3510_v28 = vpop.permute.xlu1 %3509 }
 0x2b5   : > { %v12170_v19 = vsel %vm1996_vm2, %v3508_v27, %v3510_v28  ;;  %3520 = vst.msk [vmem:[#allocation2 + $0x68] sm:$0xff] %vm461_vm6, %v3510_v28 }
 0x2b7   : > { %6516 = vrot.lane.b32.xlu0 %v6509_v20, %s10804_s22 }
 0x2b8   : > { %v3506_v4 = vpop.permute.xlu1 %3505 }
 0x2b9   : > { %v12175_v39 = vsel %vm1996_vm2, %v3506_v4, %v3508_v27  ;;  %3517 = vst.msk [vmem:[#allocation2 + $0x50] sm:$0xff] %vm457_vm4, %v3506_v4 }
 0x2ba   : > { %v12180_v36 = vpack.i.bf16 %v12170_v19, %v12175_v39 }
 0x2bb   : > { %10468 = vrot.lane.b32.xlu0 %v12135_v1, %s10822_s12 }
 0x2bc   : > { %10428 = vrot.lane.b32.xlu1 %v12180_v36, %s10821_s25  ;;  %v12186_v40 = vld [vmem:[#allocation2 + $0x68] sm:$0xff] }
 0x2bf   : > { %10483 = vrot.lane.b32.xlu0 %v12093_v48, %s10808_s13 }
 0x2c0   : > { %10433 = vrot.lane.b32.xlu1 %v12180_v36, %s10819_s19 }
 0x2c3   : > { %10493 = vrot.lane.b32.xlu0 %v12112_v16, %s10808_s13 }
 0x2c4   : > { %10438 = vrot.lane.b32.xlu1 %v12180_v36, %s10820_s26 }
 0x2c8   : > { %10443 = vrot.lane.b32.xlu1 %v12180_v36, %s10822_s12 }
 0x2cc   : > { %6514 = vrot.lane.b32.xlu1 %v6508_v44, %s10804_s22  ;;  %s10823_s22 = smov 9  }
 0x2d0   : > { %10448 = vrot.lane.b32.xlu1 %v12135_v1, %s10820_s26 }
 0x2d4   : > { %10458 = vrot.lane.b32.xlu1 %v12145_v25, %s10815_s20 }
 0x2d8   : > { %10473 = vrot.lane.b32.xlu1 %v12180_v36, %s10815_s20 }
 0x2dc   : > { %10478 = vrot.lane.b32.xlu1 %v12135_v1, %s10815_s20 }
 0x2df   : > { %v12211_v45 = vpop.permute.xlu0 %5022 }
 0x2e0   : > { %5033 = vst.msk [vmem:[#allocation2 + $0x90] sm:$0xff] %vm461_vm6, %v12211_v45  ;;  %10488 = vrot.lane.b32.xlu1 %v12145_v25, %s10808_s13 }
 0x2e7   : > { %v12217_v29 = vld [vmem:[#allocation2 + $0x90] sm:$0xff] }
 0x2e8   : > { %v12221_v35 = vpack.i.bf16 %v12217_v29, %v12186_v40 }
 0x2ea   : > { %10503 = vrot.lane.b32.xlu0 %v12221_v35, %s10821_s25  ;;  %10498 = vrot.lane.b32.xlu1 %v12221_v35, %s10819_s19 }
 0x2ec   : > { %v10359_v37 = vpop.permute.xlu0 %10358  ;;  %v12233_v33 = vpop.permute.xlu1 %10368 }
 0x2ed   : > { %v10361_v32 = vunpack.i.h.bf16 %v10359_v37  ;;  %v10360_v58 = vunpack.i.l.bf16 %v10359_v37 }
 0x2ee   : > { %10513 = vrot.lane.b32.xlu0 %v12221_v35, %s10822_s12  ;;  %10508 = vrot.lane.b32.xlu1 %v12221_v35, %s10820_s26 }
 0x2ef   : > { %v6878_v56 = vsel %vm6876_vm8, %v10360_v58, %v10361_v32 }
 0x2f0   : > { %v10364_v63 = vpop.permute.xlu0 %10363  ;;  %v12235_v43 = vpop.permute.xlu1 %10373 }
 0x2f1   : > { %v10366_v15 = vunpack.i.h.bf16 %v10364_v63  ;;  %v10365_v7 = vunpack.i.l.bf16 %v10364_v63 }
 0x2f2   : > { %10518 = vrot.lane.b32.xlu1 %v12221_v35, %s10815_s20 }
 0x2f3   : > { %v6620_v37 = vsel %vm6338_vm12, %v10365_v7, %v10366_v15 }
 0x2f4   : > { %v10379_v12 = vpop.permute.xlu0 %10378 }
 0x2f5   : > { %v10380_v8 = vunpack.i.l.bf16 %v10379_v12  ;;  %v10381_v17 = vunpack.i.h.bf16 %v10379_v12 }
 0x2f7   : > { %v6877_v61 = vsel %vm6876_vm8, %v10380_v8, %v10360_v58 }
 0x2f8   : > { %v10384_v26 = vpop.permute.xlu0 %10383 }
 0x2f9   : > { %v10385_v9 = vunpack.i.l.bf16 %v10384_v26  ;;  %v10386_v41 = vunpack.i.h.bf16 %v10384_v26 }
 0x2fb   : > { %v6619_v11 = vsel %vm6338_vm12, %v10385_v9, %v10365_v7 }
 0x303   : > { %v12237_v51 = vpop.permute.xlu1 %6518 }
 0x304   : > { %6529 = vst.msk [vmem:[#allocation2 + $0xb8] sm:$0xff] %vm461_vm6, %v12237_v51 }
 0x307   : > { %v12241_v53 = vpop.permute.xlu1 %10388 }
 0x30b   : > { %v12243_v49 = vpop.permute.xlu1 %10393  ;;  %v12245_v47 = vld [vmem:[#allocation2 + $0xb8] sm:$0xff] }
 0x30c   : > { %6874 = vrot.lane.b32.xlu0 %v12245_v47, %s10821_s25  ;;  %6617 = vrot.lane.b32.xlu1 %v12245_v47, %s10819_s19 }
 0x30d   : > { %v10399_v30 = vpop.permute.xlu0 %10398 }
 0x30e   : > { %v10400_v2 = vunpack.i.l.bf16 %v10399_v30  ;;  %v10401_v20 = vunpack.i.h.bf16 %v10399_v30 }
 0x30f   : > { %v10409_v6 = vpop.permute.xlu1 %10408 }
 0x310   : > { %v10411_v23 = vunpack.i.h.bf16 %v10409_v6  ;;  %v10410_v38 = vunpack.i.l.bf16 %v10409_v6  ;;  %7410 = vrot.lane.b32.xlu0 %v12245_v47, %s10822_s12  ;;  %7136 = vrot.lane.b32.xlu1 %v12245_v47, %s10820_s26  ;;  %v6621_v58 = vsel %vm6338_vm12, %v10366_v15, %v10400_v2 }
 0x311   : > { %v10404_v10 = vpop.permute.xlu0 %10403 }
 0x312   : > { %v6880_v60 = vsel %vm6876_vm8, %v10381_v17, %v10410_v38  ;;  %v10406_v14 = vunpack.i.h.bf16 %v10404_v10  ;;  %v10405_v13 = vunpack.i.l.bf16 %v10404_v10  ;;  %v6881_v34 = vsel %vm6876_vm8, %v10410_v38, %v10411_v23 }
 0x313   : > { %v10414_v59 = vpop.permute.xlu1 %10413  ;;  %v9977_v54 = vpack.c.bf16 %v6881_v34, %v6878_v56  ;;  %v9979_v22 = vpack.c.bf16 %v6880_v60, %v6877_v61  ;;  %v6542_v61 = vld [vmem:[#allocation2 + $0x50] sm:$0xff] }
 0x314   : > { %v10416_v3 = vunpack.i.h.bf16 %v10414_v59  ;;  %v10415_v24 = vunpack.i.l.bf16 %v10414_v59  ;;  %v6879_v27 = vsel %vm6876_vm8, %v10361_v32, %v10405_v13  ;;  %v6882_v28 = vsel %vm6876_vm8, %v10411_v23, %v10406_v14 }
 0x315   : > { %v12261_v4 = vpop.permute.xlu0 %10418  ;;  %9978 = vmatprep.subr.bf16.mxu1 %v9977_v54  ;;  %v12263_v50 = vpack.c.bf16 %v6882_v28, %v6879_v27 }
 0x316   : > { %v6622_v44 = vsel %vm6338_vm12, %v10386_v41, %v10415_v24  ;;  %9980 = vmatpush1.bf16.msra.mxu1 %v9979_v22  ;;  %v6623_v63 = vsel %vm6338_vm12, %v10415_v24, %v10416_v3  ;;  %v6624_v8 = vsel %vm6338_vm12, %v10416_v3, %v10401_v20 }
 0x317   : > { %v5021_v12 = vpop.permute.xlu1 %5020  ;;  %v9961_v26 = vpack.c.bf16 %v6623_v63, %v6620_v37  ;;  %v9963_v32 = vpack.c.bf16 %v6622_v44, %v6619_v11  ;;  %v12275_v6 = vpack.c.bf16 %v6624_v8, %v6621_v58 }
 0x318   : > { %v12273_v30 = vsel %vm1996_vm2, %v5021_v12, %v12211_v45 }
 0x319   : > { %v12277_v17 = vpop.permute.xlu0 %10423  ;;  %9962 = vmatprep.subr.bf16.mxu0 %v9961_v26 }
 0x31a   : > { %9964 = vmatpush1.bf16.msra.mxu0 %v9963_v32 }
 0x31d   : > { %v5019_v38 = vpop.permute.xlu0 %5018 }
 0x31e   : > { %v12282_v56 = vsel %vm1996_vm2, %v5019_v38, %v5021_v12  ;;  %5030 = vst.msk [vmem:[#allocation2 + $0x78] sm:$0xff] %vm457_vm4, %v5019_v38 }
 0x31f   : > { %v12300_v41 = vpack.i.bf16 %v12273_v30, %v12282_v56 }
 0x321   : > { %v10454_v15 = vpop.permute.xlu0 %10453 }
 0x322   : > { %v10455_v9 = vunpack.i.l.bf16 %v10454_v15  ;;  %v10456_v63 = vunpack.i.h.bf16 %v10454_v15 }
 0x325   : > { %v10464_v7 = vpop.permute.xlu0 %10463  ;;  %v6546_v45 = vld [vmem:[#allocation2 + $0x78] sm:$0xff] }
 0x326   : > { %v10465_v10 = vunpack.i.l.bf16 %v10464_v7  ;;  %v12285_v60 = vpack.i.bf16 %v6546_v45, %v6542_v61  ;;  %v10466_v32 = vunpack.i.h.bf16 %v10464_v7  ;;  %v12350_v61 = vsel %vm5521_vm5, %v10455_v9, %v10456_v63 }
 0x328   : > { %v12288_v14 = vsel %vm5521_vm5, %v10465_v10, %v10455_v9  ;;  %10528 = vrot.lane.b32.xlu0 %v12285_v60, %s10819_s19  ;;  %10523 = vrot.lane.b32.xlu1 %v12285_v60, %s10821_s25 }
 0x329   : > { %v6517_v13 = vpop.permute.xlu0 %6516 }
 0x32a   : > { %v12296_v34 = vsel %vm1996_vm2, %v6517_v13, %v12237_v51 }
 0x32c   : > { %10533 = vrot.lane.b32.xlu1 %v12285_v60, %s10820_s26  ;;  %10548 = vrot.lane.b32.xlu0 %v12300_v41, %s10821_s25 }
 0x32d   : > { %v12306_v2 = vpop.permute.xlu0 %10468 }
 0x32e   : > { %v12308_v59 = vpop.permute.xlu1 %10428 }
 0x330   : > { %10538 = vrot.lane.b32.xlu1 %v12285_v60, %s10822_s12  ;;  %10553 = vrot.lane.b32.xlu0 %v12300_v41, %s10819_s19 }
 0x331   : > { %v12314_v51 = vpop.permute.xlu0 %10483 }
 0x332   : > { %v12316_v54 = vpop.permute.xlu1 %10433  ;;  %v10485_v3 = vunpack.i.l.bf16 %v12314_v51 }
 0x334   : > { %10543 = vrot.lane.b32.xlu1 %v12285_v60, %s10815_s20  ;;  %10558 = vrot.lane.b32.xlu0 %v12300_v41, %s10820_s26 }
 0x335   : > { %v10494_v22 = vpop.permute.xlu0 %10493 }
 0x336   : > { %v10495_v24 = vunpack.i.l.bf16 %v10494_v22  ;;  %v12323_v27 = vpop.permute.xlu1 %10438  ;;  %v10496_v10 = vunpack.i.h.bf16 %v10494_v22 }
 0x338   : > { %v12326_v28 = vsel %vm4025_vm7, %v10495_v24, %v10485_v3  ;;  %10563 = vrot.lane.b32.xlu0 %v12300_v41, %s10822_s12 }
 0x339   : > { %13415 = vst [vmem:[#allocation6_spill] sm:$0xff] %v12326_v28 }
 0x33a   : > { %v12330_v20 = vpop.permute.xlu1 %10443 }
 0x33c   : > { %10568 = vrot.lane.b32.xlu0 %v12300_v41, %s10815_s20 }
 0x33e   : > { %v6515_v11 = vpop.permute.xlu1 %6514 }
 0x33f   : > { %v12335_v44 = vsel %vm1996_vm2, %v6515_v11, %v6517_v13  ;;  %6526 = vst.msk [vmem:[#allocation2 + $0xa0] sm:$0xff] %vm457_vm4, %v6515_v11  ;;  %v13392_v11 = vunpack.i.h.bf16 %v12314_v51  ;;  %vm7138_vm2 = vcmask 449536  }
 0x342   : > { %v12338_v37 = vpop.permute.xlu1 %10448 }
 0x346   : > { %v10459_v12 = vpop.permute.xlu1 %10458  ;;  %v12340_v26 = vld [vmem:[#allocation2 + $0xa0] sm:$0xff] }
 0x347   : > { %v10461_v58 = vunpack.i.h.bf16 %v10459_v12  ;;  %v10460_v8 = vunpack.i.l.bf16 %v10459_v12  ;;  %6611 = vrot.lane.b32.xlu0 %v12340_v26, %s10819_s19  ;;  %6868 = vrot.lane.b32.xlu1 %v12340_v26, %s10821_s25 }
 0x349   : > { %v12347_v38 = vsel %vm5521_vm5, %v10466_v32, %v10460_v8  ;;  %v12353_v15 = vsel %vm5521_vm5, %v10460_v8, %v10461_v58 }
 0x34a   : > { %v12357_v45 = vpop.permute.xlu1 %10473 }
 0x34b   : > { %7130 = vrot.lane.b32.xlu0 %v12340_v26, %s10820_s26  ;;  %7678 = vrot.lane.b32.xlu1 %v12340_v26, %s10815_s20  ;;  %v13394_v55 = vunpack.i.h.bf16 %v12357_v45 }
 0x34e   : > { %v10479_v13 = vpop.permute.xlu1 %10478 }
 0x34f   : > { %v10481_v9 = vunpack.i.h.bf16 %v10479_v13  ;;  %v10480_v24 = vunpack.i.l.bf16 %v10479_v13  ;;  %7404 = vrot.lane.b32.xlu0 %v12340_v26, %s10822_s12  ;;  %6870 = vrot.lane.b32.xlu1 %v12335_v44, %s10821_s25 }
 0x351   : > { %v7688_v12 = vsel %vm5521_vm5, %v10456_v63, %v10480_v24  ;;  %v7691_v32 = vsel %vm5521_vm5, %v10461_v58, %v10481_v9  ;;  %v12388_v63 = vsel %vm4025_vm7, %v10485_v3, %v13392_v11  ;;  %v13393_v24 = vunpack.i.h.bf16 %v12308_v59 }
 0x352   : > { %v12372_v8 = vpop.permute.xlu1 %10488  ;;  %v12374_v7 = vpack.c.bf16 %v7691_v32, %v7688_v12  ;;  %13418 = vst [vmem:[#allocation9_spill] sm:$0xff] %v12388_v63  ;;  %v13396_v9 = vunpack.i.h.bf16 %v12323_v27 }
 0x353   : > { %v13391_v0 = vunpack.i.h.bf16 %v12372_v8  ;;  %v10490_v13 = vunpack.i.l.bf16 %v12372_v8  ;;  %6872 = vrot.lane.b32.xlu0 %v12296_v34, %s10821_s25  ;;  %6613 = vrot.lane.b32.xlu1 %v12335_v44, %s10819_s19 }
 0x354   : > { %13416 = vst [vmem:[#allocation7_spill] sm:$0xff] %v12374_v7 }
 0x355   : > { %v12383_v23 = vsel %vm4025_vm7, %v10496_v10, %v10490_v13  ;;  %v12393_v22 = vsel %vm4025_vm7, %v10490_v13, %v13391_v0  ;;  %v13395_v0 = vunpack.i.h.bf16 %v12330_v20 }
 0x356   : > { %13417 = vst [vmem:[#allocation8_spill] sm:$0xff] %v12383_v23 }
 0x357   : > { %10573 = vrot.lane.b32.xlu0 %v12180_v36, %s10808_s13  ;;  %10578 = vrot.lane.b32.xlu1 %v12300_v41, %s10808_s13 }
 0x35b   : > { %6615 = vrot.lane.b32.xlu0 %v12296_v34, %s10819_s19  ;;  %7684 = vrot.lane.b32.xlu1 %v12245_v47, %s10815_s20  ;;  %s10824_s19 = smov 8  }
 0x35c   : > { %v12407_v3 = vpop.permute.xlu0 %10503  ;;  %v12409_v10 = vpop.permute.xlu1 %10498 }
 0x35d   : > { %v10505_v12 = vunpack.i.l.bf16 %v12407_v3 }
 0x35f   : > { %10583 = vrot.lane.b32.xlu0 %v12285_v60, %s10808_s13  ;;  %7134 = vrot.lane.b32.xlu1 %v12296_v34, %s10820_s26  ;;  %v12420_v32 = vsel %vm6876_vm8, %v13393_v24, %v10505_v12 }
 0x360   : > { %v12422_v13 = vpop.permute.xlu0 %10513  ;;  %v12424_v58 = vpop.permute.xlu1 %10508 }
 0x361   : > { %v10515_v11 = vunpack.i.l.bf16 %v12422_v13  ;;  %v10510_v57 = vunpack.i.l.bf16 %v12424_v58 }
 0x363   : > { %7132 = vrot.lane.b32.xlu0 %v12335_v44, %s10820_s26  ;;  %7951 = vrot.lane.b32.xlu1 %v12340_v26, %s10808_s13  ;;  %v12437_v12 = vsel %vm7138_vm2, %v13396_v9, %v10510_v57  ;;  %v12442_v24 = vsel %vm7412_vm14, %v13395_v0, %v10515_v11  ;;  %v13420_v11 = vpack.i.bf16 %v12110_v62, %v12087_v46  ;;  %v13425_v9 = vunpack.i.h.bf16 %v12308_v59  ;;  %s10725_s26 = sshll.u32 %s10826_s18, 4  ;;  %s10726_s26 = int_to_ptr.vmem [resolvable:$false] %s10725_s26 }
 0x364   : > { %v12444_v18 = vpop.permute.xlu1 %10518  ;;  %v13422_v0 = vpack.i.bf16 %v12098_v5, %v12084_v42  ;;  %v10667_v42 = vpack.i.bf16 %v12282_v56, %v12175_v39  ;;  %v10435_v56 = vunpack.i.l.bf16 %v12316_v54  ;;  %s10727_s25 = scalar_lea.vmem %s10726_s26, 3072 }
 0x365   : > { %v10520_v31 = vunpack.i.l.bf16 %v12444_v18 }
 0x367   : > { %10588 = vrot.lane.b32.xlu0 %v12135_v1, %s10808_s13  ;;  %10598 = vrot.lane.b32.xlu1 %v12093_v48, %s10823_s22  ;;  %v12455_v57 = vsel %vm5521_vm5, %v13394_v55, %v10520_v31  ;;  %v13419_v31 = vpack.i.bf16 %v12129_v21, %v12123_v52  ;;  %v13421_v55 = vpack.i.bf16 %v12186_v40, %v12170_v19  ;;  %v10430_v19 = vunpack.i.l.bf16 %v12308_v59 }
 0x369   : > { %v6884_v7 = vsel %vm6876_vm8, %v10430_v19, %v13425_v9 }
 0x36b   : > { %10593 = vrot.lane.b32.xlu0 %v12221_v35, %s10808_s13  ;;  %10608 = vrot.lane.b32.xlu1 %v12112_v16, %s10823_s22 }
 0x36f   : > { %10603 = vrot.lane.b32.xlu0 %v12145_v25, %s10823_s22  ;;  %7408 = vrot.lane.b32.xlu1 %v12296_v34, %s10822_s12 }
 0x373   : > { %7406 = vrot.lane.b32.xlu0 %v12335_v44, %s10822_s12  ;;  %10613 = vrot.lane.b32.xlu1 %v12135_v1, %s10823_s22  ;;  %s296_s12 = sand.u32 1, %s10775_s28  }
 0x377   : > { %7957 = vrot.lane.b32.xlu0 %v12245_v47, %s10808_s13  ;;  %10623 = vrot.lane.b32.xlu1 %v12300_v41, %s10823_s22 }
 0x37b   : > { %10618 = vrot.lane.b32.xlu0 %v12180_v36, %s10823_s22  ;;  %10633 = vrot.lane.b32.xlu1 %v12221_v35, %s10823_s22 }
 0x37e   : > { %v12505_v52 = vpop.permute.xlu0 %6874  ;;  %v12507_v21 = vpop.permute.xlu1 %6617 }
 0x37f   : > { %10628 = vrot.lane.b32.xlu0 %v12285_v60, %s10823_s22  ;;  %7680 = vrot.lane.b32.xlu1 %v12335_v44, %s10815_s20 }
 0x382   : > { %v12513_v46 = vpop.permute.xlu0 %7410  ;;  %v12515_v62 = vpop.permute.xlu1 %7136 }
 0x383   : > { %7682 = vrot.lane.b32.xlu0 %v12296_v34, %s10815_s20  ;;  %8230 = vrot.lane.b32.xlu1 %v12245_v47, %s10823_s22  ;;  %13423 = vst [vmem:[#allocation10_spill] sm:$0xff] %v12513_v46 }
 0x387   : > { %8224 = vrot.lane.b32.xlu0 %v12340_v26, %s10823_s22  ;;  %10643 = vrot.lane.b32.xlu1 %v13419_v31, %s10824_s19 }
 0x38b   : > { %10638 = vrot.lane.b32.xlu0 %v13420_v11, %s10824_s19  ;;  %10653 = vrot.lane.b32.xlu1 %v13421_v55, %s10824_s19 }
 0x38f   : > { %10648 = vrot.lane.b32.xlu0 %v13422_v0, %s10824_s19  ;;  %7953 = vrot.lane.b32.xlu1 %v12335_v44, %s10808_s13  ;;  %v13424_v0 = vpack.i.bf16 %v12217_v29, %v12273_v30  ;;  %v10506_v29 = vunpack.i.h.bf16 %v12407_v3 }
 0x393   : > { %7955 = vrot.lane.b32.xlu0 %v12296_v34, %s10808_s13  ;;  %10663 = vrot.lane.b32.xlu1 %v12112_v16, %s10824_s19  ;;  %s10825_s13 = smov 7  }
 0x397   : > { %10658 = vrot.lane.b32.xlu0 %v13424_v0, %s10824_s19  ;;  %10673 = vrot.lane.b32.xlu1 %v12285_v60, %s10824_s19 }
 0x39a   : > { %v10529_v5 = vpop.permute.xlu0 %10528  ;;  %v10524_v55 = vpop.permute.xlu1 %10523 }
 0x39b   : > { %10668 = vrot.lane.b32.xlu0 %v10667_v42, %s10824_s19  ;;  %8504 = vrot.lane.b32.xlu1 %v12245_v47, %s10824_s19  ;;  %v10525_v40 = vunpack.i.l.bf16 %v10524_v55  ;;  %v10526_v30 = vunpack.i.h.bf16 %v10524_v55  ;;  %v10530_v42 = vunpack.i.l.bf16 %v10529_v5  ;;  %v10531_v63 = vunpack.i.h.bf16 %v10529_v5 }
 0x39d   : > { %v6883_v3 = vsel %vm6876_vm8, %v10525_v40, %v10430_v19  ;;  %v6625_v19 = vsel %vm6338_vm12, %v10530_v42, %v10435_v56 }
 0x39e   : > { %v10549_v31 = vpop.permute.xlu0 %10548 }
 0x39f   : > { %v10551_v11 = vunpack.i.h.bf16 %v10549_v31  ;;  %v10550_v0 = vunpack.i.l.bf16 %v10549_v31  ;;  %10678 = vrot.lane.b32.xlu0 %v12093_v48, %s10825_s13  ;;  %8228 = vrot.lane.b32.xlu1 %v12296_v34, %s10823_s22 }
 0x3a1   : > { %v6886_v55 = vsel %vm6876_vm8, %v10526_v30, %v10550_v0  ;;  %v6887_v31 = vsel %vm6876_vm8, %v10550_v0, %v10551_v11  ;;  %v6888_v48 = vsel %vm6876_vm8, %v10551_v11, %v10506_v29 }
 0x3a2   : > { %v9983_v28 = vpack.c.bf16 %v6886_v55, %v6883_v3  ;;  %v12543_v23 = vpop.permute.xlu0 %10553  ;;  %v9981_v46 = vpack.c.bf16 %v6887_v31, %v6884_v7  ;;  %v12546_v39 = vpack.c.bf16 %v6888_v48, %v12420_v32  ;;  %v13426_v7 = vunpack.i.h.bf16 %v12316_v54 }
 0x3a3   : > { %v10556_v59 = vunpack.i.h.bf16 %v12543_v23  ;;  %v10555_v9 = vunpack.i.l.bf16 %v12543_v23  ;;  %8226 = vrot.lane.b32.xlu0 %v12335_v44, %s10823_s22  ;;  %10683 = vrot.lane.b32.xlu1 %v12145_v25, %s10825_s13  ;;  %v10511_v25 = vunpack.i.h.bf16 %v12424_v58  ;;  %v10516_v58 = vunpack.i.h.bf16 %v12422_v13  ;;  %s10271_s22 = smul.u32 96, %s296_s12 }
 0x3a4   : > { %9982 = vmatprep.subr.bf16.mxu1 %v9981_v46  ;;  %v6626_v32 = vsel %vm6338_vm12, %v10435_v56, %v13426_v7  ;;  %v10390_v7 = vunpack.i.l.bf16 %v12241_v53  ;;  %v10425_v23 = vunpack.i.l.bf16 %v12277_v17 }
 0x3a5   : > { %v6628_v40 = vsel %vm6338_vm12, %v10531_v63, %v10555_v9  ;;  %9984 = vmatpush1.bf16.msra.mxu1 %v9983_v28  ;;  %v6629_v5 = vsel %vm6338_vm12, %v10555_v9, %v10556_v59  ;;  %v12570_v28 = vpop.permute.xlu1 %10533  ;;  %v13403_v9 = vunpack.i.h.bf16 %v12233_v33 }
 0x3a6   : > { %v9967_v29 = vpack.c.bf16 %v6628_v40, %v6625_v19  ;;  %v12562_v30 = vpop.permute.xlu0 %10558  ;;  %v9965_v11 = vpack.c.bf16 %v6629_v5, %v6626_v32  ;;  %v10370_v19 = vunpack.i.l.bf16 %v12233_v33  ;;  %v10391_v5 = vunpack.i.h.bf16 %v12241_v53 }
 0x3a7   : > { %v10561_v46 = vunpack.i.h.bf16 %v12562_v30  ;;  %10688 = vrot.lane.b32.xlu0 %v12112_v16, %s10825_s13  ;;  %10698 = vrot.lane.b32.xlu1 %v12300_v41, %s10825_s13  ;;  %v10560_v32 = vunpack.i.l.bf16 %v12562_v30 }
 0x3a8   : > { %9966 = vmatprep.subr.bf16.mxu0 %v9965_v11  ;;  %v9011_v11 = vld [vmem:[%s13378_s7 + $0x10] sm:$0xff]  ;;  %v7140_v53 = vsel %vm7138_vm2, %v10370_v19, %v13403_v9  ;;  %v7139_v30 = vsel %vm7138_vm2, %v10390_v7, %v10370_v19 }
 0x3a9   : > { %9968 = vmatpush1.bf16.msra.mxu0 %v9967_v29  ;;  %v7150_v63 = vsel %vm7138_vm2, %v10561_v46, %v10511_v25  ;;  %v12593_v13 = vpop.permute.xlu1 %10538  ;;  %v10440_v29 = vunpack.i.l.bf16 %v12323_v27 }
 0x3aa   : > { %v12573_v0 = vpop.permute.xlu0 %10563  ;;  %v12576_v56 = vpack.c.bf16 %v7150_v63, %v12437_v12  ;;  %v10521_v12 = vunpack.i.h.bf16 %v12444_v18 }
 0x3ab   : > { %v10566_v42 = vunpack.i.h.bf16 %v12573_v0  ;;  %10693 = vrot.lane.b32.xlu0 %v12180_v36, %s10825_s13  ;;  %10703 = vrot.lane.b32.xlu1 %v12285_v60, %s10825_s13 }
 0x3ad   : > { %v7424_v16 = vsel %vm7412_vm14, %v10566_v42, %v10516_v58  ;;  %v12610_v18 = vpop.permute.xlu1 %10543 }
 0x3ae   : > { %v12587_v41 = vpop.permute.xlu0 %10568  ;;  %v12590_v3 = vpack.c.bf16 %v7424_v16, %v12442_v24 }
 0x3af   : > { %v13401_v55 = vunpack.i.h.bf16 %v12587_v41  ;;  %8502 = vrot.lane.b32.xlu0 %v12296_v34, %s10824_s19  ;;  %8500 = vrot.lane.b32.xlu1 %v12335_v44, %s10824_s19 }
 0x3b1   : > { %v7697_v36 = vsel %vm5521_vm5, %v13401_v55, %v10521_v12 }
 0x3b2   : > { %v12604_v60 = vpack.c.bf16 %v7697_v36, %v12455_v57  ;;  %v12665_v36 = vld [vmem:[%s13377_s6] sm:$0xff] }
 0x3b3   : > { %8498 = vrot.lane.b32.xlu0 %v12340_v26, %s10824_s19  ;;  %8776 = vrot.lane.b32.xlu1 %v12296_v34, %s10825_s13  ;;  %v9010_v34 = vld [vmem:[%s13378_s7 + $0x8] sm:$0xff]  ;;  %s13304_s19 = scalar_lea.vmem [#allocation3], %s10271_s22 }
 0x3b4   : > { %s9083_s20 = sshll.u32 %s13304_s19, 4  ;;  %s13323_s20 = int_to_ptr.vmem [resolvable:$true] %s9083_s20 }
 0x3b5   : > { %s10721_s21 = scalar_lea.vmem %s13323_s20, 1536  ;;  %p10728_p0 = scmp.lt.s32.totalorder %s13323_s20, %s10726_s26 }
 0x3b6   : > { %p10722_p11 = scmp.ne.s32.totalorder %s13323_s20, %s10721_s21  ;;  %p10729_p1 = scmp.lt.s32.totalorder %s10727_s25, %s10721_s21 }
 0x3b7   : > { %8774 = vrot.lane.b32.xlu0 %v12335_v44, %s10825_s13  ;;  %10708 = vrot.lane.b32.xlu1 %v12135_v1, %s10825_s13  ;;  %v13402_v1 = vunpack.i.h.bf16 %v12261_v4  ;;  %v10420_v44 = vunpack.i.l.bf16 %v12261_v4 }
 0x3b8   : > { %p10723_p12 = pnand %p10722_p11, %p10911_p5  ;;  %p10730_p2 = por %p10729_p1, %p10728_p0 }
 0x3b9   : > { %v12616_v24 = vpop.permute.xlu0 %6611  ;;  %v6869_v31 = vpop.permute.xlu1 %6868  ;;  %v7143_v25 = vsel %vm7138_vm2, %v10420_v44, %v13402_v1  ;;  %v7142_v63 = vsel %vm7138_vm2, %v10391_v5, %v10420_v44  ;;  %v10536_v44 = vunpack.i.h.bf16 %v12570_v28  ;;  %v13427_v5 = vunpack.i.h.bf16 %v12323_v27  ;;  %v12685_v27 = vld [vmem:[%s13377_s6 + $0x8] sm:$0xff] }
 0x3ba   : > { %v9993_v19 = vpack.c.bf16 %v7143_v25, %v7140_v53  ;;  %v9995_v7 = vpack.c.bf16 %v7142_v63, %v7139_v30  ;;  %v12709_v30 = vld [vmem:[%s13377_s6 + $0x10] sm:$0xff]  ;;  %p10724_p13 = pneg %p10723_p12 }
 0x3bb   : > { %8772 = vrot.lane.b32.xlu0 %v12340_v26, %s10825_s13  ;;  %8778 = vrot.lane.b32.xlu1 %v12245_v47, %s10825_s13  ;;  %v9009_v47 = vld [vmem:[%s13378_s7] sm:$0xff]  ;;  %v9012_v26 = vld [vmem:[%s13378_s7 + $0x18] sm:$0xff]  ;;  %v7146_v55 = vsel %vm7138_vm2, %v10440_v29, %v13427_v5  ;;  %v7148_v1 = vsel %vm7138_vm2, %v10536_v44, %v10560_v32  ;;  %v10426_v44 = vunpack.i.h.bf16 %v12277_v17  ;;  %v10395_v5 = vunpack.i.l.bf16 %v12243_v49 }
 0x3bc   : > { %v12944_v17 = vld [vmem:[%s13377_s6 + $0x78] sm:$0xff]  ;;  %p10731_p3 = pnand %p10730_p2, %p10724_p13 }
 0x3bd   : > { %v12625_v57 = vpop.permute.xlu0 %7130  ;;  %v12627_v48 = vpop.permute.xlu1 %7678 }
 0x3bf   : > { %10713 = vrot.lane.b32.xlu0 %v12221_v35, %s10825_s13  ;;  %9020 = vperm.xlu1 %10356, %v9010_v34   ;;  %v7149_v34 = vsel %vm7138_vm2, %v10560_v32, %v10561_v46  ;;  %v10501_v32 = vunpack.i.h.bf16 %v12409_v10  ;;  %s10273_s13 = smul.u32 1536, %s10894_s9  ;;  %s13329_s9 = scalar_lea.sflag [#allocation4], %s296_s12 }
 0x3c1   : > { %v12641_v40 = vpop.permute.xlu0 %7404  ;;  %v6871_v35 = vpop.permute.xlu1 %6870  ;;  %s13321_s23 = scalar_lea.hbm %s13379_s8, %s10273_s13 }
 0x3c3   : > { %9015 = vperm.xlu0 %10355, %v9009_v47   ;;  %9030 = vperm.xlu1 %10356, %v9012_v26   ;;  %v10535_v47 = vunpack.i.l.bf16 %v12570_v28  ;;  %v6889_v26 = vsel %vm6876_vm8, %v6869_v31, %v6871_v35  ;;  %v9997_v28 = vpack.c.bf16 %v7149_v34, %v7146_v55  ;;  %v13428_v31 = vmov 0.0  }
 0x3c5   : > { %v12654_v58 = vpop.permute.xlu0 %6872  ;;  %v6614_v16 = vpop.permute.xlu1 %6613 }
 0x3c6   : > { %v6890_v12 = vsel %vm6876_vm8, %v6871_v35, %v12654_v58  ;;  %v7145_v35 = vsel %vm7138_vm2, %v10535_v47, %v10440_v29  ;;  %v12699_v29 = vld [vmem:[%s13377_s6 + $0x20] sm:$0xff] }
 0x3c7   : > { %9025 = vperm.xlu0 %10355, %v9011_v11   ;;  %6927 = vmatprep.subr.mxu1 %v6890_v12  ;;  %v10500_v11 = vunpack.i.l.bf16 %v12409_v10  ;;  %v9999_v25 = vpack.c.bf16 %v7148_v1, %v7145_v35  ;;  %v6630_v10 = vsel %vm6338_vm12, %v10556_v59, %v10501_v32  ;;  %v6631_v1 = vsel %vm6338_vm12, %v12616_v24, %v6614_v16 }
 0x3c8   : > { %6928 = vmatpush1.msra.mxu1 %v6889_v26  ;;  %v13429_v12 = vunpack.i.h.bf16 %v12316_v54  ;;  %v12729_v54 = vld [vmem:[%s13377_s6 + $0x28] sm:$0xff]  ;;  %v10375_v26 = vunpack.i.l.bf16 %v12235_v43  ;;  %v10445_v35 = vunpack.i.l.bf16 %v12330_v20 }
 0x3c9   : > { %v12675_v9 = vpop.permute.xlu0 %10573  ;;  %v12677_v46 = vpop.permute.xlu1 %10578  ;;  %9382 = vmatmul.mubr.msk.f32.vlgmr.msra.gmra.mrb[8].mxu1 %vm6649_vm15, %v12665_v36  ;;  %9994 = vmatprep.subr.bf16.mxu1 %v9993_v19  ;;  %v10396_v19 = vunpack.i.h.bf16 %v12243_v49 }
 0x3ca   : > { %9996 = vmatpush1.bf16.msra.mxu1 %v9995_v7  ;;  %6989 = vmatprep.mubr.f32.mxu1 %v13428_v31  ;;  %v6627_v34 = vsel %vm6338_vm12, %v13429_v12, %v10500_v11  ;;  %v10565_v7 = vunpack.i.l.bf16 %v12573_v0 }
 0x3cb   : > { %9998 = vmatprep.subr.bf16.mxu1 %v9997_v28  ;;  %v9973_v24 = vpack.c.bf16 %v6630_v10, %v6627_v34  ;;  %v7416_v28 = vsel %vm7412_vm14, %v10396_v19, %v10425_v23  ;;  %v10541_v34 = vunpack.i.h.bf16 %v12593_v13 }
 0x3cd   : > { %v6616_v63 = vpop.permute.xlu0 %6615  ;;  %v12690_v53 = vpop.permute.xlu1 %7684  ;;  %9383 = vmatmul.mubr.msk.f32.gmra.mrb[10].mxu1 %vm6649_vm15, %v12685_v27 }
 0x3ce   : > { %10000 = vmatpush1.bf16.msra.mxu1 %v9999_v25  ;;  %v6632_v55 = vsel %vm6338_vm12, %v6614_v16, %v6616_v63  ;;  %6995 = vmatprep.mubr.f32.mxu1 %v13428_v31  ;;  %v10376_v16 = vunpack.i.h.bf16 %v12235_v43  ;;  %v7417_v25 = vsel %vm7412_vm14, %v10425_v23, %v10426_v44  ;;  %v6633_v49 = vsel %vm6338_vm12, %v6616_v63, %v12507_v21 }
 0x3cf   : > { %6670 = vmatprep.subr.mxu0 %v6632_v55  ;;  %v7423_v21 = vsel %vm7412_vm14, %v10565_v7, %v10566_v42  ;;  %v7413_v63 = vsel %vm7412_vm14, %v10395_v5, %v10375_v26  ;;  %v10540_v23 = vunpack.i.l.bf16 %v12593_v13  ;;  %v13430_v42 = vunpack.i.h.bf16 %v12330_v20  ;;  %v12794_v20 = vld [vmem:[%s13377_s6 + $0x48] sm:$0xff] }
 0x3d0   : > { %6671 = vmatpush1.msra.mxu0 %v6631_v1  ;;  %v9372_v1 = vld [vmem:[%s13377_s6 + $0x30] sm:$0xff]  ;;  %v7414_v12 = vsel %vm7412_vm14, %v10375_v26, %v10376_v16  ;;  %v10011_v0 = vpack.c.bf16 %v7416_v28, %v7413_v63  ;;  %v7422_v5 = vsel %vm7412_vm14, %v10541_v34, %v10565_v7  ;;  %v13431_v28 = vunpack.i.h.bf16 %v12314_v51 }
 0x3d1   : > { %v12716_v47 = vpop.permute.xlu0 %10583  ;;  %v12718_v59 = vpop.permute.xlu1 %7134  ;;  %9374 = vmatmul.mubr.msk.f32.vlgmr.msra.gmra.mrb[74].mxu0 %vm6649_vm15, %v12699_v29  ;;  %9970 = vmatprep.subr.bf16.mxu0 %v12275_v6  ;;  %v7420_v26 = vsel %vm7412_vm14, %v10445_v35, %v13430_v42  ;;  %v7419_v7 = vsel %vm7412_vm14, %v10540_v23, %v10445_v35  ;;  %v12820_v51 = vld [vmem:[%s13377_s6 + $0x50] sm:$0xff]  ;;  %v10570_v42 = vunpack.i.l.bf16 %v12587_v41 }
 0x3d2   : > { %9384 = vmatmul.mubr.msk.f32.gmra.mrb[12].mxu1 %vm6649_vm15, %v12709_v30  ;;  %9972 = vmatpush3.bf16.msra.mxu0 %v12275_v6  ;;  %v12739_v6 = vld [vmem:[%s13377_s6 + $0x18] sm:$0xff]  ;;  %v10015_v63 = vpack.c.bf16 %v7422_v5, %v7419_v7  ;;  %v10545_v7 = vunpack.i.l.bf16 %v12610_v18 }
 0x3d3   : > { %9974 = vmatprep.subr.bf16.mxu0 %v9973_v24  ;;  %6732 = vmatprep.mubr.f32.mxu0 %v13428_v31 }
 0x3d4   : > { %7001 = vmatprep.mubr.f32.mxu1 %v13428_v31 }
 0x3d5   : > { %v7133_v32 = vpop.permute.xlu0 %7132  ;;  %v12745_v11 = vpop.permute.xlu1 %7951  ;;  %9375 = vmatmul.mubr.msk.f32.gmra.mrb[76].mxu0 %vm6649_vm15, %v12729_v54 }
 0x3d6   : > { %v7151_v55 = vsel %vm7138_vm2, %v12625_v57, %v7133_v32  ;;  %9385 = vmatmul.mubr.msk.f32.gmra.mrb[14].mxu1 %vm6649_vm15, %v12739_v6  ;;  %9976 = vmatpush3.bf16.msra.mxu0 %v9973_v24  ;;  %v7152_v10 = vsel %vm7138_vm2, %v7133_v32, %v12718_v59  ;;  %v12766_v57 = vld [vmem:[%s13377_s6 + $0x40] sm:$0xff]  ;;  %v10009_v24 = vpack.c.bf16 %v7417_v25, %v7414_v12 }
 0x3d7   : > { %9825 = vmatprep.subr.mxu0 %v6633_v49  ;;  %7189 = vmatprep.subr.mxu1 %v7152_v10  ;;  %v10013_v25 = vpack.c.bf16 %v7423_v21, %v7420_v26 }
 0x3d8   : > { %6738 = vmatprep.mubr.f32.mxu0 %v13428_v31  ;;  %7190 = vmatpush1.msra.mxu1 %v7151_v55  ;;  %v9373_v55 = vld [vmem:[%s13377_s6 + $0x38] sm:$0xff] }
 0x3d9   : > { %7245 = vmatprep.mubr.f32.mxu1 %v13428_v31  ;;  %v10589_v19 = vpop.permute.xlu0 %10588  ;;  %v12779_v32 = vpop.permute.xlu1 %10598  ;;  %9376 = vmatmul.mubr.msk.f32.gmra.mrb[78].mxu0 %vm6649_vm15, %v9372_v1 }
 0x3da   : > { %v10591_v10 = vunpack.i.h.bf16 %v10589_v19  ;;  %v10590_v13 = vunpack.i.l.bf16 %v10589_v19  ;;  %9394 = vmatmul.mubr.msk.f32.vlgmr.msra.gmra.mrb[8].mxu1 %vm6649_vm15, %v12766_v57  ;;  %10010 = vmatprep.subr.bf16.mxu1 %v10009_v24  ;;  %v10451_v19 = vunpack.i.h.bf16 %v12338_v37 }
 0x3db   : > { %9826 = vmatpush3.msra.mxu0 %v6633_v49  ;;  %10012 = vmatpush1.bf16.msra.mxu1 %v10011_v0  ;;  %v13432_v49 = vunpack.i.h.bf16 %v12372_v8  ;;  %v12838_v0 = vld [vmem:[%s13377_s6 + $0x58] sm:$0xff] }
 0x3dc   : > { %9986 = vmatprep.subr.bf16.mxu0 %v12263_v50  ;;  %10014 = vmatprep.subr.bf16.mxu1 %v10013_v25  ;;  %v7961_v12 = vsel %vm4025_vm7, %v13431_v28, %v10590_v13  ;;  %v13434_v25 = vunpack.i.h.bf16 %v12261_v4  ;;  %v13436_v4 = vpack.c.bf16 %v12353_v15, %v12350_v61  ;;  %v12897_v15 = vld [vmem:[%s13377_s6 + $0x68] sm:$0xff] }
 0x3dd   : > { %v7964_v21 = vsel %vm4025_vm7, %v13432_v49, %v10591_v10  ;;  %6744 = vmatprep.mubr.f32.mxu0 %v13428_v31  ;;  %7251 = vmatprep.mubr.f32.mxu1 %v13428_v31  ;;  %v12806_v34 = vpop.permute.xlu0 %10593  ;;  %v12808_v24 = vpop.permute.xlu1 %10608  ;;  %v12860_v10 = vld [vmem:[%s13377_s6 + $0x60] sm:$0xff] }
 0x3de   : > { %v12810_v35 = vpack.c.bf16 %v7964_v21, %v7961_v12  ;;  %9377 = vmatmul.mubr.msk.f32.gmra.mrb[80].mxu0 %vm6649_vm15, %v9373_v55  ;;  %9395 = vmatmul.mubr.msk.f32.gmra.mrb[10].mxu1 %vm6649_vm15, %v12794_v20  ;;  %v13437_v12 = vunpack.i.h.bf16 %v12357_v45  ;;  %v13438_v21 = vpack.c.bf16 %v12347_v38, %v12288_v14 }
 0x3df   : > { %10016 = vmatpush1.bf16.msra.mxu1 %v10015_v63  ;;  %9827 = vmatprep.mubr.msk.f32.mxu0 %vm6649_vm15, %v12699_v29  ;;  %v10450_v29 = vunpack.i.l.bf16 %v12338_v37  ;;  %v10475_v37 = vunpack.i.l.bf16 %v12357_v45  ;;  %v10471_v45 = vunpack.i.h.bf16 %v12306_v2 }
 0x3e0   : > { %7257 = vmatprep.mubr.f32.mxu1 %v13428_v31 }
 0x3e1   : > { %v12823_v8 = vpop.permute.xlu0 %10603  ;;  %v12825_v23 = vpop.permute.xlu1 %7408  ;;  %v7692_v63 = vsel %vm5521_vm5, %v10545_v7, %v10475_v37 }
 0x3e2   : > { %9828 = vmatmul.mubr.msk.f32.vlgmr.msra.gmra.mrb[82].mxu0 %vm6649_vm15, %v12729_v54  ;;  %9396 = vmatmul.mubr.msk.f32.gmra.mrb[12].mxu1 %vm6649_vm15, %v12820_v51 }
 0x3e3   : > { %9988 = vmatpush3.bf16.msra.mxu0 %v12263_v50  ;;  %7263 = vmatprep.mubr.f32.mxu1 %v13428_v31 }
 0x3e4   : > { %9990 = vmatprep.subr.bf16.mxu0 %v12546_v39  ;;  %9830 = vmatprep.mubr.msk.f32.mxu0 %vm6649_vm15, %v9372_v1  ;;  %v6891_v1 = vsel %vm6876_vm8, %v12654_v58, %v12505_v52  ;;  %v10546_v58 = vunpack.i.h.bf16 %v12610_v18  ;;  %v7693_v18 = vsel %vm5521_vm5, %v10475_v37, %v13437_v12  ;;  %v10575_v37 = vunpack.i.l.bf16 %v12675_v9 }
 0x3e5   : > { %v7407_v54 = vpop.permute.xlu0 %7406  ;;  %v12843_v26 = vpop.permute.xlu1 %10613 }
 0x3e6   : > { %v7425_v50 = vsel %vm7412_vm14, %v12641_v40, %v7407_v54  ;;  %9397 = vmatmul.mubr.msk.f32.gmra.mrb[14].mxu1 %vm6649_vm15, %v12838_v0  ;;  %9831 = vmatmul.mubr.msk.f32.gmra.mrb[84].mxu0 %vm6649_vm15, %v9373_v55  ;;  %v7426_v5 = vsel %vm7412_vm14, %v7407_v54, %v12825_v23  ;;  %v13433_v40 = vunpack.i.h.bf16 %v12233_v33  ;;  %v7144_v55 = vsel %vm7138_vm2, %v13434_v25, %v10451_v19  ;;  %v13439_v25 = vld [vmem:[#allocation9_spill] sm:$0xff] }
 0x3e7   : > { %9992 = vmatpush3.bf16.msra.mxu0 %v12546_v39  ;;  %7463 = vmatprep.subr.mxu1 %v7426_v5  ;;  %v13435_v39 = vunpack.i.h.bf16 %v12587_v41  ;;  %v7695_v49 = vsel %vm5521_vm5, %v10546_v58, %v10570_v42  ;;  %v7418_v54 = vsel %vm7412_vm14, %v10426_v44, %v10471_v45  ;;  %v13441_v58 = vld [vmem:[#allocation10_spill] sm:$0xff] }
 0x3e8   : > { %v7141_v13 = vsel %vm7138_vm2, %v13433_v40, %v10450_v29  ;;  %9841 = vmatprep.subr.mxu0 %v6891_v1  ;;  %7464 = vmatpush1.msra.mxu1 %v7425_v50  ;;  %v10031_v19 = vpack.c.bf16 %v7695_v49, %v7692_v63  ;;  %v10585_v50 = vunpack.i.l.bf16 %v12716_v47  ;;  %v7427_v7 = vsel %vm7412_vm14, %v12825_v23, %v13441_v58 }
 0x3e9   : > { %v7696_v52 = vsel %vm5521_vm5, %v10570_v42, %v13435_v39  ;;  %7519 = vmatprep.mubr.f32.mxu1 %v13428_v31  ;;  %v12874_v28 = vpop.permute.xlu0 %7957  ;;  %v12876_v33 = vpop.permute.xlu1 %10623  ;;  %10026 = vmatprep.subr.bf16.mxu1 %v13436_v4  ;;  %v10001_v41 = vpack.c.bf16 %v7144_v55, %v7141_v13  ;;  %v13440_v55 = vpack.c.bf16 %v12393_v22, %v13439_v25  ;;  %v13442_v4 = vld [vmem:[#allocation8_spill] sm:$0xff]  ;;  %v13443_v22 = vld [vmem:[#allocation6_spill] sm:$0xff]  ;;  %v10601_v23 = vunpack.i.h.bf16 %v12779_v32 }
 0x3ea   : > { %9406 = vmatmul.mubr.msk.f32.vlgmr.msra.gmra.mrb[8].mxu1 %vm6649_vm15, %v12860_v10  ;;  %9843 = vmatprep.mubr.msk.f32.mxu0 %vm6649_vm15, %v12665_v36  ;;  %v10029_v61 = vpack.c.bf16 %v7696_v52, %v7693_v18  ;;  %v10470_v36 = vunpack.i.l.bf16 %v12306_v2  ;;  %v12916_v2 = vld [vmem:[%s13377_s6 + $0x70] sm:$0xff]  ;;  %v7965_v39 = vsel %vm4025_vm7, %v10585_v50, %v10575_v37  ;;  %v10600_v49 = vunpack.i.l.bf16 %v12779_v32 }
 0x3eb   : > { %9842 = vmatpush3.msra.mxu0 %v6891_v1  ;;  %10028 = vmatpush1.bf16.msra.mxu1 %v13438_v21  ;;  %v13012_v21 = vld [vmem:[%s13377_s6 + $0x90] sm:$0xff]  ;;  %v10595_v63 = vunpack.i.l.bf16 %v12806_v34  ;;  %v10626_v50 = vunpack.i.h.bf16 %v12876_v33  ;;  %v10615_v25 = vunpack.i.l.bf16 %v12843_v26 }
 0x3ec   : > { %10002 = vmatprep.subr.bf16.mxu0 %v10001_v41  ;;  %9844 = vmatmul.mubr.msk.f32.vlgmr.msra.gmra.mrb[82].mxu0 %vm6649_vm15, %v12685_v27  ;;  %v7153_v27 = vsel %vm7138_vm2, %v12718_v59, %v12515_v62  ;;  %v10581_v62 = vunpack.i.h.bf16 %v12677_v46  ;;  %v10580_v59 = vunpack.i.l.bf16 %v12677_v46  ;;  %v9426_v46 = vld [vmem:[%s13377_s6 + $0xa0] sm:$0xff] }
 0x3ed   : > { %10004 = vmatpush3.bf16.msra.mxu0 %v10001_v41  ;;  %10030 = vmatprep.subr.bf16.mxu1 %v10029_v61  ;;  %v12902_v14 = vpop.permute.xlu0 %10618  ;;  %v12904_v38 = vpop.permute.xlu1 %10633  ;;  %v13444_v41 = vpack.c.bf16 %v13442_v4, %v13443_v22  ;;  %v10606_v61 = vunpack.i.h.bf16 %v12823_v8 }
 0x3ee   : > { %10006 = vmatprep.subr.bf16.mxu0 %v12576_v56  ;;  %7525 = vmatprep.mubr.f32.mxu1 %v13428_v31  ;;  %v7969_v1 = vsel %vm4025_vm7, %v10580_v59, %v10581_v62  ;;  %v10635_v4 = vunpack.i.l.bf16 %v12904_v38 }
 0x3ef   : > { %9407 = vmatmul.mubr.msk.f32.gmra.mrb[10].mxu1 %vm6649_vm15, %v12897_v15  ;;  %9846 = vmatprep.mubr.msk.f32.mxu0 %vm6649_vm15, %v12709_v30  ;;  %v7415_v30 = vsel %vm7412_vm14, %v10376_v16, %v10470_v36 }
 0x3f0   : > { %10032 = vmatpush1.bf16.msra.mxu1 %v10031_v19  ;;  %7531 = vmatprep.mubr.f32.mxu1 %v13428_v31  ;;  %v10017_v43 = vpack.c.bf16 %v7418_v54, %v7415_v30  ;;  %v10596_v19 = vunpack.i.h.bf16 %v12806_v34  ;;  %v10621_v34 = vunpack.i.h.bf16 %v12902_v14 }
 0x3f1   : > { %10008 = vmatpush3.bf16.msra.mxu0 %v12576_v56  ;;  %v12922_v29 = vpop.permute.xlu0 %10628  ;;  %v7681_v42 = vpop.permute.xlu1 %7680  ;;  %v10576_v56 = vunpack.i.h.bf16 %v12675_v9 }
 0x3f2   : > { %9857 = vmatprep.subr.mxu0 %v7153_v27  ;;  %9847 = vmatmul.mubr.msk.f32.gmra.mrb[84].mxu0 %vm6649_vm15, %v12739_v6  ;;  %v10630_v9 = vunpack.i.l.bf16 %v12922_v29  ;;  %v8241_v32 = vsel %vm8232_vm1, %v10621_v34, %v10635_v4 }
 0x3f3   : > { %9408 = vmatmul.mubr.msk.f32.gmra.mrb[12].mxu1 %vm6649_vm15, %v12916_v2  ;;  %9859 = vmatprep.mubr.msk.f32.mxu0 %vm6649_vm15, %v12766_v57  ;;  %v10586_v57 = vunpack.i.h.bf16 %v12716_v47  ;;  %v7966_v5 = vsel %vm4025_vm7, %v10575_v37, %v10576_v56  ;;  %v9414_v47 = vld [vmem:[%s13377_s6 + $0x80] sm:$0xff] }
 0x3f4   : > { %7537 = vmatprep.mubr.f32.mxu1 %v13428_v31 }
 0x3f5   : > { %9858 = vmatpush3.msra.mxu0 %v7153_v27  ;;  %v12946_v44 = vpop.permute.xlu0 %7682  ;;  %v12948_v16 = vpop.permute.xlu1 %8230  ;;  %v7968_v52 = vsel %vm4025_vm7, %v10586_v57, %v10580_v59  ;;  %v8234_v27 = vsel %vm8232_vm1, %v10600_v49, %v10601_v23  ;;  %v10610_v59 = vunpack.i.l.bf16 %v12808_v24 }
 0x3f6   : > { %10018 = vmatprep.subr.bf16.mxu0 %v10017_v43  ;;  %9860 = vmatmul.mubr.msk.f32.vlgmr.msra.gmra.mrb[82].mxu0 %vm6649_vm15, %v12794_v20  ;;  %v7699_v6 = vsel %vm5521_vm5, %v7681_v42, %v12946_v44  ;;  %v7698_v20 = vsel %vm5521_vm5, %v12627_v48, %v7681_v42  ;;  %v10045_v48 = vpack.c.bf16 %v7969_v1, %v7966_v5  ;;  %v10620_v42 = vunpack.i.l.bf16 %v12902_v14 }
 0x3f7   : > { %9409 = vmatmul.mubr.msk.f32.gmra.mrb[14].mxu1 %vm6649_vm15, %v12944_v17  ;;  %10020 = vmatpush3.bf16.msra.mxu0 %v10017_v43  ;;  %v10047_v18 = vpack.c.bf16 %v7968_v52, %v7965_v39  ;;  %v7700_v43 = vsel %vm5521_vm5, %v12946_v44, %v12690_v53  ;;  %v10631_v53 = vunpack.i.h.bf16 %v12922_v29  ;;  %v10616_v1 = vunpack.i.h.bf16 %v12843_v26 }
 0x3f8   : > { %10022 = vmatprep.subr.bf16.mxu0 %v12590_v3  ;;  %7736 = vmatprep.subr.mxu1 %v7699_v6  ;;  %v8240_v29 = vsel %vm8232_vm1, %v10620_v42, %v10621_v34  ;;  %v10636_v26 = vunpack.i.h.bf16 %v12904_v38 }
 0x3f9   : > { %7737 = vmatpush1.msra.mxu1 %v7698_v20  ;;  %7792 = vmatprep.mubr.f32.mxu1 %v13428_v31  ;;  %v12971_v40 = vpop.permute.xlu0 %8224  ;;  %v12973_v13 = vpop.permute.xlu1 %10643  ;;  %v8238_v38 = vsel %vm8232_vm1, %v10606_v61, %v10616_v1 }
 0x3fa   : > { %10042 = vmatprep.subr.bf16.mxu1 %v13440_v55  ;;  %9862 = vmatprep.mubr.msk.f32.mxu0 %vm6649_vm15, %v12820_v51  ;;  %v12993_v51 = vld [vmem:[%s13377_s6 + $0x88] sm:$0xff]  ;;  %v8239_v55 = vsel %vm8232_vm1, %v10630_v9, %v10620_v42 }
 0x3fb   : > { %10024 = vmatpush3.bf16.msra.mxu0 %v12590_v3  ;;  %9418 = vmatmul.mubr.msk.f32.vlgmr.msra.gmra.mrb[8].mxu1 %vm6649_vm15, %v9414_v47 }
 0x3fc   : > { %9873 = vmatprep.subr.mxu0 %v7427_v7  ;;  %10044 = vmatpush1.bf16.msra.mxu1 %v13444_v41  ;;  %v8235_v41 = vsel %vm8232_vm1, %v10601_v23, %v10615_v25 }
 0x3fd   : > { %9863 = vmatmul.mubr.msk.f32.gmra.mrb[84].mxu0 %vm6649_vm15, %v12838_v0  ;;  %10046 = vmatprep.subr.bf16.mxu1 %v10045_v48  ;;  %v12997_v3 = vpop.permute.xlu0 %10638  ;;  %v12999_v12 = vpop.permute.xlu1 %10653  ;;  %v13445_v0 = vld [vmem:[#allocation7_spill] sm:$0xff]  ;;  %v10065_v23 = vpack.c.bf16 %v8238_v38, %v8235_v41 }
 0x3fe   : > { %7798 = vmatprep.mubr.f32.mxu1 %v13428_v31  ;;  %9875 = vmatprep.mubr.msk.f32.mxu0 %vm6649_vm15, %v12860_v10  ;;  %v10605_v10 = vunpack.i.l.bf16 %v12823_v8  ;;  %v8244_v8 = vsel %vm8232_vm1, %v10626_v50, %v10636_v26  ;;  %v9440_v26 = vld [vmem:[%s13377_s6 + $0xd0] sm:$0xff] }
 0x3ff   : > { %9874 = vmatpush3.msra.mxu0 %v7427_v7  ;;  %9419 = vmatmul.mubr.msk.f32.gmra.mrb[10].mxu1 %vm6649_vm15, %v12993_v51  ;;  %v9427_v7 = vld [vmem:[%s13377_s6 + $0xa8] sm:$0xff] }
 0x400   : > { %10034 = vmatprep.subr.bf16.mxu0 %v13445_v0  ;;  %10048 = vmatpush1.bf16.msra.mxu1 %v10047_v18  ;;  %v8237_v37 = vsel %vm8232_vm1, %v10605_v10, %v10606_v61  ;;  %v10640_v61 = vunpack.i.l.bf16 %v12997_v3 }
 0x401   : > { %9876 = vmatmul.mubr.msk.f32.vlgmr.msra.gmra.mrb[82].mxu0 %vm6649_vm15, %v12897_v15  ;;  %7804 = vmatprep.mubr.f32.mxu1 %v13428_v31  ;;  %v13019_v45 = vpop.permute.xlu0 %10648  ;;  %v7954_v36 = vpop.permute.xlu1 %7953  ;;  %v13033_v15 = vld [vmem:[%s13377_s6 + $0x98] sm:$0xff]  ;;  %v10057_v44 = vpack.c.bf16 %v8237_v37, %v8234_v27  ;;  %v10655_v37 = vunpack.i.l.bf16 %v12999_v12 }
 0x402   : > { %10036 = vmatpush3.bf16.msra.mxu0 %v13445_v0  ;;  %9878 = vmatprep.mubr.msk.f32.mxu0 %vm6649_vm15, %v12916_v2  ;;  %v10611_v2 = vunpack.i.h.bf16 %v12808_v24  ;;  %v10625_v24 = vunpack.i.l.bf16 %v12876_v33  ;;  %v10651_v0 = vunpack.i.h.bf16 %v13019_v45  ;;  %v9429_v27 = vld [vmem:[%s13377_s6 + $0xb8] sm:$0xff] }
 0x403   : > { %10038 = vmatprep.subr.bf16.mxu0 %v12604_v60  ;;  %9420 = vmatmul.mubr.msk.f32.gmra.mrb[12].mxu1 %vm6649_vm15, %v13012_v21 }
 0x404   : > { %7810 = vmatprep.mubr.f32.mxu1 %v13428_v31  ;;  %v8236_v57 = vsel %vm8232_vm1, %v10611_v2, %v10605_v10  ;;  %v8242_v48 = vsel %vm8232_vm1, %v10631_v53, %v10625_v24 }
 0x405   : > { %v7956_v30 = vpop.permute.xlu0 %7955  ;;  %v13041_v54 = vpop.permute.xlu1 %10663  ;;  %9879 = vmatmul.mubr.msk.f32.gmra.mrb[84].mxu0 %vm6649_vm15, %v12944_v17  ;;  %v7967_v17 = vsel %vm4025_vm7, %v10576_v56, %v10595_v63  ;;  %v7971_v56 = vsel %vm4025_vm7, %v12745_v11, %v7954_v36  ;;  %v10063_v22 = vpack.c.bf16 %v8242_v48, %v8239_v55  ;;  %v10069_v63 = vpack.c.bf16 %v8244_v8, %v8241_v32 }
 0x406   : > { %10040 = vmatpush3.bf16.msra.mxu0 %v12604_v60  ;;  %v7972_v6 = vsel %vm4025_vm7, %v7954_v36, %v7956_v30  ;;  %9891 = vmatprep.mubr.msk.f32.mxu0 %vm6649_vm15, %v9414_v47  ;;  %v7970_v60 = vsel %vm4025_vm7, %v10581_v62, %v10596_v19  ;;  %v8233_v62 = vsel %vm8232_vm1, %v10610_v59, %v10600_v49  ;;  %v9428_v49 = vld [vmem:[%s13377_s6 + $0xb0] sm:$0xff]  ;;  %v10666_v10 = vunpack.i.h.bf16 %v13041_v54 }
 0x407   : > { %9889 = vmatprep.subr.mxu0 %v7700_v43  ;;  %9421 = vmatmul.mubr.msk.f32.gmra.mrb[14].mxu1 %vm6649_vm15, %v13033_v15  ;;  %v10059_v11 = vpack.c.bf16 %v8236_v57, %v8233_v62  ;;  %v10053_v20 = vpack.c.bf16 %v7970_v60, %v7967_v17  ;;  %v8243_v47 = vsel %vm8232_vm1, %v10625_v24, %v10626_v50  ;;  %v9438_v57 = vld [vmem:[%s13377_s6 + $0xc0] sm:$0xff] }
 0x408   : > { %8009 = vmatprep.subr.mxu1 %v7972_v6  ;;  %8065 = vmatprep.mubr.f32.mxu1 %v13428_v31  ;;  %v10061_v39 = vpack.c.bf16 %v8243_v47, %v8240_v29  ;;  %v10656_v29 = vunpack.i.h.bf16 %v12999_v12  ;;  %v9439_v12 = vld [vmem:[%s13377_s6 + $0xc8] sm:$0xff] }
 0x409   : > { %8010 = vmatpush1.msra.mxu1 %v7971_v56  ;;  %v13071_v33 = vpop.permute.xlu0 %10658  ;;  %v13073_v5 = vpop.permute.xlu1 %10673 }
 0x40a   : > { %9890 = vmatpush3.msra.mxu0 %v7700_v43  ;;  %10058 = vmatprep.subr.bf16.mxu1 %v10057_v44  ;;  %v10660_v59 = vunpack.i.l.bf16 %v13071_v33  ;;  %v10661_v53 = vunpack.i.h.bf16 %v13071_v33  ;;  %v10675_v9 = vunpack.i.l.bf16 %v13073_v5 }
 0x40b   : > { %10050 = vmatprep.subr.bf16.mxu0 %v12810_v35  ;;  %9892 = vmatmul.mubr.msk.f32.vlgmr.msra.gmra.mrb[82].mxu0 %vm6649_vm15, %v12993_v51 }
 0x40c   : > { %9430 = vmatmul.mubr.msk.f32.vlgmr.msra.gmra.mrb[8].mxu1 %vm6649_vm15, %v9426_v46  ;;  %10052 = vmatpush3.bf16.msra.mxu0 %v12810_v35  ;;  %v7973_v35 = vsel %vm4025_vm7, %v7956_v30, %v12874_v28  ;;  %v10650_v28 = vunpack.i.l.bf16 %v13019_v45  ;;  %v10665_v45 = vunpack.i.l.bf16 %v13041_v54  ;;  %vm8506_vm7 = vcmask 64512  }
 0x40d   : > { %10054 = vmatprep.subr.bf16.mxu0 %v10053_v20  ;;  %10060 = vmatpush1.bf16.msra.mxu1 %v10059_v11  ;;  %v13092_v52 = vpop.permute.xlu0 %10668  ;;  %v13094_v58 = vpop.permute.xlu1 %8504  ;;  %v10641_v54 = vunpack.i.h.bf16 %v12997_v3  ;;  %v8510_v43 = vsel %vm8506_vm7, %v10666_v10, %v10651_v0  ;;  %v8518_v55 = vsel %vm8506_vm7, %v10660_v59, %v10661_v53 }
 0x40e   : > { %10062 = vmatprep.subr.bf16.mxu1 %v10061_v39  ;;  %8071 = vmatprep.mubr.f32.mxu1 %v13428_v31  ;;  %v10671_v14 = vunpack.i.h.bf16 %v13092_v52  ;;  %v10670_v36 = vunpack.i.l.bf16 %v13092_v52  ;;  %v8508_v42 = vsel %vm8506_vm7, %v10650_v28, %v10640_v61  ;;  %v8507_v6 = vsel %vm8506_vm7, %v10665_v45, %v10650_v28  ;;  %v9450_v28 = vld [vmem:[%s13377_s6 + $0xe0] sm:$0xff] }
 0x40f   : > { %9894 = vmatprep.mubr.msk.f32.mxu0 %vm6649_vm15, %v13012_v21  ;;  %v10645_v21 = vunpack.i.l.bf16 %v12973_v13  ;;  %v10075_v56 = vpack.c.bf16 %v8510_v43, %v8507_v6 }
 0x410   : > { %9431 = vmatmul.mubr.msk.f32.gmra.mrb[10].mxu1 %vm6649_vm15, %v9427_v7  ;;  %10056 = vmatpush3.bf16.msra.mxu0 %v10053_v20  ;;  %v8514_v24 = vsel %vm8506_vm7, %v10670_v36, %v10655_v37  ;;  %v8517_v60 = vsel %vm8506_vm7, %v10671_v14, %v10660_v59  ;;  %v8513_v33 = vsel %vm8506_vm7, %v10675_v9, %v10670_v36 }
 0x411   : > { %9905 = vmatprep.subr.mxu0 %v7973_v35  ;;  %10064 = vmatpush1.bf16.msra.mxu1 %v10063_v22  ;;  %v13113_v51 = vpop.permute.xlu0 %10678  ;;  %v8229_v18 = vpop.permute.xlu1 %8228  ;;  %v8511_v30 = vsel %vm8506_vm7, %v10651_v0, %v10645_v21 }
 0x412   : > { %9895 = vmatmul.mubr.msk.f32.gmra.mrb[84].mxu0 %vm6649_vm15, %v13033_v15  ;;  %8077 = vmatprep.mubr.f32.mxu1 %v13428_v31  ;;  %v10073_v50 = vpack.c.bf16 %v8511_v30, %v8508_v42  ;;  %v8247_v44 = vsel %vm8232_vm1, %v8229_v18, %v12948_v16  ;;  %v10681_v39 = vunpack.i.h.bf16 %v13113_v51  ;;  %v10680_v52 = vunpack.i.l.bf16 %v13113_v51  ;;  %v9462_v51 = vld [vmem:[%s13377_s6 + $0x100] sm:$0xff] }
 0x413   : > { %9907 = vmatprep.mubr.msk.f32.mxu0 %vm6649_vm15, %v9426_v46  ;;  %v8509_v46 = vsel %vm8506_vm7, %v10640_v61, %v10641_v54 }
 0x414   : > { %9432 = vmatmul.mubr.msk.f32.gmra.mrb[12].mxu1 %vm6649_vm15, %v9428_v49  ;;  %9906 = vmatpush3.msra.mxu0 %v7973_v35 }
 0x415   : > { %10066 = vmatprep.subr.bf16.mxu0 %v10065_v23  ;;  %8083 = vmatprep.mubr.f32.mxu1 %v13428_v31  ;;  %v8227_v19 = vpop.permute.xlu0 %8226  ;;  %v13136_v15 = vpop.permute.xlu1 %10683 }
 0x416   : > { %9908 = vmatmul.mubr.msk.f32.vlgmr.msra.gmra.mrb[82].mxu0 %vm6649_vm15, %v9427_v7  ;;  %v8245_v2 = vsel %vm8232_vm1, %v12971_v40, %v8227_v19  ;;  %v8246_v34 = vsel %vm8232_vm1, %v8227_v19, %v8229_v18  ;;  %v10646_v40 = vunpack.i.h.bf16 %v12973_v13  ;;  %v10676_v13 = vunpack.i.h.bf16 %v13073_v5  ;;  %v9441_v18 = vld [vmem:[%s13377_s6 + $0xd8] sm:$0xff] }
 0x417   : > { %10068 = vmatpush3.bf16.msra.mxu0 %v10065_v23  ;;  %8283 = vmatprep.subr.mxu1 %v8246_v34  ;;  %v10077_v5 = vpack.c.bf16 %v8517_v60, %v8514_v24  ;;  %v10686_v20 = vunpack.i.h.bf16 %v13136_v15  ;;  %v10685_v47 = vunpack.i.l.bf16 %v13136_v15  ;;  %v8515_v7 = vsel %vm8506_vm7, %v10655_v37, %v10656_v29  ;;  %v9451_v34 = vld [vmem:[%s13377_s6 + $0xe8] sm:$0xff]  ;;  %v9453_v24 = vld [vmem:[%s13377_s6 + $0xf8] sm:$0xff] }
 0x418   : > { %10070 = vmatprep.subr.bf16.mxu0 %v10069_v63  ;;  %9433 = vmatmul.mubr.msk.f32.gmra.mrb[14].mxu1 %vm6649_vm15, %v9429_v27  ;;  %v8516_v62 = vsel %vm8506_vm7, %v10676_v13, %v10671_v14  ;;  %v8512_v11 = vsel %vm8506_vm7, %v10645_v21, %v10646_v40  ;;  %v10085_v22 = vpack.c.bf16 %v8518_v55, %v8515_v7 }
 0x419   : > { %9910 = vmatprep.mubr.msk.f32.mxu0 %vm6649_vm15, %v9428_v49  ;;  %8284 = vmatpush1.msra.mxu1 %v8245_v2  ;;  %v13155_v17 = vpop.permute.xlu0 %10688  ;;  %v13157_v3 = vpop.permute.xlu1 %10698  ;;  %v10081_v25 = vpack.c.bf16 %v8512_v11, %v8509_v46  ;;  %v10079_v48 = vpack.c.bf16 %v8516_v62, %v8513_v33  ;;  %v8785_v0 = vsel %vm8780_vm3, %v10685_v47, %v10686_v20 }
 0x41a   : > { %8339 = vmatprep.mubr.f32.mxu1 %v13428_v31  ;;  %9911 = vmatmul.mubr.msk.f32.gmra.mrb[84].mxu0 %vm6649_vm15, %v9429_v27  ;;  %v10690_v4 = vunpack.i.l.bf16 %v13155_v17  ;;  %v10691_v38 = vunpack.i.h.bf16 %v13155_v17  ;;  %v8782_v21 = vsel %vm8780_vm3, %v10680_v52, %v10681_v39  ;;  %v10701_v10 = vunpack.i.h.bf16 %v13157_v3 }
 0x41b   : > { %10072 = vmatpush3.bf16.msra.mxu0 %v10069_v63  ;;  %10074 = vmatprep.subr.bf16.mxu1 %v10073_v50  ;;  %v10700_v45 = vunpack.i.l.bf16 %v13157_v3  ;;  %v10089_v63 = vpack.c.bf16 %v8785_v0, %v8782_v21  ;;  %v9452_v50 = vld [vmem:[%s13377_s6 + $0xf0] sm:$0xff] }
 0x41c   : > { %9921 = vmatprep.subr.mxu0 %v8247_v44  ;;  %9442 = vmatmul.mubr.msk.f32.vlgmr.msra.gmra.mrb[8].mxu1 %vm6649_vm15, %v9438_v57  ;;  %v8781_v61 = vsel %vm8780_vm3, %v10690_v4, %v10680_v52  ;;  %v9464_v3 = vld [vmem:[%s13377_s6 + $0x110] sm:$0xff] }
 0x41d   : > { %10076 = vmatpush1.bf16.msra.mxu1 %v10075_v56  ;;  %8345 = vmatprep.mubr.f32.mxu1 %v13428_v31  ;;  %v13178_v1 = vpop.permute.xlu0 %10693  ;;  %v13180_v16 = vpop.permute.xlu1 %10703  ;;  %v8791_v54 = vsel %vm8780_vm3, %v10700_v45, %v10701_v10 }
 0x41e   : > { %10078 = vmatprep.subr.bf16.mxu1 %v10077_v5  ;;  %9923 = vmatprep.mubr.msk.f32.mxu0 %vm6649_vm15, %v9438_v57  ;;  %v10696_v32 = vunpack.i.h.bf16 %v13178_v1  ;;  %v10695_v8 = vunpack.i.l.bf16 %v13178_v1  ;;  %v10706_v19 = vunpack.i.h.bf16 %v13180_v16  ;;  %v10705_v27 = vunpack.i.l.bf16 %v13180_v16  ;;  %v9463_v16 = vld [vmem:[%s13377_s6 + $0x108] sm:$0xff] }
 0x41f   : > { %9922 = vmatpush3.msra.mxu0 %v8247_v44 }
 0x420   : > { %10082 = vmatprep.subr.bf16.mxu0 %v10081_v25  ;;  %9443 = vmatmul.mubr.msk.f32.gmra.mrb[10].mxu1 %vm6649_vm15, %v9439_v12  ;;  %v8788_v42 = vsel %vm8780_vm3, %v10695_v8, %v10696_v32  ;;  %v8787_v43 = vsel %vm8780_vm3, %v10705_v27, %v10695_v8  ;;  %v8790_v6 = vsel %vm8780_vm3, %v10706_v19, %v10700_v45 }
 0x421   : > { %9924 = vmatmul.mubr.msk.f32.vlgmr.msra.gmra.mrb[82].mxu0 %vm6649_vm15, %v9439_v12  ;;  %10080 = vmatpush1.bf16.msra.mxu1 %v10079_v48  ;;  %v8503_v35 = vpop.permute.xlu0 %8502  ;;  %v8501_v41 = vpop.permute.xlu1 %8500  ;;  %v10093_v57 = vpack.c.bf16 %v8791_v54, %v8788_v42  ;;  %v10095_v60 = vpack.c.bf16 %v8790_v6, %v8787_v43 }
 0x422   : > { %10084 = vmatpush3.bf16.msra.mxu0 %v10081_v25  ;;  %8351 = vmatprep.mubr.f32.mxu1 %v13428_v31  ;;  %v8520_v49 = vsel %vm8506_vm7, %v8501_v41, %v8503_v35  ;;  %v8521_v23 = vsel %vm8506_vm7, %v8503_v35, %v13094_v58  ;;  %v8784_v58 = vsel %vm8780_vm3, %v10691_v38, %v10685_v47 }
 0x423   : > { %10086 = vmatprep.subr.bf16.mxu0 %v10085_v22  ;;  %9926 = vmatprep.mubr.msk.f32.mxu0 %vm6649_vm15, %v9440_v26  ;;  %v10091_v30 = vpack.c.bf16 %v8784_v58, %v8781_v61 }
 0x424   : > { %9444 = vmatmul.mubr.msk.f32.gmra.mrb[12].mxu1 %vm6649_vm15, %v9440_v26  ;;  %8557 = vmatprep.subr.mxu1 %v8520_v49 }
 0x425   : > { %9927 = vmatmul.mubr.msk.f32.gmra.mrb[84].mxu0 %vm6649_vm15, %v9441_v18  ;;  %8357 = vmatprep.mubr.f32.mxu1 %v13428_v31  ;;  %v8499_v14 = vpop.permute.xlu0 %8498  ;;  %v13224_v36 = vpop.permute.xlu1 %8776 }
 0x426   : > { %10088 = vmatpush3.bf16.msra.mxu0 %v10085_v22  ;;  %v8519_v2 = vsel %vm8506_vm7, %v8499_v14, %v8501_v41  ;;  %9939 = vmatprep.mubr.msk.f32.mxu0 %vm6649_vm15, %v9450_v28 }
 0x427   : > { %9937 = vmatprep.subr.mxu0 %v8521_v23  ;;  %8558 = vmatpush1.msra.mxu1 %v8519_v2 }
 0x428   : > { %9445 = vmatmul.mubr.msk.f32.gmra.mrb[14].mxu1 %vm6649_vm15, %v9441_v18  ;;  %10105 = vmatprep.subr.bf16.mxu1 %v10089_v63 }
 0x429   : > { %8613 = vmatprep.mubr.f32.mxu1 %v13428_v31  ;;  %v8775_v37 = vpop.permute.xlu0 %8774  ;;  %v10709_v59 = vpop.permute.xlu1 %10708 }
 0x42a   : > { %9938 = vmatpush3.msra.mxu0 %v8521_v23  ;;  %v10711_v40 = vunpack.i.h.bf16 %v10709_v59  ;;  %v10710_v17 = vunpack.i.l.bf16 %v10709_v59  ;;  %v8794_v13 = vsel %vm8780_vm3, %v8775_v37, %v13224_v36 }
 0x42b   : > { %10090 = vmatprep.subr.bf16.mxu0 %v10089_v63  ;;  %9940 = vmatmul.mubr.msk.f32.vlgmr.msra.gmra.mrb[82].mxu0 %vm6649_vm15, %v9451_v34 }
 0x42c   : > { %10092 = vmatpush1.bf16.msra.mxu0 %v10091_v30  ;;  %9454 = vmatmul.mubr.msk.f32.vlgmr.msra.gmra.mrb[8].mxu1 %vm6649_vm15, %v9450_v28  ;;  %v8783_v9 = vsel %vm8780_vm3, %v10681_v39, %v10710_v17  ;;  %v8786_v56 = vsel %vm8780_vm3, %v10686_v20, %v10711_v40  ;;  %v9465_v20 = vld [vmem:[%s13377_s6 + $0x118] sm:$0xff] }
 0x42d   : > { %10094 = vmatprep.subr.bf16.mxu0 %v10093_v57  ;;  %10108 = vmatpush1.bf16.msra.mxu1 %v10091_v30  ;;  %v8773_v53 = vpop.permute.xlu0 %8772  ;;  %v10097_v46 = vpack.c.bf16 %v8786_v56, %v8783_v9  ;;  %v8779_v12 = vpop.permute.xlu1 %8778 }
 0x42e   : > { %10106 = vmatprep.subr.bf16.mxu1 %v10093_v57  ;;  %9942 = vmatprep.mubr.msk.f32.mxu0 %vm6649_vm15, %v9452_v50  ;;  %v8793_v44 = vsel %vm8780_vm3, %v8773_v53, %v8775_v37  ;;  %v8795_v1 = vsel %vm8780_vm3, %v13224_v36, %v8779_v12 }
 0x42f   : > { %8619 = vmatprep.mubr.f32.mxu1 %v13428_v31  ;;  %9943 = vmatmul.mubr.msk.f32.gmra.mrb[84].mxu0 %vm6649_vm15, %v9453_v24 }
 0x430   : > { %10096 = vmatpush1.bf16.msra.mxu0 %v10095_v60  ;;  %9455 = vmatmul.mubr.msk.f32.gmra.mrb[10].mxu1 %vm6649_vm15, %v9451_v34 }
 0x431   : > { %8831 = vmatprep.subr.mxu0 %v8794_v13  ;;  %10109 = vmatpush1.bf16.msra.mxu1 %v10095_v60  ;;  %v10714_v29 = vpop.permute.xlu0 %10713 }
 0x432   : > { %10107 = vmatprep.subr.mxu1 %v8794_v13  ;;  %8887 = vmatprep.mubr.f32.mxu0 %v13428_v31  ;;  %v10716_v15 = vunpack.i.h.bf16 %v10714_v29  ;;  %v10715_v33 = vunpack.i.l.bf16 %v10714_v29 }
 0x433   : > { %8625 = vmatprep.mubr.f32.mxu1 %v13428_v31 }
 0x434   : > { %8832 = vmatpush1.msra.mxu0 %v8793_v44  ;;  %9456 = vmatmul.mubr.msk.f32.gmra.mrb[12].mxu1 %vm6649_vm15, %v9452_v50  ;;  %v8789_v62 = vsel %vm8780_vm3, %v10696_v32, %v10715_v33  ;;  %v8792_v5 = vsel %vm8780_vm3, %v10701_v10, %v10716_v15 }
 0x435   : > { %9466 = vmatmul.mubr.msk.f32.vlgmr.msra.gmra.mrb[86].mxu0 %vm6649_vm15, %v9462_v51  ;;  %10098 = vmatprep.subr.bf16.mxu0 %v10097_v46  ;;  %v10101_v11 = vpack.c.bf16 %v8792_v5, %v8789_v62 }
 0x436   : > { %10110 = vmatpush1.msra.mxu1 %v8793_v44  ;;  %10100 = vmatpush3.bf16.msra.mxu0 %v10097_v46 }
 0x437   : > { %8893 = vmatprep.mubr.f32.mxu0 %v13428_v31  ;;  %8631 = vmatprep.mubr.f32.mxu1 %v13428_v31 }
 0x438   : > { %9457 = vmatmul.mubr.msk.f32.gmra.mrb[14].mxu1 %vm6649_vm15, %v9453_v24  ;;  %10102 = vmatprep.subr.bf16.mxu0 %v10101_v11 }
 0x439   : > { %9467 = vmatmul.mubr.msk.f32.gmra.mrb[88].mxu0 %vm6649_vm15, %v9463_v16  ;;  %8905 = vmatprep.mubr.f32.mxu1 %v13428_v31 }
 0x43a   : > { %8899 = vmatprep.mubr.f32.mxu0 %v13428_v31  ;;  %10104 = vmatpush3.bf16.msra.mxu0 %v10101_v11 }
 0x43b   : > { %9953 = vmatprep.subr.mxu0 %v8795_v1 }
 0x43d   : > { %9468 = vmatmul.mubr.msk.f32.gmra.mrb[90].mxu0 %vm6649_vm15, %v9464_v3 }
 0x43e   : > { %9954 = vmatpush3.msra.mxu0 %v8795_v1  ;;  %9955 = vmatprep.mubr.msk.f32.mxu0 %vm6649_vm15, %v9462_v51  ;;  %v9021_v2 = vpop.permute.xlu1 %9020 }
 0x440   : > { %9469 = vmatmul.mubr.msk.f32.vlgmr.msra.gmra.mrb[14].mxu1 %vm6649_vm15, %v9465_v20 }
 0x441   : > { %9956 = vmatmul.mubr.msk.f32.vlgmr.msra.gmra.mrb[82].mxu0 %vm6649_vm15, %v9463_v16 }
 0x442   : > { %9958 = vmatprep.mubr.msk.f32.mxu0 %vm6649_vm15, %v9464_v3  ;;  %v9016_v10 = vpop.permute.xlu0 %9015  ;;  %v9031_v56 = vpop.permute.xlu1 %9030 }
 0x445   : > { %9959 = vmatmul.mubr.msk.f32.gmra.mrb[84].mxu0 %vm6649_vm15, %v9465_v20 }
 0x446   : > { %v9026_v40 = vpop.permute.xlu0 %9025 }
 0x4a4   : > { %v6728_v31 = vpop.f32.mrb[74].mxu0 }
 0x4a5   : > { %v6730_v47 = vpop.f32.mrb[75].mxu0 }
 0x4a8   : > { %v6734_v25 = vpop.f32.mrb[76].mxu0 }
 0x4a9   : > { %v6736_v55 = vpop.f32.mrb[77].mxu0 }
 0x4ac   : > { %v6740_v48 = vpop.f32.mrb[78].mxu0 }
 0x4ad   : > { %v6742_v39 = vpop.f32.mrb[79].mxu0 }
 0x4b1   : > { %v6746_v52 = vpop.f32.mrb[80].mxu0 }
 0x4b2   : > { %v6748_v7 = vpop.f32.mrb[81].mxu0 }
 0x4ff   : > { %v8615_v26 = vpop.f32.mrb[8].mxu1 }
 0x500   : > { %v10111_v4 = vadd.f32 %v8615_v26, %v6728_v31  ;;  %v8617_v22 = vpop.f32.mrb[9].mxu1 }
 0x501   : > { %v10113_v35 = vadd.f32 %v8617_v22, %v6730_v47 }
 0x503   : > { %v8621_v41 = vpop.f32.mrb[10].mxu1 }
 0x504   : > { %v10115_v38 = vadd.f32 %v8621_v41, %v6734_v25  ;;  %v8623_v18 = vpop.f32.mrb[11].mxu1 }
 0x505   : > { %v10117_v49 = vadd.f32 %v8623_v18, %v6736_v55 }
 0x507   : > { %v8627_v0 = vpop.f32.mrb[12].mxu1 }
 0x508   : > { %v8889_v28 = vpop.f32.mrb[86].mxu0  ;;  %v10119_v32 = vadd.f32 %v8627_v0, %v6740_v48  ;;  %v8629_v8 = vpop.f32.mrb[13].mxu1 }
 0x509   : > { %v10112_v23 = vadd.f32 %v10111_v4, %v8889_v28  ;;  %v8891_v21 = vpop.f32.mrb[87].mxu0  ;;  %v10121_v61 = vadd.f32 %v8629_v8, %v6742_v39 }
 0x50a   : > { %v10114_v45 = vadd.f32 %v10113_v35, %v8891_v21 }
 0x50b   : > { %v9033_v14 = vadd.f32 %v10112_v23, %v9016_v10 }
 0x50c   : > { %v9034_v36 = vadd.f32 %v10114_v45, %v9016_v10  ;;  %v8895_v63 = vpop.f32.mrb[88].mxu0 }
 0x50d   : > { %v9045_v58 = vmax.f32 %v9033_v14, 0.0  ;;  %v10116_v19 = vadd.f32 %v10115_v38, %v8895_v63  ;;  %v8897_v27 = vpop.f32.mrb[89].mxu0 }
 0x50e   : > { %v9046_v34 = vmax.f32 %v9034_v36, 0.0  ;;  %v10118_v42 = vadd.f32 %v10117_v49, %v8897_v27 }
 0x50f   : > { %9057 = vst [vmem:[%s13304_s19] sm:$0xff] %v9045_v58  ;;  %v9036_v30 = vadd.f32 %v10116_v19, %v9021_v2 }
 0x510   : > { %9058 = vst [vmem:[%s13304_s19 + $0x8] sm:$0xff] %v9046_v34  ;;  %v9037_v54 = vadd.f32 %v10118_v42, %v9021_v2  ;;  %v8901_v37 = vpop.f32.mrb[90].mxu0 }
 0x511   : > { %v9048_v59 = vmax.f32 %v9036_v30, 0.0  ;;  %v10120_v43 = vadd.f32 %v10119_v32, %v8901_v37  ;;  %v8903_v6 = vpop.f32.mrb[91].mxu0 }
 0x512   : > { %v9049_v17 = vmax.f32 %v9037_v54, 0.0  ;;  %v10122_v57 = vadd.f32 %v10121_v61, %v8903_v6 }
 0x513   : > { %9060 = vst [vmem:[%s13304_s19 + $0x18] sm:$0xff] %v9048_v59  ;;  %v9039_v50 = vadd.f32 %v10120_v43, %v9026_v40  ;;  %v8907_v24 = vpop.f32.mrb[14].mxu1 }
 0x514   : > { %9061 = vst [vmem:[%s13304_s19 + $0x20] sm:$0xff] %v9049_v17  ;;  %v9040_v60 = vadd.f32 %v10122_v57, %v9026_v40  ;;  %v10123_v53 = vadd.f32 %v8907_v24, %v6746_v52  ;;  %v9957_v13 = vpop.f32.mrb[82].mxu0  ;;  %v8909_v9 = vpop.f32.mrb[15].mxu1 }
 0x515   : > { %v9051_v44 = vmax.f32 %v9039_v50, 0.0  ;;  %v9038_v46 = vadd.f32 %v9957_v13, %v9021_v2  ;;  %v10124_v29 = vadd.f32 %v8909_v9, %v6748_v7  ;;  %v8978_v51 = vpop.f32.mrb[83].mxu0 }
 0x516   : > { %v9052_v15 = vmax.f32 %v9040_v60, 0.0  ;;  %v9042_v33 = vadd.f32 %v10123_v53, %v9031_v56  ;;  %v9035_v62 = vadd.f32 %v9016_v10, %v8978_v51 }
 0x517   : > { %9063 = vst [vmem:[%s13304_s19 + $0x30] sm:$0xff] %v9051_v44  ;;  %v9050_v5 = vmax.f32 %v9038_v46, 0.0  ;;  %v9043_v11 = vadd.f32 %v10124_v29, %v9031_v56 }
 0x518   : > { %9064 = vst [vmem:[%s13304_s19 + $0x38] sm:$0xff] %v9052_v15  ;;  %v9054_v16 = vmax.f32 %v9042_v33, 0.0  ;;  %v9047_v12 = vmax.f32 %v9035_v62, 0.0  ;;  %v9960_v3 = vpop.f32.mrb[84].mxu0 }
 0x519   : > { %9062 = vst [vmem:[%s13304_s19 + $0x28] sm:$0xff] %v9050_v5  ;;  %v9055_v1 = vmax.f32 %v9043_v11, 0.0  ;;  %v9044_v20 = vadd.f32 %v9960_v3, %v9031_v56  ;;  %v8988_v31 = vpop.f32.mrb[85].mxu0 }
 0x51a   : > { %9066 = vst [vmem:[%s13304_s19 + $0x48] sm:$0xff] %v9054_v16  ;;  %9059 = vst [vmem:[%s13304_s19 + $0x10] sm:$0xff] %v9047_v12  ;;  %v9041_v47 = vadd.f32 %v9026_v40, %v8988_v31 }
 0x51b   : > { %9067 = vst [vmem:[%s13304_s19 + $0x50] sm:$0xff] %v9055_v1  ;;  %v9056_v25 = vmax.f32 %v9044_v20, 0.0 }
 0x51c   : > { %v9053_v55 = vmax.f32 %v9041_v47, 0.0 }
 0x51d   : > { %9068 = vst [vmem:[%s13304_s19 + $0x58] sm:$0xff] %v9056_v25 }
 0x51e   : > { %9065 = vst [vmem:[%s13304_s19 + $0x40] sm:$0xff] %v9053_v55 }
 0x51f   : > { %10734 = shalt.err (!%p10731_p3)
}
 0x520   : > { %s10735_s12 = scalar_lea.hbm %s13321_s23, 1536  ;;  %s10739_s13 = scalar_lea.hbm %s13379_s8, 3072 }
 0x521   : > { %p10736_p4 = scmp.ne.s32.totalorder %s13321_s23, %s10735_s12  ;;  %p10740_p9 = scmp.lt.u32.totalorder %s13321_s23, %s13379_s8 }
 0x522   : > { %p10741_p10 = scmp.lt.u32.totalorder %s10739_s13, %s10735_s12  ;;  %p10743_p12 = scmp.lt.u32.totalorder %s10735_s12, %s13321_s23 }
 0x523   : > { %p10737_p7 = pnand %p10736_p4, %p10911_p5 }
 0x524   : > { %p10742_p11 = por %p10741_p10, %p10740_p9 }
 0x525   : > { %p10738_p8 = pneg %p10737_p7 }
 0x526   : > { %p10744_p13 = por %p10743_p12, %p10742_p11 }
 0x528   : > { %p10745_p0 = pnand %p10744_p13, %p10738_p8 }
 0x52a   : > { %10748 = shalt.err (!%p10745_p0)
}
 0x52b   : > { %s10827_s21 = smov 384  }
 0x52c   : > { %10274 = dma.vmem_to_hbm [thread:$0]  (%p10911_p5), %s13323_s20, 1536, %s13321_s23, %s13329_s9, %s10827_s21, %s10827_s21, %s10816_s10  }
 0x52d PF: > { %p10280_p1 = scmp.ge.s32.totalorder %s10783_s30, 2  ;;  %s9098_s18 = sand.u32 1, %s10771_s27  }
 0x52e   : > { %s9099_s26 = scalar_lea.sflag [#allocation4], %s9098_s18 }
 0x52f   : > { %p10277_p2 = pnand %p10280_p1, %p10915_p6 }
 0x531   : > { %10766 = dma.done.wait (!%p10277_p2), %s9099_s26, 1536  }
 0x532   : > { %10768 = vsyncadd (!%p10277_p2), %s9099_s26, 4294965760  ;;  %p18_p3 = scmp.ge.s32.totalorder %s10898_s11, 4   ;;  %s13446_s27 = smov %s10775_s28 }
 0x533   : > { %s13447_s28 = smov %s10779_s29  ;;  %s13448_s29 = smov %s10909_s14 }
 0x534   : > { %s13449_s30 = smov %s10898_s11  ;;  %20 = sbr.rel (!%p18_p3) target bundleno = 3 (0x3), region = 133 }
 0x53b   :  { %9104 = vsyncpa [#allocation4], 1 }
 0x53c   :  { %9106 = vsyncpa [#allocation4 + $0x1], 1 }

</bundles_post_ra>
